<compile_context>
chip_gen: v7x
topology: tpu7x:2x2x1
jax: 0.10.0
libtpu: 0.0.40
codegen_flags: <defaults>
</compile_context>

<pallas_src>
import jax
import jax.numpy as jnp
import numpy as np
from jax.experimental import pallas as pl
from jax.experimental.pallas import tpu as pltpu


# ---------------------------------------------------------------------------
# Fused conv1+ReLU+pool -> conv2+ReLU+pool kernel (one image per grid step)
# ---------------------------------------------------------------------------
def _fused_conv_kernel(p1_ref, w1t_ref, b1_ref, w2t_ref, b2_ref, o_ref, x2_scr):
    # p1_ref : (27, 4096)  transposed conv1 im2col; lane = r*1024+q*256+h3*16+w3
    # w1t_ref: (32, 27)    b1_ref: (32, 1)
    # w2t_ref: (64, 288)   b2_ref: (64, 1)
    # o_ref  : (64, 256)   pooled conv2 output (co, h3*16+w3), bf16
    # x2_scr : (288, 1024) transposed conv2 im2col; lane = q*256+h3*16+w3
    f32 = jnp.float32

    # ---- conv1 (transposed orientation) fused with the first 2x2/2 max-pool.
    # The four r-blocks are the four members of every 2x2 pool window, so the
    # pool is an elementwise max over aligned 1024-lane blocks.
    w1t = w1t_ref[...]                                          # (32, 27)
    m = None
    for r in range(4):
        y = jnp.dot(w1t, p1_ref[:, r * 1024:(r + 1) * 1024],
                    preferred_element_type=f32)                 # (32, 1024)
        m = y if m is None else jnp.maximum(m, y)
    # relu(max(y_r) + b) == max(relu(y_r + b)) (shared bias, monotone relu)
    pooled1 = jnp.maximum(m + b1_ref[...], 0.0)                 # (32, 1024)

    # Lane-position masks for the w3 borders of each 16-lane row group.
    w3_idx = jax.lax.broadcasted_iota(jnp.int32, (1, 256), 1) % 16
    mask_left = w3_idx > 0        # needed when the w3 shift is -1
    mask_right = w3_idx < 15      # needed when the w3 shift is +1

    def shift_lanes(v, s):
        # out[:, m] = v[:, m + s] inside the block, zero elsewhere.
        if s == 0:
            return v
        n = v.shape[1]
        z = jnp.zeros((v.shape[0], abs(s)), v.dtype)
        if s > 0:
            return jnp.concatenate([v[:, s:], z], axis=1)
        return jnp.concatenate([z, v[:, :n + s]], axis=1)

    # ---- conv2 im2col, built from 36 fully aligned (32, 256) pieces.
    # Output position (h2, w2) = (2*h3+oy, 2*w3+ox); kernel tap (dy, dx) needs
    # pooled1 at (2*h3 + a, 2*w3 + b) with a = oy+dy-1, b = ox+dx-1, which is
    # parity class (a&1, b&1) shifted by ((a-a&1)//2, (b-b&1)//2) in (h3, w3).
    for dy in range(3):
        for dx in range(3):
            row0 = (dy * 3 + dx) * 32
            for oy in range(2):
                for ox in range(2):
                    a = oy + dy - 1
                    b = ox + dx - 1
                    pa, sa = a & 1, (a - (a & 1)) // 2
                    pb, sb = b & 1, (b - (b & 1)) // 2
                    q_src = 2 * pa + pb
                    src = pooled1[:, q_src * 256:q_src * 256 + 256]
                    piece = shift_lanes(src, sa * 16 + sb)
                    if sb == -1:
                        piece = jnp.where(mask_left, piece, 0.0)
                    elif sb == 1:
                        piece = jnp.where(mask_right, piece, 0.0)
                    col0 = (2 * oy + ox) * 256
                    # sublane offset multiple of 32, lane offset multiple of
                    # 256, full 256-lane width -> unmasked aligned stores.
                    x2_scr[row0:row0 + 32, col0:col0 + 256] = piece

    # ---- conv2: one K=288 MXU matmul + bias + ReLU ----
    y2 = jnp.dot(w2t_ref[...], x2_scr[...],
                 preferred_element_type=f32)                    # (64, 1024)
    y2 = jnp.maximum(y2 + b2_ref[...], 0.0)

    # ---- second 2x2/2 max-pool: max over the four q parity blocks ----
    pooled2 = jnp.maximum(jnp.maximum(y2[:, 0:256], y2[:, 256:512]),
                          jnp.maximum(y2[:, 512:768], y2[:, 768:1024]))
    o_ref[...] = pooled2.astype(o_ref.dtype)                    # (64, 256)


def fused_convs(p1t, w1t, b1c, w2t, b2c):
    N = p1t.shape[0]
    return pl.pallas_call(
        _fused_conv_kernel,
        out_shape=jax.ShapeDtypeStruct((N, 64, 256), jnp.bfloat16),
        grid_spec=pltpu.PrefetchScalarGridSpec(
            num_scalar_prefetch=0,
            grid=(N,),
            in_specs=[
                pl.BlockSpec((None, 27, 4096), lambda n: (n, 0, 0)),
                pl.BlockSpec((32, 27), lambda n: (0, 0)),
                pl.BlockSpec((32, 1), lambda n: (0, 0)),
                pl.BlockSpec((64, 288), lambda n: (0, 0)),
                pl.BlockSpec((64, 1), lambda n: (0, 0)),
            ],
            out_specs=pl.BlockSpec((None, 64, 256), lambda n: (n, 0, 0)),
            scratch_shapes=[pltpu.VMEM((288, 1024), jnp.float32)],
        ),
        compiler_params=pltpu.CompilerParams(
            dimension_semantics=("parallel",)),      # batch: independent images
    )(p1t, w1t, b1c, w2t, b2c)


# ---------------------------------------------------------------------------
# Fused fc1(+bias+ReLU) + fc2(+bias) head, K-tiled over fc1's 16384 inputs
# ---------------------------------------------------------------------------
def _mlp_head_kernel(x_ref, w1_ref, b1_ref, w2_ref, b2_ref, o_ref, acc_ref):
    k = pl.program_id(0)

    @pl.when(k == 0)
    def _():
        acc_ref[...] = jnp.zeros_like(acc_ref)

    acc_ref[...] += jnp.dot(x_ref[...], w1_ref[...],
                            preferred_element_type=jnp.float32)

    @pl.when(k == pl.num_programs(0) - 1)
    def _():
        h = jnp.maximum(acc_ref[...] + b1_ref[...], 0.0)       # fc1 bias + ReLU
        # TODO(synk): Dropout(0.5) is identity at inference; training-mode
        # stochastic dropout (pltpu.prng_*) is not implemented here.
        o_ref[...] = (jnp.dot(h, w2_ref[...],
                              preferred_element_type=jnp.float32)
                      + b2_ref[...])                            # fused fc2


def mlp_head(x, w1, b1, w2, b2, *, tk=8192):
    N, K = x.shape
    Hf = w1.shape[1]
    M = w2.shape[1]
    assert K % tk == 0
    return pl.pallas_call(
        _mlp_head_kernel,
        out_shape=jax.ShapeDtypeStruct((N, M), jnp.float32),
        grid_spec=pltpu.PrefetchScalarGridSpec(
            num_scalar_prefetch=0,
            grid=(K // tk,),
            in_specs=[
                pl.BlockSpec((N, tk), lambda k: (0, k)),
                pl.BlockSpec((tk, Hf), lambda k: (k, 0)),
                pl.BlockSpec((1, Hf), lambda k: (0, 0)),
                pl.BlockSpec((Hf, M), lambda k: (0, 0)),
                pl.BlockSpec((1, M), lambda k: (0, 0)),
            ],
            out_specs=pl.BlockSpec((N, M), lambda k: (0, 0)),
            scratch_shapes=[pltpu.VMEM((N, Hf), jnp.float32)],
        ),
        compiler_params=pltpu.CompilerParams(
            dimension_semantics=("arbitrary",)),     # K is a reduction axis
    )(x, w1, b1, w2, b2)


# ---------------------------------------------------------------------------
# Wrapper-side layout plumbing (no FLOPs) + one-time parameter prep
# ---------------------------------------------------------------------------
def _build_p1t(x_nhwc):
    """(N, 64, 64, 3) -> (N, 27, 4096) transposed conv1 im2col (lane-dense).

    k order: (dy, dx, cin).  Lane order: r*1024 + q*256 + h3*16 + w3 with
    r = 2*(h1&1)+(w1&1), q = 2*(h2&1)+(w2&1), h2 = h1//2, h3 = h2//2 (same for
    w), so both in-kernel max-pools reduce over aligned contiguous lane blocks.
    """
    N, H, W, C = x_nhwc.shape
    xp = jnp.pad(x_nhwc, ((0, 0), (1, 1), (1, 1), (0, 0)))
    cols = [xp[:, dy:dy + H, dx:dx + W, :]
            for dy in range(3) for dx in range(3)]
    p = jnp.stack(cols, axis=1)                       # (N, 9, H, W, 3)
    p = jnp.moveaxis(p, -1, 2).reshape(N, 27, H, W)   # k = (dy, dx, cin)
    p = p.reshape(N, 27, H // 4, 2, 2, W // 4, 2, 2)  # (h3, qh, rh, w3, qw, rw)
    p = p.transpose(0, 1, 4, 7, 3, 6, 2, 5)           # (n, k, rh, rw, qh, qw, h3, w3)
    return p.reshape(N, 27, H * W)


def prepare_params(params):
    """One-time prep: transpose/flatten conv weights for the channel-on-sublane
    matmul orientation, reshape biases to columns, cast fc1 weights to bf16."""
    w1, b1, w2, b2, fw1, fb1, fw2, fb2 = params
    w1t = w1.reshape(27, 32).T            # (32, 27),  k = (dy, dx, cin)
    w2t = w2.reshape(288, 64).T           # (64, 288), k = (dy, dx, cin)
    return (w1t, b1.reshape(32, 1), w2t, b2.reshape(64, 1),
            fw1.astype(jnp.bfloat16),     # fc1 is HBM-bound: bf16 weight stream
            fb1.reshape(1, -1), fw2, fb2.reshape(1, -1))


def sign_language_cnn_forward(x_nchw, prepared):
    w1t, b1c, w2t, b2c, fw1_bf, fb1, fw2, fb2 = prepared
    x = jnp.transpose(x_nchw, (0, 2, 3, 1))           # NCHW -> NHWC (tiny)
    p1t = _build_p1t(x)                               # (N, 27, 4096)
    feats = fused_convs(p1t, w1t, b1c, w2t, b2c)      # (N, 64, 256) bf16
    h = feats.reshape(feats.shape[0], -1)             # == PyTorch NCHW flatten
    return mlp_head(h, fw1_bf, fb1, fw2, fb2)         # fc1+ReLU+(drop=id)+fc2


# ---------------------------------------------------------------------------
# Pure-JAX reference (for correctness check only)
# ---------------------------------------------------------------------------
def reference_forward(x_nchw, params):
    w1, b1, w2, b2, fw1, fb1, fw2, fb2 = params
    hp = jax.lax.Precision.HIGHEST
    x = jnp.transpose(x_nchw, (0, 2, 3, 1))

    def conv(h, w, b):
        y = jax.lax.conv_general_dilated(
            h, w, window_strides=(1, 1), padding="SAME",
            dimension_numbers=("NHWC", "HWIO", "NHWC"), precision=hp)
        return jnp.maximum(y + b, 0.0)

    def pool(h):
        return jax.lax.reduce_window(h, -jnp.inf, jax.lax.max,
                                     (1, 2, 2, 1), (1, 2, 2, 1), "VALID")

    h = pool(conv(x, w1, b1))
    h = pool(conv(h, w2, b2))
    h = jnp.transpose(h, (0, 3, 1, 2)).reshape(x.shape[0], -1)  # NCHW flatten
    # Match the kernel's deliberate bf16 storage of the conv features and the
    # fc1 weights (accumulation stays f32 in both paths).
    h = h.astype(jnp.bfloat16).astype(jnp.float32)
    fw1_q = fw1.astype(jnp.bfloat16).astype(jnp.float32)
    h = jnp.maximum(jnp.dot(h, fw1_q, precision=hp) + fb1, 0.0)
    return jnp.dot(h, fw2, precision=hp) + fb2


if __name__ == "__main__":
    key = jax.random.PRNGKey(0)
    k_in, k1, k2, k3, k4, k5, k6, k7, k8 = jax.random.split(key, 9)

    N, C, H, W = 2, 3, 64, 64        # 64x64 input is required by fc1 = 64*16*16
    num_classes = 26

    x = jax.random.normal(k_in, (N, C, H, W), jnp.float32)

    w1 = jax.random.normal(k1, (3, 3, 3, 32), jnp.float32) / np.sqrt(3 * 9)
    b1 = jax.random.normal(k2, (32,), jnp.float32) * 0.01
    w2 = jax.random.normal(k3, (3, 3, 32, 64), jnp.float32) / np.sqrt(32 * 9)
    b2 = jax.random.normal(k4, (64,), jnp.float32) * 0.01
    fw1 = jax.random.normal(k5, (64 * 16 * 16, 256), jnp.float32) / np.sqrt(64 * 16 * 16)
    fb1 = jax.random.normal(k6, (256,), jnp.float32) * 0.01
    fw2 = jax.random.normal(k7, (256, num_classes), jnp.float32) / np.sqrt(256)
    fb2 = jax.random.normal(k8, (num_classes,), jnp.float32) * 0.01

    params = (w1, b1, w2, b2, fw1, fb1, fw2, fb2)
    prepared = prepare_params(params)          # one-time host/param prep

    out = sign_language_cnn_forward(x, prepared)
    out = jax.block_until_ready(out)
    assert out.shape == (N, num_classes) and out.dtype == jnp.float32

    ref = jax.block_until_ready(reference_forward(x, params))
    np.testing.assert_allclose(np.asarray(out), np.asarray(ref),
                               rtol=1e-3, atol=1e-3)
    print("KERNEL_OK")
</pallas_src>

<mosaic_0001>
module attributes {stable_mosaic.version = 11 : i64} {
  func.func @_fused_conv_kernel(%arg0: i32, %arg1: memref<1x27x4096xf32, #tpu.memory_space<vmem>>, %arg2: memref<32x27xf32, #tpu.memory_space<vmem>>, %arg3: memref<32x1xf32, #tpu.memory_space<vmem>>, %arg4: memref<64x288xf32, #tpu.memory_space<vmem>>, %arg5: memref<64x1xf32, #tpu.memory_space<vmem>>, %arg6: memref<1x64x256xbf16, #tpu.memory_space<vmem>>, %arg7: memref<288x1024xf32, #tpu.memory_space<vmem>>) attributes {dimension_semantics = [#tpu.dimension_semantics<parallel>], iteration_bounds = array<i64: 2>, scalar_prefetch = 0 : i64, scratch_operands = 1 : i64, tpu.core_type = #tpu.core_type<tc>, window_params = [{transform_indices = @transform_0, window_bounds = array<i64: 1, 27, 4096>}, {pipeline_mode = #tpu.pipeline_mode<synchronous>, transform_indices = @transform_1, window_bounds = array<i64: 32, 27>}, {pipeline_mode = #tpu.pipeline_mode<synchronous>, transform_indices = @transform_2, window_bounds = array<i64: 32, 1>}, {pipeline_mode = #tpu.pipeline_mode<synchronous>, transform_indices = @transform_3, window_bounds = array<i64: 64, 288>}, {pipeline_mode = #tpu.pipeline_mode<synchronous>, transform_indices = @transform_4, window_bounds = array<i64: 64, 1>}, {transform_indices = @transform_5, window_bounds = array<i64: 1, 64, 256>}]} {
    %c0 = arith.constant 0 : index
    %c0_0 = arith.constant 0 : index
    %0 = vector.load %arg2[%c0, %c0_0] : memref<32x27xf32, #tpu.memory_space<vmem>>, vector<32x27xf32>
    %c0_1 = arith.constant 0 : index
    %c0_2 = arith.constant 0 : index
    %c0_3 = arith.constant 0 : index
    %1 = vector.load %arg1[%c0_1, %c0_2, %c0_3] : memref<1x27x4096xf32, #tpu.memory_space<vmem>>, vector<1x27x1024xf32>
    %2 = vector.shape_cast %1 : vector<1x27x1024xf32> to vector<27x1024xf32>
    %cst = arith.constant dense<0.000000e+00> : vector<32x1024xf32>
    %3 = tpu.matmul %0, %2, %cst {dimension_numbers = #tpu.dot_dimension_numbers<[1], [0], [0], [1], [0, 0, 1, 1], [], []>} : vector<32x27xf32>, vector<27x1024xf32>, vector<32x1024xf32> -> vector<32x1024xf32>
    %c0_4 = arith.constant 0 : index
    %c0_5 = arith.constant 0 : index
    %c1024 = arith.constant 1024 : index
    %4 = vector.load %arg1[%c0_4, %c0_5, %c1024] : memref<1x27x4096xf32, #tpu.memory_space<vmem>>, vector<1x27x1024xf32>
    %5 = vector.shape_cast %4 : vector<1x27x1024xf32> to vector<27x1024xf32>
    %cst_6 = arith.constant dense<0.000000e+00> : vector<32x1024xf32>
    %6 = tpu.matmul %0, %5, %cst_6 {dimension_numbers = #tpu.dot_dimension_numbers<[1], [0], [0], [1], [0, 0, 1, 1], [], []>} : vector<32x27xf32>, vector<27x1024xf32>, vector<32x1024xf32> -> vector<32x1024xf32>
    %7 = arith.maximumf %3, %6 : vector<32x1024xf32>
    %c0_7 = arith.constant 0 : index
    %c0_8 = arith.constant 0 : index
    %c2048 = arith.constant 2048 : index
    %8 = vector.load %arg1[%c0_7, %c0_8, %c2048] : memref<1x27x4096xf32, #tpu.memory_space<vmem>>, vector<1x27x1024xf32>
    %9 = vector.shape_cast %8 : vector<1x27x1024xf32> to vector<27x1024xf32>
    %cst_9 = arith.constant dense<0.000000e+00> : vector<32x1024xf32>
    %10 = tpu.matmul %0, %9, %cst_9 {dimension_numbers = #tpu.dot_dimension_numbers<[1], [0], [0], [1], [0, 0, 1, 1], [], []>} : vector<32x27xf32>, vector<27x1024xf32>, vector<32x1024xf32> -> vector<32x1024xf32>
    %11 = arith.maximumf %7, %10 : vector<32x1024xf32>
    %c0_10 = arith.constant 0 : index
    %c0_11 = arith.constant 0 : index
    %c3072 = arith.constant 3072 : index
    %12 = vector.load %arg1[%c0_10, %c0_11, %c3072] : memref<1x27x4096xf32, #tpu.memory_space<vmem>>, vector<1x27x1024xf32>
    %13 = vector.shape_cast %12 : vector<1x27x1024xf32> to vector<27x1024xf32>
    %cst_12 = arith.constant dense<0.000000e+00> : vector<32x1024xf32>
    %14 = tpu.matmul %0, %13, %cst_12 {dimension_numbers = #tpu.dot_dimension_numbers<[1], [0], [0], [1], [0, 0, 1, 1], [], []>} : vector<32x27xf32>, vector<27x1024xf32>, vector<32x1024xf32> -> vector<32x1024xf32>
    %15 = arith.maximumf %11, %14 : vector<32x1024xf32>
    %c0_13 = arith.constant 0 : index
    %c0_14 = arith.constant 0 : index
    %16 = vector.load %arg3[%c0_13, %c0_14] : memref<32x1xf32, #tpu.memory_space<vmem>>, vector<32x1xf32>
    %17 = vector.broadcast %16 : vector<32x1xf32> to vector<32x1024xf32>
    %18 = arith.addf %15, %17 : vector<32x1024xf32>
    %cst_15 = arith.constant 0.000000e+00 : f32
    %19 = vector.broadcast %cst_15 : f32 to vector<32x1024xf32>
    %20 = arith.maximumf %18, %19 : vector<32x1024xf32>
    %21 = tpu.iota {dimensions = array<i32: 1>} : vector<1x256xi32>
    %c16_i32 = arith.constant 16 : i32
    %c0_i32 = arith.constant 0 : i32
    %22 = arith.cmpi eq, %c16_i32, %c0_i32 : i32
    %c1_i32 = arith.constant 1 : i32
    %23 = arith.select %22, %c1_i32, %c16_i32 : i32
    %24 = vector.broadcast %23 : i32 to vector<1x256xi32>
    %25 = arith.remsi %21, %24 : vector<1x256xi32>
    %c0_i32_16 = arith.constant 0 : i32
    %26 = vector.broadcast %c0_i32_16 : i32 to vector<1x256xi32>
    %27 = arith.cmpi ne, %25, %26 : vector<1x256xi32>
    %c0_i32_17 = arith.constant 0 : i32
    %28 = vector.broadcast %c0_i32_17 : i32 to vector<1x256xi32>
    %29 = arith.cmpi slt, %25, %28 : vector<1x256xi32>
    %c0_i32_18 = arith.constant 0 : i32
    %30 = arith.cmpi slt, %23, %c0_i32_18 : i32
    %31 = vector.broadcast %30 : i1 to vector<1x256xi1>
    %32 = vector.broadcast %31 : vector<1x256xi1> to vector<1x256xi1>
    %33 = arith.xori %29, %32 : vector<1x256xi1>
    %34 = arith.andi %33, %27 : vector<1x256xi1>
    %35 = vector.broadcast %23 : i32 to vector<1x256xi32>
    %36 = arith.addi %25, %35 : vector<1x256xi32>
    %37 = arith.select %34, %36, %25 : vector<1x256xi1>, vector<1x256xi32>
    %c0_i32_19 = arith.constant 0 : i32
    %38 = vector.broadcast %c0_i32_19 : i32 to vector<1x256xi32>
    %39 = arith.cmpi sgt, %37, %38 : vector<1x256xi32>
    %c15_i32 = arith.constant 15 : i32
    %40 = vector.broadcast %c15_i32 : i32 to vector<1x256xi32>
    %41 = arith.cmpi slt, %37, %40 : vector<1x256xi32>
    %42 = vector.extract_strided_slice %20 {offsets = [0, 768], sizes = [32, 256], strides = [1, 1]} : vector<32x1024xf32> to vector<32x256xf32>
    %cst_20 = arith.constant 0.000000e+00 : f32
    %43 = vector.broadcast %cst_20 : f32 to vector<32x17xf32>
    %44 = vector.extract_strided_slice %42 {offsets = [0, 0], sizes = [32, 239], strides = [1, 1]} : vector<32x256xf32> to vector<32x239xf32>
    %45 = tpu.concatenate %43, %44 in 1 : vector<32x17xf32>, vector<32x239xf32> -> vector<32x256xf32>
    %cst_21 = arith.constant 0.000000e+00 : f32
    %46 = vector.shape_cast %39 : vector<1x256xi1> to vector<1x256xi1>
    %47 = vector.broadcast %46 : vector<1x256xi1> to vector<32x256xi1>
    %48 = vector.broadcast %cst_21 : f32 to vector<32x256xf32>
    %49 = arith.select %47, %45, %48 : vector<32x256xi1>, vector<32x256xf32>
    %c0_22 = arith.constant 0 : index
    %c0_23 = arith.constant 0 : index
    %50 = vector.load %arg7[%c0_22, %c0_23] : memref<288x1024xf32, #tpu.memory_space<vmem>>, vector<32x256xf32>
    tpu.vector_store %arg7[%c0_22, %c0_23], %49 {strides = array<i32>} : memref<288x1024xf32, #tpu.memory_space<vmem>>, vector<32x256xf32>,
    %51 = vector.extract_strided_slice %20 {offsets = [0, 512], sizes = [32, 256], strides = [1, 1]} : vector<32x1024xf32> to vector<32x256xf32>
    %cst_24 = arith.constant 0.000000e+00 : f32
    %52 = vector.broadcast %cst_24 : f32 to vector<32x16xf32>
    %53 = vector.extract_strided_slice %51 {offsets = [0, 0], sizes = [32, 240], strides = [1, 1]} : vector<32x256xf32> to vector<32x240xf32>
    %54 = tpu.concatenate %52, %53 in 1 : vector<32x16xf32>, vector<32x240xf32> -> vector<32x256xf32>
    %c0_25 = arith.constant 0 : index
    %c256 = arith.constant 256 : index
    %55 = vector.load %arg7[%c0_25, %c256] : memref<288x1024xf32, #tpu.memory_space<vmem>>, vector<32x256xf32>
    tpu.vector_store %arg7[%c0_25, %c256], %54 {strides = array<i32>} : memref<288x1024xf32, #tpu.memory_space<vmem>>, vector<32x256xf32>,
    %56 = vector.extract_strided_slice %20 {offsets = [0, 256], sizes = [32, 256], strides = [1, 1]} : vector<32x1024xf32> to vector<32x256xf32>
    %cst_26 = arith.constant 0.000000e+00 : f32
    %57 = vector.broadcast %cst_26 : f32 to vector<32x1xf32>
    %58 = vector.extract_strided_slice %56 {offsets = [0, 0], sizes = [32, 255], strides = [1, 1]} : vector<32x256xf32> to vector<32x255xf32>
    %59 = tpu.concatenate %57, %58 in 1 : vector<32x1xf32>, vector<32x255xf32> -> vector<32x256xf32>
    %cst_27 = arith.constant 0.000000e+00 : f32
    %60 = vector.shape_cast %39 : vector<1x256xi1> to vector<1x256xi1>
    %61 = vector.broadcast %60 : vector<1x256xi1> to vector<32x256xi1>
    %62 = vector.broadcast %cst_27 : f32 to vector<32x256xf32>
    %63 = arith.select %61, %59, %62 : vector<32x256xi1>, vector<32x256xf32>
    %c0_28 = arith.constant 0 : index
    %c512 = arith.constant 512 : index
    %64 = vector.load %arg7[%c0_28, %c512] : memref<288x1024xf32, #tpu.memory_space<vmem>>, vector<32x256xf32>
    tpu.vector_store %arg7[%c0_28, %c512], %63 {strides = array<i32>} : memref<288x1024xf32, #tpu.memory_space<vmem>>, vector<32x256xf32>,
    %65 = vector.extract_strided_slice %20 {offsets = [0, 0], sizes = [32, 256], strides = [1, 1]} : vector<32x1024xf32> to vector<32x256xf32>
    %c0_29 = arith.constant 0 : index
    %c768 = arith.constant 768 : index
    %66 = vector.load %arg7[%c0_29, %c768] : memref<288x1024xf32, #tpu.memory_space<vmem>>, vector<32x256xf32>
    tpu.vector_store %arg7[%c0_29, %c768], %65 {strides = array<i32>} : memref<288x1024xf32, #tpu.memory_space<vmem>>, vector<32x256xf32>,
    %67 = vector.extract_strided_slice %20 {offsets = [0, 512], sizes = [32, 256], strides = [1, 1]} : vector<32x1024xf32> to vector<32x256xf32>
    %cst_30 = arith.constant 0.000000e+00 : f32
    %68 = vector.broadcast %cst_30 : f32 to vector<32x16xf32>
    %69 = vector.extract_strided_slice %67 {offsets = [0, 0], sizes = [32, 240], strides = [1, 1]} : vector<32x256xf32> to vector<32x240xf32>
    %70 = tpu.concatenate %68, %69 in 1 : vector<32x16xf32>, vector<32x240xf32> -> vector<32x256xf32>
    %c32 = arith.constant 32 : index
    %c0_31 = arith.constant 0 : index
    %71 = vector.load %arg7[%c32, %c0_31] : memref<288x1024xf32, #tpu.memory_space<vmem>>, vector<32x256xf32>
    tpu.vector_store %arg7[%c32, %c0_31], %70 {strides = array<i32>} : memref<288x1024xf32, #tpu.memory_space<vmem>>, vector<32x256xf32>,
    %72 = vector.extract_strided_slice %20 {offsets = [0, 768], sizes = [32, 256], strides = [1, 1]} : vector<32x1024xf32> to vector<32x256xf32>
    %cst_32 = arith.constant 0.000000e+00 : f32
    %73 = vector.broadcast %cst_32 : f32 to vector<32x16xf32>
    %74 = vector.extract_strided_slice %72 {offsets = [0, 0], sizes = [32, 240], strides = [1, 1]} : vector<32x256xf32> to vector<32x240xf32>
    %75 = tpu.concatenate %73, %74 in 1 : vector<32x16xf32>, vector<32x240xf32> -> vector<32x256xf32>
    %c32_33 = arith.constant 32 : index
    %c256_34 = arith.constant 256 : index
    %76 = vector.load %arg7[%c32_33, %c256_34] : memref<288x1024xf32, #tpu.memory_space<vmem>>, vector<32x256xf32>
    tpu.vector_store %arg7[%c32_33, %c256_34], %75 {strides = array<i32>} : memref<288x1024xf32, #tpu.memory_space<vmem>>, vector<32x256xf32>,
    %77 = vector.extract_strided_slice %20 {offsets = [0, 0], sizes = [32, 256], strides = [1, 1]} : vector<32x1024xf32> to vector<32x256xf32>
    %c32_35 = arith.constant 32 : index
    %c512_36 = arith.constant 512 : index
    %78 = vector.load %arg7[%c32_35, %c512_36] : memref<288x1024xf32, #tpu.memory_space<vmem>>, vector<32x256xf32>
    tpu.vector_store %arg7[%c32_35, %c512_36], %77 {strides = array<i32>} : memref<288x1024xf32, #tpu.memory_space<vmem>>, vector<32x256xf32>,
    %79 = vector.extract_strided_slice %20 {offsets = [0, 256], sizes = [32, 256], strides = [1, 1]} : vector<32x1024xf32> to vector<32x256xf32>
    %c32_37 = arith.constant 32 : index
    %c768_38 = arith.constant 768 : index
    %80 = vector.load %arg7[%c32_37, %c768_38] : memref<288x1024xf32, #tpu.memory_space<vmem>>, vector<32x256xf32>
    tpu.vector_store %arg7[%c32_37, %c768_38], %79 {strides = array<i32>} : memref<288x1024xf32, #tpu.memory_space<vmem>>, vector<32x256xf32>,
    %81 = vector.extract_strided_slice %20 {offsets = [0, 768], sizes = [32, 256], strides = [1, 1]} : vector<32x1024xf32> to vector<32x256xf32>
    %cst_39 = arith.constant 0.000000e+00 : f32
    %82 = vector.broadcast %cst_39 : f32 to vector<32x16xf32>
    %83 = vector.extract_strided_slice %81 {offsets = [0, 0], sizes = [32, 240], strides = [1, 1]} : vector<32x256xf32> to vector<32x240xf32>
    %84 = tpu.concatenate %82, %83 in 1 : vector<32x16xf32>, vector<32x240xf32> -> vector<32x256xf32>
    %c64 = arith.constant 64 : index
    %c0_40 = arith.constant 0 : index
    %85 = vector.load %arg7[%c64, %c0_40] : memref<288x1024xf32, #tpu.memory_space<vmem>>, vector<32x256xf32>
    tpu.vector_store %arg7[%c64, %c0_40], %84 {strides = array<i32>} : memref<288x1024xf32, #tpu.memory_space<vmem>>, vector<32x256xf32>,
    %86 = vector.extract_strided_slice %20 {offsets = [0, 512], sizes = [32, 256], strides = [1, 1]} : vector<32x1024xf32> to vector<32x256xf32>
    %cst_41 = arith.constant 0.000000e+00 : f32
    %87 = vector.broadcast %cst_41 : f32 to vector<32x15xf32>
    %88 = vector.extract_strided_slice %86 {offsets = [0, 0], sizes = [32, 241], strides = [1, 1]} : vector<32x256xf32> to vector<32x241xf32>
    %89 = tpu.concatenate %87, %88 in 1 : vector<32x15xf32>, vector<32x241xf32> -> vector<32x256xf32>
    %cst_42 = arith.constant 0.000000e+00 : f32
    %90 = vector.shape_cast %41 : vector<1x256xi1> to vector<1x256xi1>
    %91 = vector.broadcast %90 : vector<1x256xi1> to vector<32x256xi1>
    %92 = vector.broadcast %cst_42 : f32 to vector<32x256xf32>
    %93 = arith.select %91, %89, %92 : vector<32x256xi1>, vector<32x256xf32>
    %c64_43 = arith.constant 64 : index
    %c256_44 = arith.constant 256 : index
    %94 = vector.load %arg7[%c64_43, %c256_44] : memref<288x1024xf32, #tpu.memory_space<vmem>>, vector<32x256xf32>
    tpu.vector_store %arg7[%c64_43, %c256_44], %93 {strides = array<i32>} : memref<288x1024xf32, #tpu.memory_space<vmem>>, vector<32x256xf32>,
    %95 = vector.extract_strided_slice %20 {offsets = [0, 256], sizes = [32, 256], strides = [1, 1]} : vector<32x1024xf32> to vector<32x256xf32>
    %c64_45 = arith.constant 64 : index
    %c512_46 = arith.constant 512 : index
    %96 = vector.load %arg7[%c64_45, %c512_46] : memref<288x1024xf32, #tpu.memory_space<vmem>>, vector<32x256xf32>
    tpu.vector_store %arg7[%c64_45, %c512_46], %95 {strides = array<i32>} : memref<288x1024xf32, #tpu.memory_space<vmem>>, vector<32x256xf32>,
    %97 = vector.extract_strided_slice %20 {offsets = [0, 0], sizes = [32, 256], strides = [1, 1]} : vector<32x1024xf32> to vector<32x256xf32>
    %cst_47 = arith.constant 0.000000e+00 : f32
    %98 = vector.broadcast %cst_47 : f32 to vector<32x1xf32>
    %99 = vector.extract_strided_slice %97 {offsets = [0, 1], sizes = [32, 255], strides = [1, 1]} : vector<32x256xf32> to vector<32x255xf32>
    %100 = tpu.concatenate %99, %98 in 1 : vector<32x255xf32>, vector<32x1xf32> -> vector<32x256xf32>
    %cst_48 = arith.constant 0.000000e+00 : f32
    %101 = vector.shape_cast %41 : vector<1x256xi1> to vector<1x256xi1>
    %102 = vector.broadcast %101 : vector<1x256xi1> to vector<32x256xi1>
    %103 = vector.broadcast %cst_48 : f32 to vector<32x256xf32>
    %104 = arith.select %102, %100, %103 : vector<32x256xi1>, vector<32x256xf32>
    %c64_49 = arith.constant 64 : index
    %c768_50 = arith.constant 768 : index
    %105 = vector.load %arg7[%c64_49, %c768_50] : memref<288x1024xf32, #tpu.memory_space<vmem>>, vector<32x256xf32>
    tpu.vector_store %arg7[%c64_49, %c768_50], %104 {strides = array<i32>} : memref<288x1024xf32, #tpu.memory_space<vmem>>, vector<32x256xf32>,
    %106 = vector.extract_strided_slice %20 {offsets = [0, 256], sizes = [32, 256], strides = [1, 1]} : vector<32x1024xf32> to vector<32x256xf32>
    %cst_51 = arith.constant 0.000000e+00 : f32
    %107 = vector.broadcast %cst_51 : f32 to vector<32x1xf32>
    %108 = vector.extract_strided_slice %106 {offsets = [0, 0], sizes = [32, 255], strides = [1, 1]} : vector<32x256xf32> to vector<32x255xf32>
    %109 = tpu.concatenate %107, %108 in 1 : vector<32x1xf32>, vector<32x255xf32> -> vector<32x256xf32>
    %cst_52 = arith.constant 0.000000e+00 : f32
    %110 = vector.shape_cast %39 : vector<1x256xi1> to vector<1x256xi1>
    %111 = vector.broadcast %110 : vector<1x256xi1> to vector<32x256xi1>
    %112 = vector.broadcast %cst_52 : f32 to vector<32x256xf32>
    %113 = arith.select %111, %109, %112 : vector<32x256xi1>, vector<32x256xf32>
    %c96 = arith.constant 96 : index
    %c0_53 = arith.constant 0 : index
    %114 = vector.load %arg7[%c96, %c0_53] : memref<288x1024xf32, #tpu.memory_space<vmem>>, vector<32x256xf32>
    tpu.vector_store %arg7[%c96, %c0_53], %113 {strides = array<i32>} : memref<288x1024xf32, #tpu.memory_space<vmem>>, vector<32x256xf32>,
    %115 = vector.extract_strided_slice %20 {offsets = [0, 0], sizes = [32, 256], strides = [1, 1]} : vector<32x1024xf32> to vector<32x256xf32>
    %c96_54 = arith.constant 96 : index
    %c256_55 = arith.constant 256 : index
    %116 = vector.load %arg7[%c96_54, %c256_55] : memref<288x1024xf32, #tpu.memory_space<vmem>>, vector<32x256xf32>
    tpu.vector_store %arg7[%c96_54, %c256_55], %115 {strides = array<i32>} : memref<288x1024xf32, #tpu.memory_space<vmem>>, vector<32x256xf32>,
    %117 = vector.extract_strided_slice %20 {offsets = [0, 768], sizes = [32, 256], strides = [1, 1]} : vector<32x1024xf32> to vector<32x256xf32>
    %cst_56 = arith.constant 0.000000e+00 : f32
    %118 = vector.broadcast %cst_56 : f32 to vector<32x1xf32>
    %119 = vector.extract_strided_slice %117 {offsets = [0, 0], sizes = [32, 255], strides = [1, 1]} : vector<32x256xf32> to vector<32x255xf32>
    %120 = tpu.concatenate %118, %119 in 1 : vector<32x1xf32>, vector<32x255xf32> -> vector<32x256xf32>
    %cst_57 = arith.constant 0.000000e+00 : f32
    %121 = vector.shape_cast %39 : vector<1x256xi1> to vector<1x256xi1>
    %122 = vector.broadcast %121 : vector<1x256xi1> to vector<32x256xi1>
    %123 = vector.broadcast %cst_57 : f32 to vector<32x256xf32>
    %124 = arith.select %122, %120, %123 : vector<32x256xi1>, vector<32x256xf32>
    %c96_58 = arith.constant 96 : index
    %c512_59 = arith.constant 512 : index
    %125 = vector.load %arg7[%c96_58, %c512_59] : memref<288x1024xf32, #tpu.memory_space<vmem>>, vector<32x256xf32>
    tpu.vector_store %arg7[%c96_58, %c512_59], %124 {strides = array<i32>} : memref<288x1024xf32, #tpu.memory_space<vmem>>, vector<32x256xf32>,
    %126 = vector.extract_strided_slice %20 {offsets = [0, 512], sizes = [32, 256], strides = [1, 1]} : vector<32x1024xf32> to vector<32x256xf32>
    %c96_60 = arith.constant 96 : index
    %c768_61 = arith.constant 768 : index
    %127 = vector.load %arg7[%c96_60, %c768_61] : memref<288x1024xf32, #tpu.memory_space<vmem>>, vector<32x256xf32>
    tpu.vector_store %arg7[%c96_60, %c768_61], %126 {strides = array<i32>} : memref<288x1024xf32, #tpu.memory_space<vmem>>, vector<32x256xf32>,
    %128 = vector.extract_strided_slice %20 {offsets = [0, 0], sizes = [32, 256], strides = [1, 1]} : vector<32x1024xf32> to vector<32x256xf32>
    %c128 = arith.constant 128 : index
    %c0_62 = arith.constant 0 : index
    %129 = vector.load %arg7[%c128, %c0_62] : memref<288x1024xf32, #tpu.memory_space<vmem>>, vector<32x256xf32>
    tpu.vector_store %arg7[%c128, %c0_62], %128 {strides = array<i32>} : memref<288x1024xf32, #tpu.memory_space<vmem>>, vector<32x256xf32>,
    %130 = vector.extract_strided_slice %20 {offsets = [0, 256], sizes = [32, 256], strides = [1, 1]} : vector<32x1024xf32> to vector<32x256xf32>
    %c128_63 = arith.constant 128 : index
    %c256_64 = arith.constant 256 : index
    %131 = vector.load %arg7[%c128_63, %c256_64] : memref<288x1024xf32, #tpu.memory_space<vmem>>, vector<32x256xf32>
    tpu.vector_store %arg7[%c128_63, %c256_64], %130 {strides = array<i32>} : memref<288x1024xf32, #tpu.memory_space<vmem>>, vector<32x256xf32>,
    %132 = vector.extract_strided_slice %20 {offsets = [0, 512], sizes = [32, 256], strides = [1, 1]} : vector<32x1024xf32> to vector<32x256xf32>
    %c128_65 = arith.constant 128 : index
    %c512_66 = arith.constant 512 : index
    %133 = vector.load %arg7[%c128_65, %c512_66] : memref<288x1024xf32, #tpu.memory_space<vmem>>, vector<32x256xf32>
    tpu.vector_store %arg7[%c128_65, %c512_66], %132 {strides = array<i32>} : memref<288x1024xf32, #tpu.memory_space<vmem>>, vector<32x256xf32>,
    %134 = vector.extract_strided_slice %20 {offsets = [0, 768], sizes = [32, 256], strides = [1, 1]} : vector<32x1024xf32> to vector<32x256xf32>
    %c128_67 = arith.constant 128 : index
    %c768_68 = arith.constant 768 : index
    %135 = vector.load %arg7[%c128_67, %c768_68] : memref<288x1024xf32, #tpu.memory_space<vmem>>, vector<32x256xf32>
    tpu.vector_store %arg7[%c128_67, %c768_68], %134 {strides = array<i32>} : memref<288x1024xf32, #tpu.memory_space<vmem>>, vector<32x256xf32>,
    %136 = vector.extract_strided_slice %20 {offsets = [0, 256], sizes = [32, 256], strides = [1, 1]} : vector<32x1024xf32> to vector<32x256xf32>
    %c160 = arith.constant 160 : index
    %c0_69 = arith.constant 0 : index
    %137 = vector.load %arg7[%c160, %c0_69] : memref<288x1024xf32, #tpu.memory_space<vmem>>, vector<32x256xf32>
    tpu.vector_store %arg7[%c160, %c0_69], %136 {strides = array<i32>} : memref<288x1024xf32, #tpu.memory_space<vmem>>, vector<32x256xf32>,
    %138 = vector.extract_strided_slice %20 {offsets = [0, 0], sizes = [32, 256], strides = [1, 1]} : vector<32x1024xf32> to vector<32x256xf32>
    %cst_70 = arith.constant 0.000000e+00 : f32
    %139 = vector.broadcast %cst_70 : f32 to vector<32x1xf32>
    %140 = vector.extract_strided_slice %138 {offsets = [0, 1], sizes = [32, 255], strides = [1, 1]} : vector<32x256xf32> to vector<32x255xf32>
    %141 = tpu.concatenate %140, %139 in 1 : vector<32x255xf32>, vector<32x1xf32> -> vector<32x256xf32>
    %cst_71 = arith.constant 0.000000e+00 : f32
    %142 = vector.shape_cast %41 : vector<1x256xi1> to vector<1x256xi1>
    %143 = vector.broadcast %142 : vector<1x256xi1> to vector<32x256xi1>
    %144 = vector.broadcast %cst_71 : f32 to vector<32x256xf32>
    %145 = arith.select %143, %141, %144 : vector<32x256xi1>, vector<32x256xf32>
    %c160_72 = arith.constant 160 : index
    %c256_73 = arith.constant 256 : index
    %146 = vector.load %arg7[%c160_72, %c256_73] : memref<288x1024xf32, #tpu.memory_space<vmem>>, vector<32x256xf32>
    tpu.vector_store %arg7[%c160_72, %c256_73], %145 {strides = array<i32>} : memref<288x1024xf32, #tpu.memory_space<vmem>>, vector<32x256xf32>,
    %147 = vector.extract_strided_slice %20 {offsets = [0, 768], sizes = [32, 256], strides = [1, 1]} : vector<32x1024xf32> to vector<32x256xf32>
    %c160_74 = arith.constant 160 : index
    %c512_75 = arith.constant 512 : index
    %148 = vector.load %arg7[%c160_74, %c512_75] : memref<288x1024xf32, #tpu.memory_space<vmem>>, vector<32x256xf32>
    tpu.vector_store %arg7[%c160_74, %c512_75], %147 {strides = array<i32>} : memref<288x1024xf32, #tpu.memory_space<vmem>>, vector<32x256xf32>,
    %149 = vector.extract_strided_slice %20 {offsets = [0, 512], sizes = [32, 256], strides = [1, 1]} : vector<32x1024xf32> to vector<32x256xf32>
    %cst_76 = arith.constant 0.000000e+00 : f32
    %150 = vector.broadcast %cst_76 : f32 to vector<32x1xf32>
    %151 = vector.extract_strided_slice %149 {offsets = [0, 1], sizes = [32, 255], strides = [1, 1]} : vector<32x256xf32> to vector<32x255xf32>
    %152 = tpu.concatenate %151, %150 in 1 : vector<32x255xf32>, vector<32x1xf32> -> vector<32x256xf32>
    %cst_77 = arith.constant 0.000000e+00 : f32
    %153 = vector.shape_cast %41 : vector<1x256xi1> to vector<1x256xi1>
    %154 = vector.broadcast %153 : vector<1x256xi1> to vector<32x256xi1>
    %155 = vector.broadcast %cst_77 : f32 to vector<32x256xf32>
    %156 = arith.select %154, %152, %155 : vector<32x256xi1>, vector<32x256xf32>
    %c160_78 = arith.constant 160 : index
    %c768_79 = arith.constant 768 : index
    %157 = vector.load %arg7[%c160_78, %c768_79] : memref<288x1024xf32, #tpu.memory_space<vmem>>, vector<32x256xf32>
    tpu.vector_store %arg7[%c160_78, %c768_79], %156 {strides = array<i32>} : memref<288x1024xf32, #tpu.memory_space<vmem>>, vector<32x256xf32>,
    %158 = vector.extract_strided_slice %20 {offsets = [0, 768], sizes = [32, 256], strides = [1, 1]} : vector<32x1024xf32> to vector<32x256xf32>
    %cst_80 = arith.constant 0.000000e+00 : f32
    %159 = vector.broadcast %cst_80 : f32 to vector<32x1xf32>
    %160 = vector.extract_strided_slice %158 {offsets = [0, 0], sizes = [32, 255], strides = [1, 1]} : vector<32x256xf32> to vector<32x255xf32>
    %161 = tpu.concatenate %159, %160 in 1 : vector<32x1xf32>, vector<32x255xf32> -> vector<32x256xf32>
    %cst_81 = arith.constant 0.000000e+00 : f32
    %162 = vector.shape_cast %39 : vector<1x256xi1> to vector<1x256xi1>
    %163 = vector.broadcast %162 : vector<1x256xi1> to vector<32x256xi1>
    %164 = vector.broadcast %cst_81 : f32 to vector<32x256xf32>
    %165 = arith.select %163, %161, %164 : vector<32x256xi1>, vector<32x256xf32>
    %c192 = arith.constant 192 : index
    %c0_82 = arith.constant 0 : index
    %166 = vector.load %arg7[%c192, %c0_82] : memref<288x1024xf32, #tpu.memory_space<vmem>>, vector<32x256xf32>
    tpu.vector_store %arg7[%c192, %c0_82], %165 {strides = array<i32>} : memref<288x1024xf32, #tpu.memory_space<vmem>>, vector<32x256xf32>,
    %167 = vector.extract_strided_slice %20 {offsets = [0, 512], sizes = [32, 256], strides = [1, 1]} : vector<32x1024xf32> to vector<32x256xf32>
    %c192_83 = arith.constant 192 : index
    %c256_84 = arith.constant 256 : index
    %168 = vector.load %arg7[%c192_83, %c256_84] : memref<288x1024xf32, #tpu.memory_space<vmem>>, vector<32x256xf32>
    tpu.vector_store %arg7[%c192_83, %c256_84], %167 {strides = array<i32>} : memref<288x1024xf32, #tpu.memory_space<vmem>>, vector<32x256xf32>,
    %169 = vector.extract_strided_slice %20 {offsets = [0, 256], sizes = [32, 256], strides = [1, 1]} : vector<32x1024xf32> to vector<32x256xf32>
    %cst_85 = arith.constant 0.000000e+00 : f32
    %170 = vector.broadcast %cst_85 : f32 to vector<32x15xf32>
    %171 = vector.extract_strided_slice %169 {offsets = [0, 15], sizes = [32, 241], strides = [1, 1]} : vector<32x256xf32> to vector<32x241xf32>
    %172 = tpu.concatenate %171, %170 in 1 : vector<32x241xf32>, vector<32x15xf32> -> vector<32x256xf32>
    %cst_86 = arith.constant 0.000000e+00 : f32
    %173 = vector.shape_cast %39 : vector<1x256xi1> to vector<1x256xi1>
    %174 = vector.broadcast %173 : vector<1x256xi1> to vector<32x256xi1>
    %175 = vector.broadcast %cst_86 : f32 to vector<32x256xf32>
    %176 = arith.select %174, %172, %175 : vector<32x256xi1>, vector<32x256xf32>
    %c192_87 = arith.constant 192 : index
    %c512_88 = arith.constant 512 : index
    %177 = vector.load %arg7[%c192_87, %c512_88] : memref<288x1024xf32, #tpu.memory_space<vmem>>, vector<32x256xf32>
    tpu.vector_store %arg7[%c192_87, %c512_88], %176 {strides = array<i32>} : memref<288x1024xf32, #tpu.memory_space<vmem>>, vector<32x256xf32>,
    %178 = vector.extract_strided_slice %20 {offsets = [0, 0], sizes = [32, 256], strides = [1, 1]} : vector<32x1024xf32> to vector<32x256xf32>
    %cst_89 = arith.constant 0.000000e+00 : f32
    %179 = vector.broadcast %cst_89 : f32 to vector<32x16xf32>
    %180 = vector.extract_strided_slice %178 {offsets = [0, 16], sizes = [32, 240], strides = [1, 1]} : vector<32x256xf32> to vector<32x240xf32>
    %181 = tpu.concatenate %180, %179 in 1 : vector<32x240xf32>, vector<32x16xf32> -> vector<32x256xf32>
    %c192_90 = arith.constant 192 : index
    %c768_91 = arith.constant 768 : index
    %182 = vector.load %arg7[%c192_90, %c768_91] : memref<288x1024xf32, #tpu.memory_space<vmem>>, vector<32x256xf32>
    tpu.vector_store %arg7[%c192_90, %c768_91], %181 {strides = array<i32>} : memref<288x1024xf32, #tpu.memory_space<vmem>>, vector<32x256xf32>,
    %183 = vector.extract_strided_slice %20 {offsets = [0, 512], sizes = [32, 256], strides = [1, 1]} : vector<32x1024xf32> to vector<32x256xf32>
    %c224 = arith.constant 224 : index
    %c0_92 = arith.constant 0 : index
    %184 = vector.load %arg7[%c224, %c0_92] : memref<288x1024xf32, #tpu.memory_space<vmem>>, vector<32x256xf32>
    tpu.vector_store %arg7[%c224, %c0_92], %183 {strides = array<i32>} : memref<288x1024xf32, #tpu.memory_space<vmem>>, vector<32x256xf32>,
    %185 = vector.extract_strided_slice %20 {offsets = [0, 768], sizes = [32, 256], strides = [1, 1]} : vector<32x1024xf32> to vector<32x256xf32>
    %c224_93 = arith.constant 224 : index
    %c256_94 = arith.constant 256 : index
    %186 = vector.load %arg7[%c224_93, %c256_94] : memref<288x1024xf32, #tpu.memory_space<vmem>>, vector<32x256xf32>
    tpu.vector_store %arg7[%c224_93, %c256_94], %185 {strides = array<i32>} : memref<288x1024xf32, #tpu.memory_space<vmem>>, vector<32x256xf32>,
    %187 = vector.extract_strided_slice %20 {offsets = [0, 0], sizes = [32, 256], strides = [1, 1]} : vector<32x1024xf32> to vector<32x256xf32>
    %cst_95 = arith.constant 0.000000e+00 : f32
    %188 = vector.broadcast %cst_95 : f32 to vector<32x16xf32>
    %189 = vector.extract_strided_slice %187 {offsets = [0, 16], sizes = [32, 240], strides = [1, 1]} : vector<32x256xf32> to vector<32x240xf32>
    %190 = tpu.concatenate %189, %188 in 1 : vector<32x240xf32>, vector<32x16xf32> -> vector<32x256xf32>
    %c224_96 = arith.constant 224 : index
    %c512_97 = arith.constant 512 : index
    %191 = vector.load %arg7[%c224_96, %c512_97] : memref<288x1024xf32, #tpu.memory_space<vmem>>, vector<32x256xf32>
    tpu.vector_store %arg7[%c224_96, %c512_97], %190 {strides = array<i32>} : memref<288x1024xf32, #tpu.memory_space<vmem>>, vector<32x256xf32>,
    %192 = vector.extract_strided_slice %20 {offsets = [0, 256], sizes = [32, 256], strides = [1, 1]} : vector<32x1024xf32> to vector<32x256xf32>
    %cst_98 = arith.constant 0.000000e+00 : f32
    %193 = vector.broadcast %cst_98 : f32 to vector<32x16xf32>
    %194 = vector.extract_strided_slice %192 {offsets = [0, 16], sizes = [32, 240], strides = [1, 1]} : vector<32x256xf32> to vector<32x240xf32>
    %195 = tpu.concatenate %194, %193 in 1 : vector<32x240xf32>, vector<32x16xf32> -> vector<32x256xf32>
    %c224_99 = arith.constant 224 : index
    %c768_100 = arith.constant 768 : index
    %196 = vector.load %arg7[%c224_99, %c768_100] : memref<288x1024xf32, #tpu.memory_space<vmem>>, vector<32x256xf32>
    tpu.vector_store %arg7[%c224_99, %c768_100], %195 {strides = array<i32>} : memref<288x1024xf32, #tpu.memory_space<vmem>>, vector<32x256xf32>,
    %197 = vector.extract_strided_slice %20 {offsets = [0, 768], sizes = [32, 256], strides = [1, 1]} : vector<32x1024xf32> to vector<32x256xf32>
    %c256_101 = arith.constant 256 : index
    %c0_102 = arith.constant 0 : index
    %198 = vector.load %arg7[%c256_101, %c0_102] : memref<288x1024xf32, #tpu.memory_space<vmem>>, vector<32x256xf32>
    tpu.vector_store %arg7[%c256_101, %c0_102], %197 {strides = array<i32>} : memref<288x1024xf32, #tpu.memory_space<vmem>>, vector<32x256xf32>,
    %199 = vector.extract_strided_slice %20 {offsets = [0, 512], sizes = [32, 256], strides = [1, 1]} : vector<32x1024xf32> to vector<32x256xf32>
    %cst_103 = arith.constant 0.000000e+00 : f32
    %200 = vector.broadcast %cst_103 : f32 to vector<32x1xf32>
    %201 = vector.extract_strided_slice %199 {offsets = [0, 1], sizes = [32, 255], strides = [1, 1]} : vector<32x256xf32> to vector<32x255xf32>
    %202 = tpu.concatenate %201, %200 in 1 : vector<32x255xf32>, vector<32x1xf32> -> vector<32x256xf32>
    %cst_104 = arith.constant 0.000000e+00 : f32
    %203 = vector.shape_cast %41 : vector<1x256xi1> to vector<1x256xi1>
    %204 = vector.broadcast %203 : vector<1x256xi1> to vector<32x256xi1>
    %205 = vector.broadcast %cst_104 : f32 to vector<32x256xf32>
    %206 = arith.select %204, %202, %205 : vector<32x256xi1>, vector<32x256xf32>
    %c256_105 = arith.constant 256 : index
    %c256_106 = arith.constant 256 : index
    %207 = vector.load %arg7[%c256_105, %c256_106] : memref<288x1024xf32, #tpu.memory_space<vmem>>, vector<32x256xf32>
    tpu.vector_store %arg7[%c256_105, %c256_106], %206 {strides = array<i32>} : memref<288x1024xf32, #tpu.memory_space<vmem>>, vector<32x256xf32>,
    %208 = vector.extract_strided_slice %20 {offsets = [0, 256], sizes = [32, 256], strides = [1, 1]} : vector<32x1024xf32> to vector<32x256xf32>
    %cst_107 = arith.constant 0.000000e+00 : f32
    %209 = vector.broadcast %cst_107 : f32 to vector<32x16xf32>
    %210 = vector.extract_strided_slice %208 {offsets = [0, 16], sizes = [32, 240], strides = [1, 1]} : vector<32x256xf32> to vector<32x240xf32>
    %211 = tpu.concatenate %210, %209 in 1 : vector<32x240xf32>, vector<32x16xf32> -> vector<32x256xf32>
    %c256_108 = arith.constant 256 : index
    %c512_109 = arith.constant 512 : index
    %212 = vector.load %arg7[%c256_108, %c512_109] : memref<288x1024xf32, #tpu.memory_space<vmem>>, vector<32x256xf32>
    tpu.vector_store %arg7[%c256_108, %c512_109], %211 {strides = array<i32>} : memref<288x1024xf32, #tpu.memory_space<vmem>>, vector<32x256xf32>,
    %213 = vector.extract_strided_slice %20 {offsets = [0, 0], sizes = [32, 256], strides = [1, 1]} : vector<32x1024xf32> to vector<32x256xf32>
    %cst_110 = arith.constant 0.000000e+00 : f32
    %214 = vector.broadcast %cst_110 : f32 to vector<32x17xf32>
    %215 = vector.extract_strided_slice %213 {offsets = [0, 17], sizes = [32, 239], strides = [1, 1]} : vector<32x256xf32> to vector<32x239xf32>
    %216 = tpu.concatenate %215, %214 in 1 : vector<32x239xf32>, vector<32x17xf32> -> vector<32x256xf32>
    %cst_111 = arith.constant 0.000000e+00 : f32
    %217 = vector.shape_cast %41 : vector<1x256xi1> to vector<1x256xi1>
    %218 = vector.broadcast %217 : vector<1x256xi1> to vector<32x256xi1>
    %219 = vector.broadcast %cst_111 : f32 to vector<32x256xf32>
    %220 = arith.select %218, %216, %219 : vector<32x256xi1>, vector<32x256xf32>
    %c256_112 = arith.constant 256 : index
    %c768_113 = arith.constant 768 : index
    %221 = vector.load %arg7[%c256_112, %c768_113] : memref<288x1024xf32, #tpu.memory_space<vmem>>, vector<32x256xf32>
    tpu.vector_store %arg7[%c256_112, %c768_113], %220 {strides = array<i32>} : memref<288x1024xf32, #tpu.memory_space<vmem>>, vector<32x256xf32>,
    %c0_114 = arith.constant 0 : index
    %c0_115 = arith.constant 0 : index
    %222 = vector.load %arg4[%c0_114, %c0_115] : memref<64x288xf32, #tpu.memory_space<vmem>>, vector<64x288xf32>
    %c0_116 = arith.constant 0 : index
    %c0_117 = arith.constant 0 : index
    %223 = vector.load %arg7[%c0_116, %c0_117] : memref<288x1024xf32, #tpu.memory_space<vmem>>, vector<288x1024xf32>
    %cst_118 = arith.constant dense<0.000000e+00> : vector<64x1024xf32>
    %224 = tpu.matmul %222, %223, %cst_118 {dimension_numbers = #tpu.dot_dimension_numbers<[1], [0], [0], [1], [0, 0, 1, 1], [], []>} : vector<64x288xf32>, vector<288x1024xf32>, vector<64x1024xf32> -> vector<64x1024xf32>
    %c0_119 = arith.constant 0 : index
    %c0_120 = arith.constant 0 : index
    %225 = vector.load %arg5[%c0_119, %c0_120] : memref<64x1xf32, #tpu.memory_space<vmem>>, vector<64x1xf32>
    %226 = vector.broadcast %225 : vector<64x1xf32> to vector<64x1024xf32>
    %227 = arith.addf %224, %226 : vector<64x1024xf32>
    %cst_121 = arith.constant 0.000000e+00 : f32
    %228 = vector.broadcast %cst_121 : f32 to vector<64x1024xf32>
    %229 = arith.maximumf %227, %228 : vector<64x1024xf32>
    %230 = vector.extract_strided_slice %229 {offsets = [0, 0], sizes = [64, 256], strides = [1, 1]} : vector<64x1024xf32> to vector<64x256xf32>
    %231 = vector.extract_strided_slice %229 {offsets = [0, 256], sizes = [64, 256], strides = [1, 1]} : vector<64x1024xf32> to vector<64x256xf32>
    %232 = arith.maximumf %230, %231 : vector<64x256xf32>
    %233 = vector.extract_strided_slice %229 {offsets = [0, 512], sizes = [64, 256], strides = [1, 1]} : vector<64x1024xf32> to vector<64x256xf32>
    %234 = vector.extract_strided_slice %229 {offsets = [0, 768], sizes = [64, 256], strides = [1, 1]} : vector<64x1024xf32> to vector<64x256xf32>
    %235 = arith.maximumf %233, %234 : vector<64x256xf32>
    %236 = arith.maximumf %232, %235 : vector<64x256xf32>
    %237 = arith.truncf %236 : vector<64x256xf32> to vector<64x256xbf16>
    %c0_122 = arith.constant 0 : index
    %c0_123 = arith.constant 0 : index
    %c0_124 = arith.constant 0 : index
    %238 = vector.load %arg6[%c0_122, %c0_123, %c0_124] : memref<1x64x256xbf16, #tpu.memory_space<vmem>>, vector<1x64x256xbf16>
    %239 = vector.shape_cast %238 : vector<1x64x256xbf16> to vector<64x256xbf16>
    %240 = vector.shape_cast %237 : vector<64x256xbf16> to vector<1x64x256xbf16>
    tpu.vector_store %arg6[%c0_122, %c0_123, %c0_124], %240 {strides = array<i32>} : memref<1x64x256xbf16, #tpu.memory_space<vmem>>, vector<1x64x256xbf16>,
    return
  }
  func.func @transform_0(%arg0: i32) -> (i32, i32, i32) {
    %c0_i32 = arith.constant 0 : i32
    %c0_i32_0 = arith.constant 0 : i32
    %c0_i32_1 = arith.constant 0 : i32
    return %arg0, %c0_i32, %c0_i32_0 : i32, i32, i32
  }
  func.func @transform_1(%arg0: i32) -> (i32, i32) {
    %c0_i32 = arith.constant 0 : i32
    %c0_i32_0 = arith.constant 0 : i32
    %c0_i32_1 = arith.constant 0 : i32
    return %c0_i32, %c0_i32_0 : i32, i32
  }
  func.func @transform_2(%arg0: i32) -> (i32, i32) {
    %c0_i32 = arith.constant 0 : i32
    %c0_i32_0 = arith.constant 0 : i32
    %c0_i32_1 = arith.constant 0 : i32
    return %c0_i32, %c0_i32_0 : i32, i32
  }
  func.func @transform_3(%arg0: i32) -> (i32, i32) {
    %c0_i32 = arith.constant 0 : i32
    %c0_i32_0 = arith.constant 0 : i32
    %c0_i32_1 = arith.constant 0 : i32
    return %c0_i32, %c0_i32_0 : i32, i32
  }
  func.func @transform_4(%arg0: i32) -> (i32, i32) {
    %c0_i32 = arith.constant 0 : i32
    %c0_i32_0 = arith.constant 0 : i32
    %c0_i32_1 = arith.constant 0 : i32
    return %c0_i32, %c0_i32_0 : i32, i32
  }
  func.func @transform_5(%arg0: i32) -> (i32, i32, i32) {
    %c0_i32 = arith.constant 0 : i32
    %c0_i32_0 = arith.constant 0 : i32
    %c0_i32_1 = arith.constant 0 : i32
    return %arg0, %c0_i32, %c0_i32_0 : i32, i32, i32
  }
}

</mosaic_0001>

<bundles_post_ra>
// kernel: tpu_custom_call.1
= control target key start
LH: loop header
LB: loop body
LE: loop exit
PB: predicated region body
PF: predicated region fallthrough
CT: control target
= control target key end

     0   :  { %10 = vsyncpa [#allocation4], 0  ;;  %s7827_s0 = inlined_call_operand.vmem [shape: f32[2,27,4096], index: 0, kind: input, shape index: {}]   ;;  %s7828_s1 = inlined_call_operand.vmem [shape: f32[32,27], index: 1, kind: input, shape index: {}]   ;;  %s7829_s2 = inlined_call_operand.vmem [shape: f32[32,1], index: 2, kind: input, shape index: {}]   ;;  %s7830_s3 = inlined_call_operand.vmem [shape: f32[64,288], index: 3, kind: input, shape index: {}]   ;;  %s7831_s4 = inlined_call_operand.vmem [shape: f32[64,1], index: 4, kind: input, shape index: {}]   ;;  %s7832_s5 = inlined_call_operand.hbm [shape: bf16[2,64,256], index: 5, kind: output, shape index: {}]  }
   0x1   :  { %12 = vsyncpa [#allocation4 + $0x1], 0  ;;  %s5765_s18 = smov 0   ;;  %s5767_s19 = smov 0  }
   0x2   :  { %s5769_s20 = smov 0   ;;  %s5771_s21 = smov 0  }
   0x3 LB: > { %s5786_s22 = sadd.s32 4294967295, %s5719_s21   ;;  %s4421_s23 = sadd.s32 4294967294, %s5719_s21   ;;  %s5719_s21 = sphi %s5771_s21, %s7945_s21   ;;  %s5715_s20 = sphi %s5769_s20, %s7944_s20   ;;  %s5711_s19 = sphi %s5767_s19, %s7943_s19   ;;  %s5707_s18 = sphi %s5765_s18, %s7942_s18  }
   0x4   : > { %s5790_s24 = sadd.s32 1, %s5719_s21   ;;  %s135_s25 = sadd.s32 1, %s5715_s20 }
   0x5   : > { %s132_s26 = ssub.s32 %s5719_s21, %s5790_s24  ;;  %p145_p0 = scmp.ne.s32.totalorder %s5715_s20, %s5711_s19 }
   0x6   : > { %p133_p1 = scmp.eq.s32.totalorder %s132_s26, 0  ;;  %p146_p2 = scmp.eq.s32.totalorder %s5786_s22, 1 }
   0x7   : > { %p151_p3 = scmp.ne.s32.totalorder %s5711_s19, %s5707_s18  ;;  %p152_p4 = scmp.eq.s32.totalorder %s4421_s23, 1 }
   0x8   : > { %s5801_s27 = scalar_select %p133_p1, %s5715_s20, %s135_s25  }
   0x9   : > { %p5803_p5 = por %p146_p2, %p145_p0  ;;  %p5807_p6 = por %p152_p4, %p151_p3 }
   0xa   : > { %p4424_p7 = scmp.ge.s32.totalorder %s5719_s21, 1  ;;  %p190_p8 = scmp.lt.s32.totalorder %s5719_s21, 3 }
   0xc   : > { %p191_p9 = pnand %p4424_p7, %p190_p8 }
   0xe   : > { %194 = sbr.rel (%p191_p9) target bundleno = 963 (0x3c3), region = 40 }
  0x15   : > { %p218_p10 = scmp.lt.s32.totalorder %s5786_s22, 1  ;;  %v7833_v0 = vmov 0.0   ;;  %vm272_vm0 = vcmask 1042432   ;;  %vm5722_vm1 = vmmov 1   ;;  %v5859_v35 = vld [vmem:[%s7828_s1] sm:$0xff]  ;;  %vm259_vm3 = vcmask 220160  }
  0x16   : > { %361 = vmatprep.mubr.f32.mxu0 %v7833_v0  ;;  %450 = vmatprep.mubr.f32.mxu1 %v7833_v0  ;;  %vm5822_vm2 = vmpackc.low %vm272_vm0, %vm5722_vm1  ;;  %v5723_v42 = vmov 0   ;;  %v5881_v52 = vld [vmem:[%s7828_s1 + $0x8] sm:$0xff]  ;;  %v5898_v59 = vld [vmem:[%s7828_s1 + $0x10] sm:$0xff]  ;;  %s5725_s11 = smov 16   ;;  %s5726_s12 = smov 15   ;;  %vm2128_vm4 = vcmask 138240  }
  0x17   : > { %s219_s30 = scalar_select %p218_p10, %s5786_s22, 1  ;;  %5415 = vset.pattern.permute.xlu0 %v5723_v42  ;;  %5416 = vset.pattern.permute.xlu1 %v5723_v42  ;;  %v5913_v60 = vld [vmem:[%s7828_s1 + $0x18] sm:$0xff]  ;;  %vm2189_vm9 = vcmask 130048   ;;  %vm2367_vm12 = vcmask 121856   ;;  %vm2238_vm1 = vcmask 7168  }
  0x18   : > { %s5727_s13 = smov 1   ;;  %s5728_s14 = smov 127   ;;  %vm4587_vm10 = vmneg %vm2189_vm9 }
  0x19   : > { %s4569_s6 = sshll.u32 %s219_s30, 10  ;;  %s5729_s15 = smov 113   ;;  %vm6970_vm11 = vmpackc.low %vm4587_vm10, %vm4587_vm10 }
  0x1a   : > { %s5820_s9 = scalar_lea.vmem %s7827_s0, %s4569_s6  ;;  %s5730_s16 = smov 112  }
  0x1b   : > { %v228_v2 = vld [vmem:[%s5820_s9 + $0x8] sm:$0xff]  ;;  %v230_v4 = vld [vmem:[%s5820_s9 + $0x18] sm:$0xff]  ;;  %v227_v7 = vld [vmem:[%s5820_s9] sm:$0xff]  ;;  %s5731_s25 = smov 111   ;;  %s215_s23 = sand.u32 1, %s5711_s19  }
  0x1c   : > { %v236_v3 = vld [vmem:[%s5820_s9 + $0x108] sm:$0xff]  ;;  %v238_v6 = vld [vmem:[%s5820_s9 + $0x118] sm:$0xff]  ;;  %v235_v8 = vld [vmem:[%s5820_s9 + $0x100] sm:$0xff]  ;;  %s4578_s30 = sshll.u32 %s5786_s22, 10  ;;  %s7786_s22 = scalar_lea.sflag [#allocation4], %s215_s23 }
  0x1d   : > { %v4723_v5 = vpack.c.bf16 %v236_v3, %v228_v2  ;;  %v4733_v9 = vpack.c.bf16 %v238_v6, %v230_v4  ;;  %v4725_v10 = vpack.c.bf16 %v235_v8, %v227_v7  ;;  %v229_v11 = vld [vmem:[%s5820_s9 + $0x10] sm:$0xff]  ;;  %v244_v13 = vld [vmem:[%s5820_s9 + $0x208] sm:$0xff]  ;;  %v246_v16 = vld [vmem:[%s5820_s9 + $0x218] sm:$0xff]  ;;  %s7779_s10 = scalar_lea.hbm %s7832_s5, %s4578_s30 }
  0x1e   : > { %v237_v12 = vld [vmem:[%s5820_s9 + $0x110] sm:$0xff]  ;;  %v252_v15 = vld [vmem:[%s5820_s9 + $0x308] sm:$0x7]  ;;  %v254_v17 = vld [vmem:[%s5820_s9 + $0x318] sm:$0x7] }
  0x1f   : > { %4724 = vmatprep.subr.bf16.mxu0 %v4723_v5  ;;  %v4735_v14 = vpack.c.bf16 %v237_v12, %v229_v11  ;;  %4734 = vmatprep.subr.bf16.mxu1 %v4733_v9  ;;  %v4727_v18 = vpack.c.bf16 %v252_v15, %v244_v13  ;;  %v4737_v19 = vpack.c.bf16 %v254_v17, %v246_v16  ;;  %v243_v20 = vld [vmem:[%s5820_s9 + $0x200] sm:$0xff]  ;;  %v245_v22 = vld [vmem:[%s5820_s9 + $0x210] sm:$0xff]  ;;  %v234_v25 = vld [vmem:[%s5820_s9 + $0x38] sm:$0xff] }
  0x20   : > { %4726 = vmatpush1.bf16.msra.mxu0 %v4725_v10  ;;  %v251_v21 = vld [vmem:[%s5820_s9 + $0x300] sm:$0x7]  ;;  %v253_v24 = vld [vmem:[%s5820_s9 + $0x310] sm:$0x7]  ;;  %v242_v26 = vld [vmem:[%s5820_s9 + $0x138] sm:$0xff] }
  0x21   : > { %4736 = vmatpush1.bf16.msra.mxu1 %v4735_v14  ;;  %v4730_v23 = vpack.c.bf16 %v251_v21, %v243_v20  ;;  %4729 = vmatprep.subr.msk.bf16.mxu0 %vm5822_vm2, %v4727_v18  ;;  %v4740_v27 = vpack.c.bf16 %v253_v24, %v245_v22  ;;  %v4753_v28 = vpack.c.bf16 %v242_v26, %v234_v25  ;;  %v233_v29 = vld [vmem:[%s5820_s9 + $0x30] sm:$0xff]  ;;  %v232_v31 = vld [vmem:[%s5820_s9 + $0x28] sm:$0xff]  ;;  %v231_v33 = vld [vmem:[%s5820_s9 + $0x20] sm:$0xff] }
  0x22   : > { %4739 = vmatprep.subr.msk.bf16.mxu1 %vm5822_vm2, %v4737_v19  ;;  %v241_v30 = vld [vmem:[%s5820_s9 + $0x130] sm:$0xff]  ;;  %v240_v32 = vld [vmem:[%s5820_s9 + $0x128] sm:$0xff]  ;;  %v239_v34 = vld [vmem:[%s5820_s9 + $0x120] sm:$0xff] }
  0x23   : > { %v4743_v36 = vpack.c.bf16 %v240_v32, %v232_v31  ;;  %v250_v37 = vld [vmem:[%s5820_s9 + $0x238] sm:$0xff]  ;;  %v4755_v39 = vpack.c.bf16 %v241_v30, %v233_v29  ;;  %v248_v40 = vld [vmem:[%s5820_s9 + $0x228] sm:$0xff]  ;;  %v4745_v43 = vpack.c.bf16 %v239_v34, %v231_v33  ;;  %v249_v45 = vld [vmem:[%s5820_s9 + $0x230] sm:$0xff] }
  0x24   : > { %4732 = vmatpush1.bf16.msk.msra.mxu0 %vm5822_vm2, %v4730_v23  ;;  %v258_v38 = vld [vmem:[%s5820_s9 + $0x338] sm:$0x7]  ;;  %v256_v41 = vld [vmem:[%s5820_s9 + $0x328] sm:$0x7]  ;;  %v257_v46 = vld [vmem:[%s5820_s9 + $0x330] sm:$0x7] }
  0x25   : > { %4742 = vmatpush1.bf16.msk.msra.mxu1 %vm5822_vm2, %v4740_v27  ;;  %4744 = vmatprep.subr.bf16.mxu0 %v4743_v36  ;;  %v4757_v44 = vpack.c.bf16 %v258_v38, %v250_v37  ;;  %v247_v47 = vld [vmem:[%s5820_s9 + $0x220] sm:$0xff]  ;;  %v4747_v48 = vpack.c.bf16 %v256_v41, %v248_v40  ;;  %v656_v50 = vld [vmem:[%s5820_s9 + $0x58] sm:$0xff]  ;;  %v654_v53 = vld [vmem:[%s5820_s9 + $0x48] sm:$0xff]  ;;  %v4760_v55 = vpack.c.bf16 %v257_v46, %v249_v45 }
  0x26   : > { %4754 = vmatprep.subr.bf16.mxu1 %v4753_v28  ;;  %v255_v49 = vld [vmem:[%s5820_s9 + $0x320] sm:$0x7]  ;;  %v664_v51 = vld [vmem:[%s5820_s9 + $0x158] sm:$0xff]  ;;  %v662_v54 = vld [vmem:[%s5820_s9 + $0x148] sm:$0xff] }
  0x27   : > { %4430 = vmatmul.mubr.msk.f32.vlgmr.msra.gmra.mrb[0].mxu0 %vm259_vm3, %v5859_v35  ;;  %v4750_v56 = vpack.c.bf16 %v255_v49, %v247_v47  ;;  %v4773_v57 = vpack.c.bf16 %v664_v51, %v656_v50  ;;  %v4763_v58 = vpack.c.bf16 %v662_v54, %v654_v53  ;;  %v655_v61 = vld [vmem:[%s5820_s9 + $0x50] sm:$0xff]  ;;  %v653_v63 = vld [vmem:[%s5820_s9 + $0x40] sm:$0xff]  ;;  %v672_v3 = vld [vmem:[%s5820_s9 + $0x258] sm:$0xff] }
  0x28   : > { %4436 = vmatmul.mubr.msk.f32.vlgmr.msra.gmra.mrb[0].mxu1 %vm259_vm3, %v5859_v35  ;;  %367 = vmatprep.mubr.f32.mxu0 %v7833_v0  ;;  %v663_v62 = vld [vmem:[%s5820_s9 + $0x150] sm:$0xff]  ;;  %v661_v2 = vld [vmem:[%s5820_s9 + $0x140] sm:$0xff]  ;;  %v680_v4 = vld [vmem:[%s5820_s9 + $0x358] sm:$0x7] }
  0x29   : > { %4756 = vmatpush1.bf16.msra.mxu1 %v4755_v39  ;;  %456 = vmatprep.mubr.f32.mxu1 %v7833_v0  ;;  %v670_v5 = vld [vmem:[%s5820_s9 + $0x248] sm:$0xff]  ;;  %v4775_v7 = vpack.c.bf16 %v663_v62, %v655_v61  ;;  %v4765_v8 = vpack.c.bf16 %v661_v2, %v653_v63  ;;  %v4777_v9 = vpack.c.bf16 %v680_v4, %v672_v3  ;;  %v671_v10 = vld [vmem:[%s5820_s9 + $0x250] sm:$0xff]  ;;  %v669_v12 = vld [vmem:[%s5820_s9 + $0x240] sm:$0xff] }
  0x2a   : > { %4746 = vmatpush1.bf16.msra.mxu0 %v4745_v43  ;;  %4759 = vmatprep.subr.msk.bf16.mxu1 %vm5822_vm2, %v4757_v44  ;;  %v678_v6 = vld [vmem:[%s5820_s9 + $0x348] sm:$0x7]  ;;  %v679_v11 = vld [vmem:[%s5820_s9 + $0x350] sm:$0x7]  ;;  %v677_v14 = vld [vmem:[%s5820_s9 + $0x340] sm:$0x7] }
  0x2b   : > { %4431 = vmatmul.mubr.msk.f32.gmra.mrb[2].mxu0 %vm259_vm3, %v5881_v52  ;;  %4749 = vmatprep.subr.msk.bf16.mxu0 %vm5822_vm2, %v4747_v48  ;;  %v4767_v13 = vpack.c.bf16 %v678_v6, %v670_v5  ;;  %v660_v15 = vld [vmem:[%s5820_s9 + $0x78] sm:$0xff]  ;;  %v658_v17 = vld [vmem:[%s5820_s9 + $0x68] sm:$0xff]  ;;  %v4780_v19 = vpack.c.bf16 %v679_v11, %v671_v10  ;;  %v4770_v20 = vpack.c.bf16 %v677_v14, %v669_v12  ;;  %v659_v23 = vld [vmem:[%s5820_s9 + $0x70] sm:$0xff] }
  0x2c   : > { %4437 = vmatmul.mubr.msk.f32.gmra.mrb[2].mxu1 %vm259_vm3, %v5881_v52  ;;  %373 = vmatprep.mubr.f32.mxu0 %v7833_v0  ;;  %v668_v16 = vld [vmem:[%s5820_s9 + $0x178] sm:$0xff]  ;;  %v666_v18 = vld [vmem:[%s5820_s9 + $0x168] sm:$0xff]  ;;  %v667_v24 = vld [vmem:[%s5820_s9 + $0x170] sm:$0xff] }
  0x2d   : > { %462 = vmatprep.mubr.f32.mxu1 %v7833_v0  ;;  %4762 = vmatpush1.bf16.msk.msra.mxu1 %vm5822_vm2, %v4760_v55  ;;  %v4793_v21 = vpack.c.bf16 %v668_v16, %v660_v15  ;;  %v4783_v22 = vpack.c.bf16 %v666_v18, %v658_v17  ;;  %v657_v25 = vld [vmem:[%s5820_s9 + $0x60] sm:$0xff]  ;;  %v676_v27 = vld [vmem:[%s5820_s9 + $0x278] sm:$0xff]  ;;  %v674_v29 = vld [vmem:[%s5820_s9 + $0x268] sm:$0xff]  ;;  %v4795_v31 = vpack.c.bf16 %v667_v24, %v659_v23 }
  0x2e   : > { %4752 = vmatpush1.bf16.msk.msra.mxu0 %vm5822_vm2, %v4750_v56  ;;  %4774 = vmatprep.subr.bf16.mxu1 %v4773_v57  ;;  %v665_v26 = vld [vmem:[%s5820_s9 + $0x160] sm:$0xff]  ;;  %v684_v28 = vld [vmem:[%s5820_s9 + $0x378] sm:$0x7]  ;;  %v682_v30 = vld [vmem:[%s5820_s9 + $0x368] sm:$0x7] }
  0x2f   : > { %4432 = vmatmul.mubr.msk.f32.gmra.mrb[4].mxu0 %vm259_vm3, %v5898_v59  ;;  %4764 = vmatprep.subr.bf16.mxu0 %v4763_v58  ;;  %v675_v32 = vld [vmem:[%s5820_s9 + $0x270] sm:$0xff]  ;;  %v4785_v33 = vpack.c.bf16 %v665_v26, %v657_v25  ;;  %v4797_v34 = vpack.c.bf16 %v684_v28, %v676_v27  ;;  %v673_v37 = vld [vmem:[%s5820_s9 + $0x260] sm:$0xff]  ;;  %v4787_v39 = vpack.c.bf16 %v682_v30, %v674_v29  ;;  %v1100_v41 = vld [vmem:[%s5820_s9 + $0x98] sm:$0xff] }
  0x30   : > { %4438 = vmatmul.mubr.msk.f32.gmra.mrb[4].mxu1 %vm259_vm3, %v5898_v59  ;;  %379 = vmatprep.mubr.f32.mxu0 %v7833_v0  ;;  %v683_v36 = vld [vmem:[%s5820_s9 + $0x370] sm:$0x7]  ;;  %v1985_v38 = vld [vmem:[%s7829_s2] sm:$0xff]  ;;  %v1108_v42 = vld [vmem:[%s5820_s9 + $0x198] sm:$0xff] }
  0x31   : > { %468 = vmatprep.mubr.f32.mxu1 %v7833_v0  ;;  %v681_v40 = vld [vmem:[%s5820_s9 + $0x360] sm:$0x7]  ;;  %1991 = vperm.xlu0 %5415, %v1985_v38   ;;  %v1098_v43 = vld [vmem:[%s5820_s9 + $0x88] sm:$0xff]  ;;  %v4800_v45 = vpack.c.bf16 %v683_v36, %v675_v32  ;;  %v4813_v47 = vpack.c.bf16 %v1108_v42, %v1100_v41  ;;  %v1987_v50 = vld [vmem:[%s7829_s2 + $0x10] sm:$0xff] }
  0x32   : > { %v1106_v44 = vld [vmem:[%s5820_s9 + $0x188] sm:$0xff]  ;;  %v4790_v46 = vpack.c.bf16 %v681_v40, %v673_v37  ;;  %v1099_v51 = vld [vmem:[%s5820_s9 + $0x90] sm:$0xff]  ;;  %v1097_v54 = vld [vmem:[%s5820_s9 + $0x80] sm:$0xff]  ;;  %2001 = vperm.xlu1 %5416, %v1987_v50  }
  0x33   : > { %4433 = vmatmul.mubr.msk.f32.gmra.mrb[6].mxu0 %vm259_vm3, %v5913_v60  ;;  %v4803_v48 = vpack.c.bf16 %v1106_v44, %v1098_v43  ;;  %v1986_v49 = vld [vmem:[%s7829_s2 + $0x8] sm:$0xff]  ;;  %v1107_v53 = vld [vmem:[%s5820_s9 + $0x190] sm:$0xff]  ;;  %v1105_v55 = vld [vmem:[%s5820_s9 + $0x180] sm:$0xff] }
  0x34   : > { %4439 = vmatmul.mubr.msk.f32.gmra.mrb[6].mxu1 %vm259_vm3, %v5913_v60  ;;  %539 = vmatprep.mubr.f32.mxu0 %v7833_v0  ;;  %v1116_v56 = vld [vmem:[%s5820_s9 + $0x298] sm:$0xff]  ;;  %v1114_v61 = vld [vmem:[%s5820_s9 + $0x288] sm:$0xff]  ;;  %v4815_v63 = vpack.c.bf16 %v1107_v53, %v1099_v51  ;;  %v4805_v2 = vpack.c.bf16 %v1105_v55, %v1097_v54  ;;  %v1115_v4 = vld [vmem:[%s5820_s9 + $0x290] sm:$0xff] }
  0x35   : > { %628 = vmatprep.mubr.f32.mxu1 %v7833_v0  ;;  %1996 = vperm.xlu0 %5415, %v1986_v49   ;;  %v1124_v57 = vld [vmem:[%s5820_s9 + $0x398] sm:$0x7]  ;;  %v1122_v62 = vld [vmem:[%s5820_s9 + $0x388] sm:$0x7]  ;;  %v1123_v5 = vld [vmem:[%s5820_s9 + $0x390] sm:$0x7] }
  0x36   : > { %v1988_v58 = vld [vmem:[%s7829_s2 + $0x18] sm:$0xff]  ;;  %v4817_v3 = vpack.c.bf16 %v1124_v57, %v1116_v56  ;;  %v1113_v6 = vld [vmem:[%s5820_s9 + $0x280] sm:$0xff]  ;;  %v1102_v11 = vld [vmem:[%s5820_s9 + $0xa8] sm:$0xff] }
  0x37   : > { %4442 = vmatmul.mubr.msk.f32.vlgmr.msra.gmra.mrb[8].mxu0 %vm259_vm3, %v5859_v35  ;;  %2006 = vperm.xlu1 %5416, %v1988_v58   ;;  %v1112_v10 = vld [vmem:[%s5820_s9 + $0x1b8] sm:$0xff]  ;;  %v1110_v12 = vld [vmem:[%s5820_s9 + $0x1a8] sm:$0xff]  ;;  %v1103_v17 = vld [vmem:[%s5820_s9 + $0xb0] sm:$0xff] }
  0x38   : > { %4448 = vmatmul.mubr.msk.f32.vlgmr.msra.gmra.mrb[8].mxu1 %vm259_vm3, %v5859_v35  ;;  %545 = vmatprep.mubr.f32.mxu0 %v7833_v0  ;;  %v4823_v16 = vpack.c.bf16 %v1110_v12, %v1102_v11  ;;  %v1111_v18 = vld [vmem:[%s5820_s9 + $0x1b0] sm:$0xff]  ;;  %v1118_v23 = vld [vmem:[%s5820_s9 + $0x2a8] sm:$0xff]  ;;  %v1117_v30 = vld [vmem:[%s5820_s9 + $0x2a0] sm:$0xff] }
  0x39   : > { %4776 = vmatpush1.bf16.msra.mxu1 %v4775_v7  ;;  %634 = vmatprep.mubr.f32.mxu1 %v7833_v0  ;;  %v4807_v7 = vpack.c.bf16 %v1122_v62, %v1114_v61  ;;  %v1126_v24 = vld [vmem:[%s5820_s9 + $0x3a8] sm:$0x7]  ;;  %v4835_v25 = vpack.c.bf16 %v1111_v18, %v1103_v17  ;;  %v1119_v28 = vld [vmem:[%s5820_s9 + $0x2b0] sm:$0xff]  ;;  %v1125_v32 = vld [vmem:[%s5820_s9 + $0x3a0] sm:$0x7] }
  0x3a   : > { %4766 = vmatpush1.bf16.msra.mxu0 %v4765_v8  ;;  %4779 = vmatprep.subr.msk.bf16.mxu1 %vm5822_vm2, %v4777_v9  ;;  %v1121_v8 = vld [vmem:[%s5820_s9 + $0x380] sm:$0x7]  ;;  %v1104_v9 = vld [vmem:[%s5820_s9 + $0xb8] sm:$0xff]  ;;  %v1127_v29 = vld [vmem:[%s5820_s9 + $0x3b0] sm:$0x7] }
  0x3b   : > { %4443 = vmatmul.mubr.msk.f32.gmra.mrb[10].mxu0 %vm259_vm3, %v5881_v52  ;;  %4769 = vmatprep.subr.msk.bf16.mxu0 %vm5822_vm2, %v4767_v13  ;;  %v4820_v13 = vpack.c.bf16 %v1123_v5, %v1115_v4  ;;  %v4810_v14 = vpack.c.bf16 %v1121_v8, %v1113_v6  ;;  %v4833_v15 = vpack.c.bf16 %v1112_v10, %v1104_v9  ;;  %v1542_v36 = vld [vmem:[%s5820_s9 + $0xc8] sm:$0xff]  ;;  %v1543_v42 = vld [vmem:[%s5820_s9 + $0xd0] sm:$0xff]  ;;  %v1541_v44 = vld [vmem:[%s5820_s9 + $0xc0] sm:$0xff] }
  0x3c   : > { %4449 = vmatmul.mubr.msk.f32.gmra.mrb[10].mxu1 %vm259_vm3, %v5881_v52  ;;  %551 = vmatprep.mubr.f32.mxu0 %v7833_v0  ;;  %v1550_v37 = vld [vmem:[%s5820_s9 + $0x1c8] sm:$0xff]  ;;  %v4840_v38 = vpack.c.bf16 %v1127_v29, %v1119_v28  ;;  %v1551_v43 = vld [vmem:[%s5820_s9 + $0x1d0] sm:$0xff]  ;;  %v1557_v56 = vld [vmem:[%s5820_s9 + $0x2c0] sm:$0xff] }
  0x3d   : > { %640 = vmatprep.mubr.f32.mxu1 %v7833_v0  ;;  %4782 = vmatpush1.bf16.msk.msra.mxu1 %vm5822_vm2, %v4780_v19  ;;  %v1101_v19 = vld [vmem:[%s5820_s9 + $0xa0] sm:$0xff]  ;;  %v4843_v41 = vpack.c.bf16 %v1550_v37, %v1542_v36  ;;  %v1566_v49 = vld [vmem:[%s5820_s9 + $0x3c8] sm:$0x7]  ;;  %v4855_v50 = vpack.c.bf16 %v1551_v43, %v1543_v42  ;;  %v1559_v54 = vld [vmem:[%s5820_s9 + $0x2d0] sm:$0xff] }
  0x3e   : > { %4772 = vmatpush1.bf16.msk.msra.mxu0 %vm5822_vm2, %v4770_v20  ;;  %4794 = vmatprep.subr.bf16.mxu1 %v4793_v21  ;;  %v1109_v20 = vld [vmem:[%s5820_s9 + $0x1a0] sm:$0xff]  ;;  %v1120_v21 = vld [vmem:[%s5820_s9 + $0x2b8] sm:$0xff]  ;;  %v1567_v55 = vld [vmem:[%s5820_s9 + $0x3d0] sm:$0x7] }
  0x3f   : > { %4444 = vmatmul.mubr.msk.f32.gmra.mrb[12].mxu0 %vm259_vm3, %v5898_v59  ;;  %4784 = vmatprep.subr.bf16.mxu0 %v4783_v22  ;;  %v1128_v22 = vld [vmem:[%s5820_s9 + $0x3b8] sm:$0x7]  ;;  %v4825_v26 = vpack.c.bf16 %v1109_v20, %v1101_v19  ;;  %v1565_v58 = vld [vmem:[%s5820_s9 + $0x3c0] sm:$0x7]  ;;  %v1555_v8 = vld [vmem:[%s5820_s9 + $0x1f0] sm:$0xff] }
  0x40   : > { %4450 = vmatmul.mubr.msk.f32.gmra.mrb[12].mxu1 %vm259_vm3, %v5898_v59  ;;  %557 = vmatprep.mubr.f32.mxu0 %v7833_v0  ;;  %v4837_v27 = vpack.c.bf16 %v1128_v22, %v1120_v21  ;;  %v1548_v61 = vld [vmem:[%s5820_s9 + $0xf8] sm:$0xff]  ;;  %v4850_v4 = vpack.c.bf16 %v1565_v58, %v1557_v56  ;;  %v1545_v9 = vld [vmem:[%s5820_s9 + $0xe0] sm:$0xff]  ;;  %v1563_v18 = vld [vmem:[%s5820_s9 + $0x2f0] sm:$0xff] }
  0x41   : > { %646 = vmatprep.mubr.f32.mxu1 %v7833_v0  ;;  %v1556_v62 = vld [vmem:[%s5820_s9 + $0x1f8] sm:$0xff]  ;;  %v1553_v10 = vld [vmem:[%s5820_s9 + $0x1e0] sm:$0xff]  ;;  %v1571_v19 = vld [vmem:[%s5820_s9 + $0x3f0] sm:$0x7] }
  0x42   : > { %v4873_v5 = vpack.c.bf16 %v1556_v62, %v1548_v61  ;;  %v1564_v11 = vld [vmem:[%s5820_s9 + $0x2f8] sm:$0xff]  ;;  %v1561_v21 = vld [vmem:[%s5820_s9 + $0x2e0] sm:$0xff] }
  0x43   : > { %4445 = vmatmul.mubr.msk.f32.gmra.mrb[14].mxu0 %vm259_vm3, %v5913_v60  ;;  %v1572_v12 = vld [vmem:[%s5820_s9 + $0x3f8] sm:$0x7]  ;;  %v1569_v22 = vld [vmem:[%s5820_s9 + $0x3e0] sm:$0x7] }
  0x44   : > { %4451 = vmatmul.mubr.msk.f32.gmra.mrb[14].mxu1 %vm259_vm3, %v5913_v60  ;;  %773 = vmatprep.mubr.f32.mxu0 %v7833_v0  ;;  %v4877_v17 = vpack.c.bf16 %v1572_v12, %v1564_v11 }
  0x45   : > { %862 = vmatprep.mubr.f32.mxu1 %v7833_v0 }
  0x47   : > { %4454 = vmatmul.mubr.msk.f32.vlgmr.msra.gmra.mrb[16].mxu0 %vm259_vm3, %v5859_v35 }
  0x48   : > { %4460 = vmatmul.mubr.msk.f32.vlgmr.msra.gmra.mrb[16].mxu1 %vm259_vm3, %v5859_v35  ;;  %779 = vmatprep.mubr.f32.mxu0 %v7833_v0 }
  0x49   : > { %4796 = vmatpush1.bf16.msra.mxu1 %v4795_v31  ;;  %868 = vmatprep.mubr.f32.mxu1 %v7833_v0  ;;  %v4827_v31 = vpack.c.bf16 %v1126_v24, %v1118_v23  ;;  %v4880_v23 = vpack.c.bf16 %v1571_v19, %v1563_v18  ;;  %v4870_v24 = vpack.c.bf16 %v1569_v22, %v1561_v21 }
  0x4a   : > { %4786 = vmatpush1.bf16.msra.mxu0 %v4785_v33  ;;  %4799 = vmatprep.subr.msk.bf16.mxu1 %vm5822_vm2, %v4797_v34  ;;  %v1544_v33 = vld [vmem:[%s5820_s9 + $0xd8] sm:$0xff] }
  0x4b   : > { %4455 = vmatmul.mubr.msk.f32.gmra.mrb[18].mxu0 %vm259_vm3, %v5881_v52  ;;  %4789 = vmatprep.subr.msk.bf16.mxu0 %vm5822_vm2, %v4787_v39  ;;  %v1552_v34 = vld [vmem:[%s5820_s9 + $0x1d8] sm:$0xff]  ;;  %v4830_v39 = vpack.c.bf16 %v1125_v32, %v1117_v30 }
  0x4c   : > { %4461 = vmatmul.mubr.msk.f32.gmra.mrb[18].mxu1 %vm259_vm3, %v5881_v52  ;;  %785 = vmatprep.mubr.f32.mxu0 %v7833_v0  ;;  %v4853_v40 = vpack.c.bf16 %v1552_v34, %v1544_v33 }
  0x4d   : > { %874 = vmatprep.mubr.f32.mxu1 %v7833_v0  ;;  %4802 = vmatpush1.bf16.msk.msra.mxu1 %vm5822_vm2, %v4800_v45  ;;  %v1549_v45 = vld [vmem:[%s5820_s9 + $0x1c0] sm:$0xff] }
  0x4e   : > { %4792 = vmatpush1.bf16.msk.msra.mxu0 %vm5822_vm2, %v4790_v46  ;;  %4814 = vmatprep.subr.bf16.mxu1 %v4813_v47  ;;  %v1560_v46 = vld [vmem:[%s5820_s9 + $0x2d8] sm:$0xff]  ;;  %v4845_v51 = vpack.c.bf16 %v1549_v45, %v1541_v44 }
  0x4f   : > { %4456 = vmatmul.mubr.msk.f32.gmra.mrb[20].mxu0 %vm259_vm3, %v5898_v59  ;;  %4804 = vmatprep.subr.bf16.mxu0 %v4803_v48  ;;  %v1568_v47 = vld [vmem:[%s5820_s9 + $0x3d8] sm:$0x7]  ;;  %v1558_v48 = vld [vmem:[%s5820_s9 + $0x2c8] sm:$0xff] }
  0x50   : > { %4462 = vmatmul.mubr.msk.f32.gmra.mrb[20].mxu1 %vm259_vm3, %v5898_v59  ;;  %791 = vmatprep.mubr.f32.mxu0 %v7833_v0  ;;  %v4857_v53 = vpack.c.bf16 %v1568_v47, %v1560_v46  ;;  %v4847_v57 = vpack.c.bf16 %v1566_v49, %v1558_v48 }
  0x51   : > { %880 = vmatprep.mubr.f32.mxu1 %v7833_v0 }
  0x53   : > { %4457 = vmatmul.mubr.msk.f32.gmra.mrb[22].mxu0 %vm259_vm3, %v5913_v60 }
  0x54   : > { %4463 = vmatmul.mubr.msk.f32.gmra.mrb[22].mxu1 %vm259_vm3, %v5913_v60  ;;  %951 = vmatprep.mubr.f32.mxu0 %v7833_v0 }
  0x55   : > { %1040 = vmatprep.mubr.f32.mxu1 %v7833_v0 }
  0x57   : > { %4466 = vmatmul.mubr.msk.f32.vlgmr.msra.gmra.mrb[24].mxu0 %vm259_vm3, %v5859_v35 }
  0x58   : > { %4472 = vmatmul.mubr.msk.f32.vlgmr.msra.gmra.mrb[24].mxu1 %vm259_vm3, %v5859_v35  ;;  %957 = vmatprep.mubr.f32.mxu0 %v7833_v0 }
  0x59   : > { %4816 = vmatpush1.bf16.msra.mxu1 %v4815_v63  ;;  %1046 = vmatprep.mubr.f32.mxu1 %v7833_v0  ;;  %v1546_v63 = vld [vmem:[%s5820_s9 + $0xe8] sm:$0xff] }
  0x5a   : > { %4806 = vmatpush1.bf16.msra.mxu0 %v4805_v2  ;;  %4819 = vmatprep.subr.msk.bf16.mxu1 %vm5822_vm2, %v4817_v3  ;;  %v1554_v2 = vld [vmem:[%s5820_s9 + $0x1e8] sm:$0xff]  ;;  %v4860_v3 = vpack.c.bf16 %v1567_v55, %v1559_v54 }
  0x5b   : > { %4467 = vmatmul.mubr.msk.f32.gmra.mrb[26].mxu0 %vm259_vm3, %v5881_v52  ;;  %4809 = vmatprep.subr.msk.bf16.mxu0 %vm5822_vm2, %v4807_v7  ;;  %v4863_v6 = vpack.c.bf16 %v1554_v2, %v1546_v63  ;;  %v1547_v7 = vld [vmem:[%s5820_s9 + $0xf0] sm:$0xff] }
  0x5c   : > { %4473 = vmatmul.mubr.msk.f32.gmra.mrb[26].mxu1 %vm259_vm3, %v5881_v52  ;;  %963 = vmatprep.mubr.f32.mxu0 %v7833_v0 }
  0x5d   : > { %1052 = vmatprep.mubr.f32.mxu1 %v7833_v0  ;;  %4822 = vmatpush1.bf16.msk.msra.mxu1 %vm5822_vm2, %v4820_v13  ;;  %v1562_v13 = vld [vmem:[%s5820_s9 + $0x2e8] sm:$0xff] }
  0x5e   : > { %4812 = vmatpush1.bf16.msk.msra.mxu0 %vm5822_vm2, %v4810_v14  ;;  %4834 = vmatprep.subr.bf16.mxu1 %v4833_v15  ;;  %v1570_v14 = vld [vmem:[%s5820_s9 + $0x3e8] sm:$0x7]  ;;  %v4875_v15 = vpack.c.bf16 %v1555_v8, %v1547_v7  ;;  %s5724_s9 = smov 17  }
  0x5f   : > { %4468 = vmatmul.mubr.msk.f32.gmra.mrb[28].mxu0 %vm259_vm3, %v5898_v59  ;;  %4824 = vmatprep.subr.bf16.mxu0 %v4823_v16  ;;  %v4865_v16 = vpack.c.bf16 %v1553_v10, %v1545_v9  ;;  %v4867_v20 = vpack.c.bf16 %v1570_v14, %v1562_v13 }
  0x60   : > { %4474 = vmatmul.mubr.msk.f32.gmra.mrb[28].mxu1 %vm259_vm3, %v5898_v59  ;;  %969 = vmatprep.mubr.f32.mxu0 %v7833_v0 }
  0x61   : > { %1058 = vmatprep.mubr.f32.mxu1 %v7833_v0 }
  0x63   : > { %4469 = vmatmul.mubr.msk.f32.gmra.mrb[30].mxu0 %vm259_vm3, %v5913_v60 }
  0x64   : > { %4475 = vmatmul.mubr.msk.f32.gmra.mrb[30].mxu1 %vm259_vm3, %v5913_v60  ;;  %1217 = vmatprep.mubr.f32.mxu0 %v7833_v0 }
  0x65   : > { %1306 = vmatprep.mubr.f32.mxu1 %v7833_v0 }
  0x67   : > { %4478 = vmatmul.mubr.msk.f32.vlgmr.msra.gmra.mrb[32].mxu0 %vm259_vm3, %v5859_v35 }
  0x68   : > { %4484 = vmatmul.mubr.msk.f32.vlgmr.msra.gmra.mrb[32].mxu1 %vm259_vm3, %v5859_v35  ;;  %1223 = vmatprep.mubr.f32.mxu0 %v7833_v0 }
  0x69   : > { %4836 = vmatpush1.bf16.msra.mxu1 %v4835_v25  ;;  %1312 = vmatprep.mubr.f32.mxu1 %v7833_v0 }
  0x6a   : > { %4826 = vmatpush1.bf16.msra.mxu0 %v4825_v26  ;;  %4839 = vmatprep.subr.msk.bf16.mxu1 %vm5822_vm2, %v4837_v27 }
  0x6b   : > { %4479 = vmatmul.mubr.msk.f32.gmra.mrb[34].mxu0 %vm259_vm3, %v5881_v52  ;;  %4829 = vmatprep.subr.msk.bf16.mxu0 %vm5822_vm2, %v4827_v31 }
  0x6c   : > { %4485 = vmatmul.mubr.msk.f32.gmra.mrb[34].mxu1 %vm259_vm3, %v5881_v52  ;;  %1229 = vmatprep.mubr.f32.mxu0 %v7833_v0 }
  0x6d   : > { %1318 = vmatprep.mubr.f32.mxu1 %v7833_v0  ;;  %4842 = vmatpush1.bf16.msk.msra.mxu1 %vm5822_vm2, %v4840_v38 }
  0x6e   : > { %4832 = vmatpush1.bf16.msk.msra.mxu0 %vm5822_vm2, %v4830_v39  ;;  %4854 = vmatprep.subr.bf16.mxu1 %v4853_v40 }
  0x6f   : > { %4480 = vmatmul.mubr.msk.f32.gmra.mrb[36].mxu0 %vm259_vm3, %v5898_v59  ;;  %4844 = vmatprep.subr.bf16.mxu0 %v4843_v41 }
  0x70   : > { %4486 = vmatmul.mubr.msk.f32.gmra.mrb[36].mxu1 %vm259_vm3, %v5898_v59  ;;  %1235 = vmatprep.mubr.f32.mxu0 %v7833_v0 }
  0x71   : > { %1324 = vmatprep.mubr.f32.mxu1 %v7833_v0 }
  0x73   : > { %4481 = vmatmul.mubr.msk.f32.gmra.mrb[38].mxu0 %vm259_vm3, %v5913_v60 }
  0x74   : > { %4487 = vmatmul.mubr.msk.f32.gmra.mrb[38].mxu1 %vm259_vm3, %v5913_v60  ;;  %1395 = vmatprep.mubr.f32.mxu0 %v7833_v0 }
  0x75   : > { %1484 = vmatprep.mubr.f32.mxu1 %v7833_v0 }
  0x77   : > { %4490 = vmatmul.mubr.msk.f32.vlgmr.msra.gmra.mrb[40].mxu0 %vm259_vm3, %v5859_v35 }
  0x78   : > { %4496 = vmatmul.mubr.msk.f32.vlgmr.msra.gmra.mrb[40].mxu1 %vm259_vm3, %v5859_v35  ;;  %1401 = vmatprep.mubr.f32.mxu0 %v7833_v0 }
  0x79   : > { %4856 = vmatpush1.bf16.msra.mxu1 %v4855_v50  ;;  %1490 = vmatprep.mubr.f32.mxu1 %v7833_v0 }
  0x7a   : > { %4846 = vmatpush1.bf16.msra.mxu0 %v4845_v51  ;;  %4859 = vmatprep.subr.msk.bf16.mxu1 %vm5822_vm2, %v4857_v53 }
  0x7b   : > { %4491 = vmatmul.mubr.msk.f32.gmra.mrb[42].mxu0 %vm259_vm3, %v5881_v52  ;;  %4849 = vmatprep.subr.msk.bf16.mxu0 %vm5822_vm2, %v4847_v57 }
  0x7c   : > { %4497 = vmatmul.mubr.msk.f32.gmra.mrb[42].mxu1 %vm259_vm3, %v5881_v52  ;;  %1407 = vmatprep.mubr.f32.mxu0 %v7833_v0 }
  0x7d   : > { %1496 = vmatprep.mubr.f32.mxu1 %v7833_v0  ;;  %4862 = vmatpush1.bf16.msk.msra.mxu1 %vm5822_vm2, %v4860_v3 }
  0x7e   : > { %4852 = vmatpush1.bf16.msk.msra.mxu0 %vm5822_vm2, %v4850_v4  ;;  %4874 = vmatprep.subr.bf16.mxu1 %v4873_v5 }
  0x7f   : > { %4492 = vmatmul.mubr.msk.f32.gmra.mrb[44].mxu0 %vm259_vm3, %v5898_v59  ;;  %4864 = vmatprep.subr.bf16.mxu0 %v4863_v6 }
  0x80   : > { %4498 = vmatmul.mubr.msk.f32.gmra.mrb[44].mxu1 %vm259_vm3, %v5898_v59  ;;  %1413 = vmatprep.mubr.f32.mxu0 %v7833_v0 }
  0x81   : > { %1502 = vmatprep.mubr.f32.mxu1 %v7833_v0 }
  0x83   : > { %4493 = vmatmul.mubr.msk.f32.gmra.mrb[46].mxu0 %vm259_vm3, %v5913_v60 }
  0x84   : > { %4499 = vmatmul.mubr.msk.f32.gmra.mrb[46].mxu1 %vm259_vm3, %v5913_v60  ;;  %1661 = vmatprep.mubr.f32.mxu0 %v7833_v0 }
  0x85   : > { %1750 = vmatprep.mubr.f32.mxu1 %v7833_v0 }
  0x87   : > { %4502 = vmatmul.mubr.msk.f32.vlgmr.msra.gmra.mrb[48].mxu0 %vm259_vm3, %v5859_v35 }
  0x88   : > { %4508 = vmatmul.mubr.msk.f32.vlgmr.msra.gmra.mrb[48].mxu1 %vm259_vm3, %v5859_v35  ;;  %1667 = vmatprep.mubr.f32.mxu0 %v7833_v0 }
  0x89   : > { %4876 = vmatpush1.bf16.msra.mxu1 %v4875_v15  ;;  %1756 = vmatprep.mubr.f32.mxu1 %v7833_v0 }
  0x8a   : > { %4866 = vmatpush1.bf16.msra.mxu0 %v4865_v16  ;;  %4879 = vmatprep.subr.msk.bf16.mxu1 %vm5822_vm2, %v4877_v17 }
  0x8b   : > { %4503 = vmatmul.mubr.msk.f32.gmra.mrb[50].mxu0 %vm259_vm3, %v5881_v52  ;;  %4869 = vmatprep.subr.msk.bf16.mxu0 %vm5822_vm2, %v4867_v20 }
  0x8c   : > { %4509 = vmatmul.mubr.msk.f32.gmra.mrb[50].mxu1 %vm259_vm3, %v5881_v52  ;;  %1673 = vmatprep.mubr.f32.mxu0 %v7833_v0 }
  0x8d   : > { %1762 = vmatprep.mubr.f32.mxu1 %v7833_v0  ;;  %4882 = vmatpush1.bf16.msk.msra.mxu1 %vm5822_vm2, %v4880_v23 }
  0x8e   : > { %4872 = vmatpush1.bf16.msk.msra.mxu0 %vm5822_vm2, %v4870_v24  ;;  %vm2436_vm2 = vcmask 1039360  }
  0x8f   : > { %4504 = vmatmul.mubr.msk.f32.gmra.mrb[52].mxu0 %vm259_vm3, %v5898_v59 }
  0x90   : > { %4510 = vmatmul.mubr.msk.f32.gmra.mrb[52].mxu1 %vm259_vm3, %v5898_v59  ;;  %1679 = vmatprep.mubr.f32.mxu0 %v7833_v0 }
  0x91   : > { %1768 = vmatprep.mubr.f32.mxu1 %v7833_v0 }
  0x93   : > { %4505 = vmatmul.mubr.msk.f32.gmra.mrb[54].mxu0 %vm259_vm3, %v5913_v60 }
  0x94   : > { %4511 = vmatmul.mubr.msk.f32.gmra.mrb[54].mxu1 %vm259_vm3, %v5913_v60  ;;  %1839 = vmatprep.mubr.f32.mxu0 %v7833_v0 }
  0x95   : > { %1928 = vmatprep.mubr.f32.mxu1 %v7833_v0 }
  0x97   : > { %4514 = vmatmul.mubr.msk.f32.vlgmr.msra.gmra.mrb[56].mxu0 %vm259_vm3, %v5859_v35 }
  0x98   : > { %4520 = vmatmul.mubr.msk.f32.vlgmr.msra.gmra.mrb[56].mxu1 %vm259_vm3, %v5859_v35  ;;  %1845 = vmatprep.mubr.f32.mxu0 %v7833_v0 }
  0x99   : > { %1934 = vmatprep.mubr.f32.mxu1 %v7833_v0 }
  0x9b   : > { %4515 = vmatmul.mubr.msk.f32.gmra.mrb[58].mxu0 %vm259_vm3, %v5881_v52 }
  0x9c   : > { %4521 = vmatmul.mubr.msk.f32.gmra.mrb[58].mxu1 %vm259_vm3, %v5881_v52  ;;  %1851 = vmatprep.mubr.f32.mxu0 %v7833_v0 }
  0x9d   : > { %1940 = vmatprep.mubr.f32.mxu1 %v7833_v0 }
  0x9f   : > { %4516 = vmatmul.mubr.msk.f32.gmra.mrb[60].mxu0 %vm259_vm3, %v5898_v59 }
  0xa0   : > { %4522 = vmatmul.mubr.msk.f32.gmra.mrb[60].mxu1 %vm259_vm3, %v5898_v59  ;;  %1857 = vmatprep.mubr.f32.mxu0 %v7833_v0 }
  0xa1   : > { %1946 = vmatprep.mubr.f32.mxu1 %v7833_v0 }
  0xa3   : > { %4517 = vmatmul.mubr.msk.f32.gmra.mrb[62].mxu0 %vm259_vm3, %v5913_v60 }
  0xa4   : > { %4523 = vmatmul.mubr.msk.f32.gmra.mrb[62].mxu1 %vm259_vm3, %v5913_v60  ;;  %vm3248_vm3 = vcmask 261120  }
  0xfa   : > { %v6240_v1 = vpop.f32.mrb[0].mxu0 }
  0xfb   : > { %v6242_v35 = vpop.f32.mrb[0].mxu1  ;;  %v6244_v52 = vpop.f32.mrb[1].mxu0 }
  0xfc   : > { %v6246_v25 = vpop.f32.mrb[1].mxu1 }
  0xfe   : > { %v6248_v26 = vpop.f32.mrb[2].mxu0 }
  0xff   : > { %v6250_v59 = vpop.f32.mrb[2].mxu1  ;;  %v6252_v27 = vpop.f32.mrb[3].mxu0 }
 0x100   : > { %v6254_v28 = vpop.f32.mrb[3].mxu1 }
 0x102   : > { %v6256_v29 = vpop.f32.mrb[4].mxu0 }
 0x103   : > { %v6258_v30 = vpop.f32.mrb[4].mxu1  ;;  %v6260_v60 = vpop.f32.mrb[5].mxu0 }
 0x104   : > { %v6262_v31 = vpop.f32.mrb[5].mxu1 }
 0x106   : > { %v6264_v32 = vpop.f32.mrb[6].mxu0 }
 0x107   : > { %v6266_v33 = vpop.f32.mrb[6].mxu1  ;;  %v6268_v34 = vpop.f32.mrb[7].mxu0 }
 0x108   : > { %v6270_v36 = vpop.f32.mrb[7].mxu1 }
 0x10a   : > { %v6272_v37 = vpop.f32.mrb[8].mxu0 }
 0x10b   : > { %v6274_v38 = vpop.f32.mrb[8].mxu1  ;;  %v6276_v39 = vpop.f32.mrb[9].mxu0 }
 0x10c   : > { %v6278_v40 = vpop.f32.mrb[9].mxu1 }
 0x10e   : > { %v6280_v41 = vpop.f32.mrb[10].mxu0 }
 0x10f   : > { %v6282_v42 = vpop.f32.mrb[10].mxu1  ;;  %v6284_v43 = vpop.f32.mrb[11].mxu0 }
 0x110   : > { %v6286_v44 = vpop.f32.mrb[11].mxu1 }
 0x112   : > { %v6288_v45 = vpop.f32.mrb[12].mxu0 }
 0x113   : > { %7856 = vst [vmem:[#allocation6_spill] sm:$0xff] %v6288_v45  ;;  %v6290_v46 = vpop.f32.mrb[12].mxu1  ;;  %v6292_v47 = vpop.f32.mrb[13].mxu0 }
 0x114   : > { %7857 = vst [vmem:[#allocation7_spill] sm:$0xff] %v6292_v47  ;;  %v6294_v48 = vpop.f32.mrb[13].mxu1 }
 0x115   : > { %7858 = vst [vmem:[#allocation8_spill] sm:$0xff] %v6294_v48 }
 0x116   : > { %v6296_v49 = vpop.f32.mrb[14].mxu0 }
 0x117   : > { %7859 = vst [vmem:[#allocation9_spill] sm:$0xff] %v6296_v49  ;;  %v6298_v50 = vpop.f32.mrb[14].mxu1  ;;  %v6300_v51 = vpop.f32.mrb[15].mxu0 }
 0x118   : > { %7860 = vst [vmem:[#allocation10_spill] sm:$0xff] %v6300_v51  ;;  %v6302_v53 = vpop.f32.mrb[15].mxu1 }
 0x11a   : > { %v6304_v54 = vpop.f32.mrb[16].mxu0 }
 0x11b   : > { %v6308_v56 = vpop.f32.mrb[16].mxu1  ;;  %v6310_v57 = vpop.f32.mrb[17].mxu0  ;;  %v7868_v48 = vmax.f32 %v6240_v1, %v6304_v54 }
 0x11c   : > { %v6316_v62 = vpop.f32.mrb[17].mxu1  ;;  %v7869_v47 = vmax.f32 %v6242_v35, %v6308_v56  ;;  %v7870_v23 = vmax.f32 %v6244_v52, %v6310_v57 }
 0x11d   : > { %v7871_v0 = vmax.f32 %v6246_v25, %v6316_v62 }
 0x11e   : > { %v6320_v2 = vpop.f32.mrb[18].mxu0 }
 0x11f   : > { %v6324_v4 = vpop.f32.mrb[18].mxu1  ;;  %v6326_v5 = vpop.f32.mrb[19].mxu0 }
 0x120   : > { %v6332_v8 = vpop.f32.mrb[19].mxu1 }
 0x121   : > { %v7875_v25 = vmax.f32 %v6254_v28, %v6332_v8 }
 0x122   : > { %v6336_v10 = vpop.f32.mrb[20].mxu0 }
 0x123   : > { %v6340_v12 = vpop.f32.mrb[20].mxu1  ;;  %v6342_v13 = vpop.f32.mrb[21].mxu0  ;;  %v7876_v57 = vmax.f32 %v6256_v29, %v6336_v10 }
 0x124   : > { %v6348_v16 = vpop.f32.mrb[21].mxu1 }
 0x125   : > { %v7879_v8 = vmax.f32 %v6262_v31, %v6348_v16 }
 0x126   : > { %v6352_v18 = vpop.f32.mrb[22].mxu0 }
 0x127   : > { %v6356_v20 = vpop.f32.mrb[22].mxu1  ;;  %v6358_v21 = vpop.f32.mrb[23].mxu0  ;;  %v7880_v10 = vmax.f32 %v6264_v32, %v6352_v18 }
 0x128   : > { %v6364_v24 = vpop.f32.mrb[23].mxu1 }
 0x129   : > { %v7883_v16 = vmax.f32 %v6270_v36, %v6364_v24 }
 0x12a   : > { %v6368_v17 = vpop.f32.mrb[24].mxu0 }
 0x12b   : > { %v6372_v15 = vpop.f32.mrb[24].mxu1  ;;  %v6374_v14 = vpop.f32.mrb[25].mxu0  ;;  %v7884_v18 = vmax.f32 %v6272_v37, %v6368_v17 }
 0x12c   : > { %v6380_v11 = vpop.f32.mrb[25].mxu1 }
 0x12d   : > { %v7887_v24 = vmax.f32 %v6278_v40, %v6380_v11 }
 0x12e   : > { %v6384_v9 = vpop.f32.mrb[26].mxu0 }
 0x12f   : > { %v6388_v7 = vpop.f32.mrb[26].mxu1  ;;  %v6390_v6 = vpop.f32.mrb[27].mxu0  ;;  %v7888_v17 = vmax.f32 %v6280_v41, %v6384_v9  ;;  %v7893_v9 = vld [vmem:[#allocation6_spill] sm:$0xff] }
 0x130   : > { %v6396_v3 = vpop.f32.mrb[27].mxu1 }
 0x131   : > { %7861 = vst [vmem:[#allocation11_spill] sm:$0xff] %v6396_v3 }
 0x132   : > { %v6400_v63 = vpop.f32.mrb[28].mxu0 }
 0x133   : > { %7862 = vst [vmem:[#allocation12_spill] sm:$0xff] %v6400_v63  ;;  %v6404_v61 = vpop.f32.mrb[28].mxu1  ;;  %v6406_v58 = vpop.f32.mrb[29].mxu0 }
 0x134   : > { %7863 = vst [vmem:[#allocation13_spill] sm:$0xff] %v6406_v58  ;;  %v6412_v55 = vpop.f32.mrb[29].mxu1 }
 0x135   : > { %7864 = vst [vmem:[#allocation14_spill] sm:$0xff] %v6412_v55 }
 0x136   : > { %v6416_v3 = vpop.f32.mrb[30].mxu0 }
 0x137   : > { %7865 = vst [vmem:[#allocation15_spill] sm:$0xff] %v6416_v3  ;;  %v6420_v63 = vpop.f32.mrb[30].mxu1  ;;  %v6422_v45 = vpop.f32.mrb[31].mxu0 }
 0x138   : > { %7866 = vst [vmem:[#allocation16_spill] sm:$0xff] %v6422_v45  ;;  %v6428_v58 = vpop.f32.mrb[31].mxu1  ;;  %v7891_v11 = vld [vmem:[#allocation11_spill] sm:$0xff] }
 0x139   : > { %7867 = vst [vmem:[#allocation17_spill] sm:$0xff] %v6428_v58 }
 0x13a   : > { %v1219_v55 = vpop.f32.mrb[32].mxu0 }
 0x13b   : > { %v6435_v19 = vmax.f32 %v7868_v48, %v1219_v55  ;;  %v1308_v3 = vpop.f32.mrb[32].mxu1  ;;  %v1221_v49 = vpop.f32.mrb[33].mxu0  ;;  %v7872_v48 = vmax.f32 %v6248_v26, %v6320_v2  ;;  %v7873_v55 = vmax.f32 %v6250_v59, %v6324_v4  ;;  %v7878_v4 = vmax.f32 %v6260_v60, %v6342_v13 }
 0x13c   : > { %v6440_v22 = vmax.f32 %v7869_v47, %v1308_v3  ;;  %v6445_v45 = vmax.f32 %v7870_v23, %v1221_v49  ;;  %v1310_v51 = vpop.f32.mrb[33].mxu1  ;;  %v7874_v49 = vmax.f32 %v6252_v27, %v6326_v5  ;;  %v7877_v3 = vmax.f32 %v6258_v30, %v6340_v12 }
 0x13d   : > { %v6450_v58 = vmax.f32 %v7871_v0, %v1310_v51  ;;  %v7882_v13 = vmax.f32 %v6268_v34, %v6358_v21  ;;  %v7886_v21 = vmax.f32 %v6276_v39, %v6374_v14  ;;  %v7890_v14 = vmax.f32 %v6284_v43, %v6390_v6  ;;  %v7897_v6 = vld [vmem:[#allocation7_spill] sm:$0xff] }
 0x13e   : > { %v1225_v1 = vpop.f32.mrb[34].mxu0 }
 0x13f   : > { %v6455_v54 = vmax.f32 %v7872_v48, %v1225_v1  ;;  %v1314_v35 = vpop.f32.mrb[34].mxu1  ;;  %v1227_v47 = vpop.f32.mrb[35].mxu0  ;;  %v7881_v48 = vmax.f32 %v6266_v33, %v6356_v20 }
 0x140   : > { %v6460_v52 = vmax.f32 %v7873_v55, %v1314_v35  ;;  %v6465_v56 = vmax.f32 %v7874_v49, %v1227_v47  ;;  %v1316_v0 = vpop.f32.mrb[35].mxu1  ;;  %v7885_v49 = vmax.f32 %v6274_v38, %v6372_v15 }
 0x141   : > { %v6470_v51 = vmax.f32 %v7875_v25, %v1316_v0 }
 0x142   : > { %v1231_v26 = vpop.f32.mrb[36].mxu0 }
 0x143   : > { %v6475_v62 = vmax.f32 %v7876_v57, %v1231_v26  ;;  %v1320_v59 = vpop.f32.mrb[36].mxu1  ;;  %v1233_v2 = vpop.f32.mrb[37].mxu0  ;;  %v7889_v57 = vmax.f32 %v6282_v42, %v6388_v7 }
 0x144   : > { %v6480_v27 = vmax.f32 %v7877_v3, %v1320_v59  ;;  %v6485_v5 = vmax.f32 %v7878_v4, %v1233_v2  ;;  %v1322_v28 = vpop.f32.mrb[37].mxu1  ;;  %v7892_v2 = vmax.f32 %v6286_v44, %v7891_v11  ;;  %v7894_v4 = vld [vmem:[#allocation12_spill] sm:$0xff] }
 0x145   : > { %v6490_v23 = vmax.f32 %v7879_v8, %v1322_v28  ;;  %v7895_v28 = vmax.f32 %v7893_v9, %v7894_v4 }
 0x146   : > { %v1237_v29 = vpop.f32.mrb[38].mxu0 }
 0x147   : > { %v6495_v1 = vmax.f32 %v7880_v10, %v1237_v29  ;;  %v1326_v30 = vpop.f32.mrb[38].mxu1  ;;  %v1239_v12 = vpop.f32.mrb[39].mxu0  ;;  %v7896_v29 = vmax.f32 %v6290_v46, %v6404_v61  ;;  %v7898_v10 = vld [vmem:[#allocation13_spill] sm:$0xff] }
 0x148   : > { %v6500_v60 = vmax.f32 %v7881_v48, %v1326_v30  ;;  %v6505_v35 = vmax.f32 %v7882_v13, %v1239_v12  ;;  %v1328_v31 = vpop.f32.mrb[39].mxu1  ;;  %v7899_v30 = vmax.f32 %v7897_v6, %v7898_v10  ;;  %v7900_v48 = vld [vmem:[#allocation8_spill] sm:$0xff]  ;;  %v7901_v13 = vld [vmem:[#allocation14_spill] sm:$0xff] }
 0x149   : > { %v6510_v47 = vmax.f32 %v7883_v16, %v1328_v31  ;;  %v7902_v31 = vmax.f32 %v7900_v48, %v7901_v13 }
 0x14a   : > { %v1397_v32 = vpop.f32.mrb[40].mxu0 }
 0x14b   : > { %v6515_v55 = vmax.f32 %v7884_v18, %v1397_v32  ;;  %v1486_v33 = vpop.f32.mrb[40].mxu1  ;;  %v1399_v20 = vpop.f32.mrb[41].mxu0  ;;  %v7903_v18 = vld [vmem:[#allocation9_spill] sm:$0xff] }
 0x14c   : > { %v6520_v34 = vmax.f32 %v7885_v49, %v1486_v33  ;;  %v6525_v0 = vmax.f32 %v7886_v21, %v1399_v20  ;;  %v1488_v36 = vpop.f32.mrb[41].mxu1  ;;  %v7904_v33 = vld [vmem:[#allocation15_spill] sm:$0xff]  ;;  %v7906_v21 = vmax.f32 %v6298_v50, %v6420_v63 }
 0x14d   : > { %v6530_v25 = vmax.f32 %v7887_v24, %v1488_v36  ;;  %v7905_v20 = vmax.f32 %v7903_v18, %v7904_v33  ;;  %v7907_v24 = vld [vmem:[#allocation10_spill] sm:$0xff] }
 0x14e   : > { %v1403_v37 = vpop.f32.mrb[42].mxu0 }
 0x14f   : > { %v6535_v26 = vmax.f32 %v7888_v17, %v1403_v37  ;;  %v1492_v38 = vpop.f32.mrb[42].mxu1  ;;  %v1405_v15 = vpop.f32.mrb[43].mxu0  ;;  %v7908_v37 = vld [vmem:[#allocation16_spill] sm:$0xff] }
 0x150   : > { %v6540_v39 = vmax.f32 %v7889_v57, %v1492_v38  ;;  %v6545_v59 = vmax.f32 %v7890_v14, %v1405_v15  ;;  %v1494_v40 = vpop.f32.mrb[43].mxu1  ;;  %v7909_v17 = vmax.f32 %v7907_v24, %v7908_v37  ;;  %v6587_v57 = vpop.permute.xlu0 %1991  ;;  %v7910_v14 = vld [vmem:[#allocation17_spill] sm:$0xff] }
 0x151   : > { %v6550_v3 = vmax.f32 %v7892_v2, %v1494_v40  ;;  %v7911_v40 = vmax.f32 %v6302_v53, %v7910_v14 }
 0x152   : > { %v1409_v41 = vpop.f32.mrb[44].mxu0 }
 0x153   : > { %v6555_v8 = vmax.f32 %v7895_v28, %v1409_v41  ;;  %v1498_v42 = vpop.f32.mrb[44].mxu1  ;;  %v1411_v7 = vpop.f32.mrb[45].mxu0 }
 0x154   : > { %v6560_v43 = vmax.f32 %v7896_v29, %v1498_v42  ;;  %v6565_v12 = vmax.f32 %v7899_v30, %v1411_v7  ;;  %v1500_v44 = vpop.f32.mrb[45].mxu1  ;;  %v6599_v6 = vpop.permute.xlu0 %1996 }
 0x155   : > { %v6570_v16 = vmax.f32 %v7902_v31, %v1500_v44  ;;  %v6609_v31 = vpop.permute.xlu1 %2001 }
 0x156   : > { %v1415_v32 = vpop.f32.mrb[46].mxu0 }
 0x157   : > { %v6575_v49 = vmax.f32 %v7905_v20, %v1415_v32  ;;  %v1504_v46 = vpop.f32.mrb[46].mxu1  ;;  %v1417_v61 = vpop.f32.mrb[47].mxu0 }
 0x158   : > { %v6580_v36 = vmax.f32 %v7906_v21, %v1504_v46  ;;  %v6585_v38 = vmax.f32 %v7909_v17, %v1417_v61  ;;  %v1506_v15 = vpop.f32.mrb[47].mxu1 }
 0x159   : > { %v6592_v11 = vmax.f32 %v7911_v40, %v1506_v15 }
 0x15a   : > { %v1663_v2 = vpop.f32.mrb[48].mxu0 }
 0x15b   : > { %v1953_v41 = vmax.f32 %v6435_v19, %v1663_v2  ;;  %v1752_v9 = vpop.f32.mrb[48].mxu1  ;;  %v1665_v50 = vpop.f32.mrb[49].mxu0 }
 0x15c   : > { %v1955_v63 = vmax.f32 %v6440_v22, %v1752_v9  ;;  %v1954_v4 = vmax.f32 %v6445_v45, %v1665_v50  ;;  %v1754_v28 = vpop.f32.mrb[49].mxu1 }
 0x15d   : > { %v1956_v42 = vmax.f32 %v6450_v58, %v1754_v28  ;;  %v2009_v7 = vadd.f32 %v6587_v57, %v1953_v41 }
 0x15e   : > { %v1669_v29 = vpop.f32.mrb[50].mxu0  ;;  %v2011_v53 = vadd.f32 %v6587_v57, %v1955_v63  ;;  %v2010_v10 = vadd.f32 %v6587_v57, %v1954_v4 }
 0x15f   : > { %v1961_v19 = vmax.f32 %v6455_v54, %v1669_v29  ;;  %v1758_v30 = vpop.f32.mrb[50].mxu1  ;;  %v1671_v44 = vpop.f32.mrb[51].mxu0  ;;  %v2012_v22 = vadd.f32 %v6587_v57, %v1956_v42  ;;  %v6605_v48 = vmax.f32 %v2009_v7, 0.0 }
 0x160   : > { %v1963_v45 = vmax.f32 %v6460_v52, %v1758_v30  ;;  %v1962_v58 = vmax.f32 %v6465_v56, %v1671_v44  ;;  %v1760_v13 = vpop.f32.mrb[51].mxu1  ;;  %v6611_v32 = vmax.f32 %v2011_v53, 0.0  ;;  %v6613_v18 = vmax.f32 %v2010_v10, 0.0  ;;  %v6645_v42 = vpop.permute.xlu1 %2006 }
 0x161   : > { %v1964_v33 = vmax.f32 %v6470_v51, %v1760_v13  ;;  %v6616_v54 = vmax.f32 %v2012_v22, 0.0  ;;  %v2017_v20 = vadd.f32 %v6599_v6, %v1961_v19 }
 0x162   : > { %v1675_v46 = vpop.f32.mrb[52].mxu0  ;;  %v2019_v61 = vadd.f32 %v6599_v6, %v1963_v45  ;;  %v2018_v52 = vadd.f32 %v6599_v6, %v1962_v58 }
 0x163   : > { %v1969_v21 = vmax.f32 %v6475_v62, %v1675_v46  ;;  %v1764_v24 = vpop.f32.mrb[52].mxu1  ;;  %v1677_v37 = vpop.f32.mrb[53].mxu0  ;;  %v6626_v17 = vpack.i.bf16 %v6616_v54, %v6611_v32  ;;  %v2020_v51 = vadd.f32 %v6599_v6, %v1964_v33  ;;  %v6629_v15 = vmax.f32 %v2017_v20, 0.0 }
 0x164   : > { %v1971_v14 = vmax.f32 %v6480_v27, %v1764_v24  ;;  %v1970_v40 = vmax.f32 %v6485_v5, %v1677_v37  ;;  %v1766_v2 = vpop.f32.mrb[53].mxu1  ;;  %v6633_v41 = vmax.f32 %v2019_v61, 0.0  ;;  %v6635_v9 = vmax.f32 %v2018_v52, 0.0 }
 0x165   : > { %v1972_v62 = vmax.f32 %v6490_v23, %v1766_v2  ;;  %v6638_v50 = vmax.f32 %v2020_v51, 0.0  ;;  %v6642_v63 = vpack.i.bf16 %v6629_v15, %v6605_v48  ;;  %v2025_v4 = vadd.f32 %v6609_v31, %v1969_v21 }
 0x166   : > { %v1681_v28 = vpop.f32.mrb[54].mxu0  ;;  %v2027_v27 = vadd.f32 %v6609_v31, %v1971_v14  ;;  %v6650_v5 = vpack.i.bf16 %v6635_v9, %v6613_v18  ;;  %v2026_v7 = vadd.f32 %v6609_v31, %v1970_v40  ;;  %v6824_v23 = vpack.c.bf16 %v6633_v41, %v6611_v32 }
 0x167   : > { %v1977_v29 = vmax.f32 %v6495_v1, %v1681_v28  ;;  %v1770_v53 = vpop.f32.mrb[54].mxu1  ;;  %v1683_v10 = vpop.f32.mrb[55].mxu0  ;;  %v2028_v19 = vadd.f32 %v6609_v31, %v1972_v62  ;;  %v6659_v30 = vpack.i.bf16 %v6638_v50, %v6633_v41  ;;  %v6661_v44 = vmax.f32 %v2025_v4, 0.0 }
 0x168   : > { %v1979_v22 = vmax.f32 %v6500_v60, %v1770_v53  ;;  %v1978_v45 = vmax.f32 %v6505_v35, %v1683_v10  ;;  %v1772_v58 = vpop.f32.mrb[55].mxu1  ;;  %v6665_v13 = vmax.f32 %v2027_v27, 0.0  ;;  %v6667_v33 = vmax.f32 %v2026_v7, 0.0  ;;  %7912 = vst [vmem:[#allocation11_spill] sm:$0xff] %v6824_v23 }
 0x169   : > { %v1980_v1 = vmax.f32 %v6510_v47, %v1772_v58  ;;  %v6670_v20 = vmax.f32 %v2028_v19, 0.0  ;;  %v2033_v46 = vadd.f32 %v6645_v42, %v1977_v29 }
 0x16a   : > { %v1841_v52 = vpop.f32.mrb[56].mxu0  ;;  %v2035_v21 = vadd.f32 %v6645_v42, %v1979_v22  ;;  %v2034_v60 = vadd.f32 %v6645_v42, %v1978_v45 }
 0x16b   : > { %v1957_v47 = vmax.f32 %v6515_v55, %v1841_v52  ;;  %v1930_v37 = vpop.f32.mrb[56].mxu1  ;;  %v1843_v51 = vpop.f32.mrb[57].mxu0  ;;  %v6684_v14 = vpack.i.bf16 %v6670_v20, %v6665_v13  ;;  %v2036_v40 = vadd.f32 %v6645_v42, %v1980_v1  ;;  %v6687_v2 = vmax.f32 %v2033_v46, 0.0 }
 0x16c   : > { %v1959_v62 = vmax.f32 %v6520_v34, %v1930_v37  ;;  %v1958_v4 = vmax.f32 %v6525_v0, %v1843_v51  ;;  %v1932_v28 = vpop.f32.mrb[57].mxu1  ;;  %v6691_v27 = vmax.f32 %v2035_v21, 0.0  ;;  %v6693_v7 = vmax.f32 %v2034_v60, 0.0 }
 0x16d   : > { %v2013_v55 = vadd.f32 %v6587_v57, %v1957_v47  ;;  %v1960_v29 = vmax.f32 %v6530_v25, %v1932_v28  ;;  %v6697_v53 = vmax.f32 %v2036_v40, 0.0  ;;  %v6701_v10 = vpack.i.bf16 %v6687_v2, %v6661_v44 }
 0x16e   : > { %v6704_v19 = vadd.f32 %v6587_v57, %v1959_v62  ;;  %v2014_v34 = vadd.f32 %v6587_v57, %v1958_v4  ;;  %v1847_v0 = vpop.f32.mrb[58].mxu0  ;;  %v6709_v22 = vpack.i.bf16 %v6693_v7, %v6667_v33 }
 0x16f   : > { %v6713_v25 = vmax.f32 %v2013_v55, 0.0  ;;  %v6716_v58 = vadd.f32 %v6587_v57, %v1960_v29  ;;  %v1965_v1 = vmax.f32 %v6535_v26, %v1847_v0  ;;  %v1936_v46 = vpop.f32.mrb[58].mxu1  ;;  %v1849_v52 = vpop.f32.mrb[59].mxu0  ;;  %v6721_v21 = vpack.i.bf16 %v6697_v53, %v6691_v27 }
 0x170   : > { %v7848_v60 = vmax.f32 %v6704_v19, 0.0  ;;  %v6724_v47 = vmax.f32 %v2014_v34, 0.0  ;;  %v1967_v37 = vmax.f32 %v6540_v39, %v1936_v46  ;;  %v1966_v51 = vmax.f32 %v6545_v59, %v1849_v52  ;;  %v1938_v40 = vpop.f32.mrb[59].mxu1 }
 0x171   : > { %v2048_v57 = vmax.f32 %v6716_v58, 0.0  ;;  %v2021_v62 = vadd.f32 %v6599_v6, %v1965_v1  ;;  %v1968_v26 = vmax.f32 %v6550_v3, %v1938_v40  ;;  %v6828_v56 = vpack.c.bf16 %v6697_v53, %v6670_v20 }
 0x172   : > { %v6734_v28 = vadd.f32 %v6599_v6, %v1967_v37  ;;  %v2022_v55 = vadd.f32 %v6599_v6, %v1966_v51  ;;  %v1853_v29 = vpop.f32.mrb[60].mxu0  ;;  %v6739_v39 = vpack.i.bf16 %v6724_v47, %v6713_v25  ;;  %v7919_v58 = vpack.i.bf16 %v6633_v41, %v6611_v32  ;;  %v3201_v41 = vld [vmem:[%s7831_s4 + $0x8] sm:$0xff] }
 0x173   : > { %v6741_v59 = vmax.f32 %v2021_v62, 0.0  ;;  %v6744_v34 = vadd.f32 %v6599_v6, %v1968_v26  ;;  %v1973_v3 = vmax.f32 %v6555_v8, %v1853_v29  ;;  %v1942_v0 = vpop.f32.mrb[60].mxu1  ;;  %v1855_v1 = vpop.f32.mrb[61].mxu0  ;;  %v6751_v46 = vpack.i.bf16 %v2048_v57, %v7848_v60  ;;  %7913 = vst [vmem:[#allocation6_spill] sm:$0xff] %v6828_v56 }
 0x174   : > { %v7847_v52 = vmax.f32 %v6734_v28, 0.0  ;;  %v6754_v37 = vmax.f32 %v2022_v55, 0.0  ;;  %v1975_v51 = vmax.f32 %v6560_v43, %v1942_v0  ;;  %v1974_v40 = vmax.f32 %v6565_v12, %v1855_v1  ;;  %v1944_v6 = vpop.f32.mrb[61].mxu1 }
 0x175   : > { %v2056_v62 = vmax.f32 %v6744_v34, 0.0  ;;  %v2029_v8 = vadd.f32 %v6609_v31, %v1973_v3  ;;  %v1976_v26 = vmax.f32 %v6570_v16, %v1944_v6  ;;  %5418 = vrot.lane.b32.xlu0 %v6751_v46, %s5724_s9  ;;  %v6843_v61 = vpack.c.bf16 %v6741_v59, %v6713_v25 }
 0x176   : > { %v2031_v29 = vadd.f32 %v6609_v31, %v1975_v51  ;;  %v2030_v55 = vadd.f32 %v6609_v31, %v1974_v40  ;;  %v1859_v45 = vpop.f32.mrb[62].mxu0  ;;  %v5432_v43 = vpack.i.bf16 %v6754_v37, %v6741_v59  ;;  %v7916_v23 = vmax.f32 %v6734_v28, 0.0 }
 0x177   : > { %v6767_v12 = vmax.f32 %v2029_v8, 0.0  ;;  %v2032_v34 = vadd.f32 %v6609_v31, %v1976_v26  ;;  %v1981_v3 = vmax.f32 %v6575_v49, %v1859_v45  ;;  %v1948_v0 = vpop.f32.mrb[62].mxu1  ;;  %v1861_v16 = vpop.f32.mrb[63].mxu0  ;;  %v6773_v1 = vpack.i.bf16 %v2056_v62, %v7847_v52 }
 0x178   : > { %v2063_v6 = vmax.f32 %v2031_v29, 0.0  ;;  %v6775_v51 = vmax.f32 %v2030_v55, 0.0  ;;  %v1983_v40 = vmax.f32 %v6580_v36, %v1948_v0  ;;  %v1982_v24 = vmax.f32 %v6585_v38, %v1861_v16  ;;  %v1950_v35 = vpop.f32.mrb[63].mxu1 }
 0x179   : > { %v2064_v8 = vmax.f32 %v2032_v34, 0.0  ;;  %v2037_v4 = vadd.f32 %v6645_v42, %v1981_v3  ;;  %v1984_v31 = vmax.f32 %v6592_v11, %v1950_v35  ;;  %5428 = vrot.lane.b32.xlu1 %v6773_v1, %s5724_s9  ;;  %5423 = vrot.lane.b32.xlu0 %v6739_v39, %s5725_s11  ;;  %v5557_v34 = vpack.i.bf16 %v6754_v37, %v6724_v47 }
 0x17a   : > { %v2039_v49 = vadd.f32 %v6645_v42, %v1983_v40  ;;  %v2038_v45 = vadd.f32 %v6645_v42, %v1982_v24  ;;  %v5442_v36 = vpack.i.bf16 %v6775_v51, %v6767_v12  ;;  %v5562_v24 = vpack.i.bf16 %v6741_v59, %v6713_v25 }
 0x17b   : > { %v2069_v38 = vmax.f32 %v2037_v4, 0.0  ;;  %v2040_v26 = vadd.f32 %v6645_v42, %v1984_v31  ;;  %v5437_v29 = vpack.i.bf16 %v2064_v8, %v2063_v6  ;;  %v5612_v16 = vpack.i.bf16 %v6693_v7, %v6687_v2 }
 0x17c   : > { %v2071_v55 = vmax.f32 %v2039_v49, 0.0  ;;  %v2070_v11 = vmax.f32 %v2038_v45, 0.0  ;;  %v6804_v40 = vpack.c.bf16 %v6635_v9, %v6613_v18  ;;  %v6808_v31 = vpack.c.bf16 %v6629_v15, %v6605_v48 }
 0x17d   : > { %v2072_v35 = vmax.f32 %v2040_v26, 0.0  ;;  %5438 = vrot.lane.b32.xlu0 %v5437_v29, %s5724_s9  ;;  %5433 = vrot.lane.b32.xlu1 %v5432_v43, %s5725_s11  ;;  %v5572_v4 = vpack.i.bf16 %v2069_v38, %v6767_v12  ;;  %v6812_v49 = vpack.c.bf16 %v6693_v7, %v6667_v33  ;;  %v6816_v45 = vpack.c.bf16 %v6687_v2, %v6661_v44 }
 0x17e   : > { %v5457_v3 = vpack.i.bf16 %v2070_v11, %v2069_v38  ;;  %v5567_v0 = vpack.i.bf16 %v2070_v11, %v6775_v51  ;;  %v6820_v26 = vpack.c.bf16 %v6638_v50, %v6616_v54  ;;  %v6835_v2 = vpack.c.bf16 %v6691_v27, %v6665_v13 }
 0x17f   : > { %v5452_v42 = vpack.i.bf16 %v2072_v35, %v2071_v55  ;;  %v6839_v7 = vpack.c.bf16 %v6754_v37, %v6724_v47  ;;  %v6846_v52 = vpack.c.bf16 %v2070_v11, %v6775_v51  ;;  %v6849_v60 = vpack.c.bf16 %v2069_v38, %v6767_v12 }
 0x180   : > { %7914 = vst [vmem:[#allocation12_spill] sm:$0xff] %v6835_v2  ;;  %v6853_v56 = vpack.c.bf16 %v2056_v62, %v2048_v57  ;;  %v7915_v2 = vmax.f32 %v6704_v19, 0.0  ;;  %v6861_v37 = vpack.c.bf16 %v2072_v35, %v2064_v8  ;;  %v6863_v25 = vpack.c.bf16 %v2071_v55, %v2063_v6  ;;  %v6892_v57 = vld [vmem:[%s7830_s3 + $0x8] sm:$0xff] }
 0x181   : > { %5453 = vrot.lane.b32.xlu1 %v5452_v42, %s5724_s9  ;;  %5443 = vrot.lane.b32.xlu0 %v5442_v36, %s5725_s11  ;;  %v7918_v19 = vpack.i.bf16 %v6613_v18, %v6605_v48  ;;  %v7921_v48 = vpack.i.bf16 %v6635_v9, %v6629_v15  ;;  %v7922_v32 = vpack.i.bf16 %v6667_v33, %v6661_v44  ;;  %v3200_v15 = vld [vmem:[%s7831_s4] sm:$0xff] }
 0x182   : > { %v6859_v47 = vpack.c.bf16 %v7916_v23, %v7915_v2  ;;  %v7917_v23 = vpack.i.bf16 %v6638_v50, %v6616_v54  ;;  %3337 = vmatprep.mubr.f32.mxu0 %v6892_v57  ;;  %3563 = vmatprep.mubr.f32.mxu1 %v6892_v57  ;;  %v7920_v54 = vpack.i.bf16 %v6697_v53, %v6670_v20  ;;  %v3204_v9 = vld [vmem:[%s7831_s4 + $0x20] sm:$0xff]  ;;  %v3203_v50 = vld [vmem:[%s7831_s4 + $0x18] sm:$0xff] }
 0x183   : > { %v7923_v18 = vpack.i.bf16 %v6691_v27, %v6665_v13  ;;  %v3207_v13 = vld [vmem:[%s7831_s4 + $0x38] sm:$0xff] }
 0x185   : > { %5448 = vrot.lane.b32.xlu0 %v6751_v46, %s5725_s11  ;;  %5458 = vrot.lane.b32.xlu1 %v5457_v3, %s5725_s11 }
 0x189   : > { %5468 = vrot.lane.b32.xlu0 %v5437_v29, %s5725_s11  ;;  %5463 = vrot.lane.b32.xlu1 %v6773_v1, %s5725_s11 }
 0x18d   : > { %5473 = vrot.lane.b32.xlu0 %v6739_v39, %s5726_s12  ;;  %5478 = vrot.lane.b32.xlu1 %v5452_v42, %s5725_s11  ;;  %s5732_s11 = smov [#allocation3]  }
 0x191   : > { %5488 = vrot.lane.b32.xlu0 %v5442_v36, %s5726_s12  ;;  %5483 = vrot.lane.b32.xlu1 %v5432_v43, %s5726_s12 }
 0x195   : > { %5493 = vrot.lane.b32.xlu0 %v6626_v17, %s5727_s13  ;;  %5498 = vrot.lane.b32.xlu1 %v5457_v3, %s5726_s12  ;;  %s5661_s12 = sshll.u32 %s5732_s11, 4  ;;  %s5662_s12 = int_to_ptr.vmem [resolvable:$false] %s5661_s12 }
 0x199   : > { %5508 = vrot.lane.b32.xlu0 %v6684_v14, %s5727_s13  ;;  %5503 = vrot.lane.b32.xlu1 %v6659_v30, %s5727_s13 }
 0x19d   : > { %5518 = vrot.lane.b32.xlu0 %v6650_v5, %s5728_s14  ;;  %5513 = vrot.lane.b32.xlu1 %v6721_v21, %s5727_s13 }
 0x1a1   : > { %5528 = vrot.lane.b32.xlu0 %v6709_v22, %s5728_s14  ;;  %5523 = vrot.lane.b32.xlu1 %v6642_v63, %s5728_s14 }
 0x1a5   : > { %5538 = vrot.lane.b32.xlu0 %v6751_v46, %s5727_s13  ;;  %5533 = vrot.lane.b32.xlu1 %v6701_v10, %s5728_s14 }
 0x1a9   : > { %5548 = vrot.lane.b32.xlu0 %v5437_v29, %s5727_s13  ;;  %5543 = vrot.lane.b32.xlu1 %v6773_v1, %s5727_s13 }
 0x1ad   : > { %5558 = vrot.lane.b32.xlu0 %v5557_v34, %s5728_s14  ;;  %5553 = vrot.lane.b32.xlu1 %v5452_v42, %s5727_s13  ;;  %s5663_s13 = scalar_lea.vmem %s5662_s12, 2048 }
 0x1b1   : > { %5568 = vrot.lane.b32.xlu0 %v5567_v0, %s5728_s14  ;;  %5563 = vrot.lane.b32.xlu1 %v5562_v24, %s5728_s14 }
 0x1b5   : > { %5578 = vrot.lane.b32.xlu0 %v7917_v23, %s5729_s15  ;;  %5573 = vrot.lane.b32.xlu1 %v5572_v4, %s5728_s14 }
 0x1b9   : > { %5588 = vrot.lane.b32.xlu0 %v7918_v19, %s5730_s16  ;;  %5583 = vrot.lane.b32.xlu1 %v7919_v58, %s5729_s15 }
 0x1bd   : > { %5598 = vrot.lane.b32.xlu0 %v7920_v54, %s5729_s15  ;;  %5593 = vrot.lane.b32.xlu1 %v7921_v48, %s5730_s16 }
 0x1c1   : > { %5608 = vrot.lane.b32.xlu0 %v7922_v32, %s5730_s16  ;;  %5603 = vrot.lane.b32.xlu1 %v7923_v18, %s5729_s15 }
 0x1c5   : > { %5618 = vrot.lane.b32.xlu0 %v6626_v17, %s5730_s16  ;;  %5613 = vrot.lane.b32.xlu1 %v5612_v16, %s5730_s16  ;;  %v3202_v17 = vld [vmem:[%s7831_s4 + $0x10] sm:$0xff] }
 0x1c9   : > { %5628 = vrot.lane.b32.xlu0 %v6684_v14, %s5730_s16  ;;  %5623 = vrot.lane.b32.xlu1 %v6659_v30, %s5730_s16  ;;  %v3205_v30 = vld [vmem:[%s7831_s4 + $0x28] sm:$0xff] }
 0x1cd   : > { %5638 = vrot.lane.b32.xlu0 %v6650_v5, %s5731_s25  ;;  %5633 = vrot.lane.b32.xlu1 %v6721_v21, %s5730_s16  ;;  %v3206_v5 = vld [vmem:[%s7831_s4 + $0x30] sm:$0xff] }
 0x1d1   : > { %5648 = vrot.lane.b32.xlu0 %v6709_v22, %s5731_s25  ;;  %5643 = vrot.lane.b32.xlu1 %v6642_v63, %s5731_s25  ;;  %v2073_v63 = vlaneseq }
 0x1d3   : > { %v6937_v44 = vand.u32 127, %v2073_v63 }
 0x1d5   : > { %3210 = vperm.xlu0 %5415, %v3200_v15   ;;  %5653 = vrot.lane.b32.xlu1 %v6701_v10, %s5731_s25  ;;  %v6943_v33 = vadd.s32 128, %v6937_v44  ;;  %v2080_v27 = vand.u32 15, %v6937_v44  ;;  %s4425_s25 = sshll.u32 %s215_s23, 6 }
 0x1d6   : > { %s7732_s26 = scalar_lea.vmem [#allocation3], %s4425_s25 }
 0x1d7   : > { %v2087_v14 = vand.u32 15, %v6943_v33  ;;  %vm2100_vm6 = vcmp.gt.s32.totalorder %v2080_v27, 0  ;;  %vm7002_vm14 = vcmp.lt.s32.totalorder %v2080_v27, 15  ;;  %s4359_s6 = sshll.u32 %s7732_s26, 4  ;;  %s7781_s6 = int_to_ptr.vmem [resolvable:$true] %s4359_s6 }
 0x1d8   : > { %vm6959_vm8 = vmpackc.low %vm2100_vm6, %vm2100_vm6  ;;  %s5657_s9 = scalar_lea.vmem %s7781_s6, 1024  ;;  %p5664_p0 = scmp.lt.s32.totalorder %s7781_s6, %s5662_s12 }
 0x1d9   : > { %3220 = vperm.xlu0 %5415, %v3202_v17   ;;  %3215 = vperm.xlu1 %5416, %v3201_v41   ;;  %vm2101_vm5 = vcmp.gt.s32.totalorder %v2087_v14, 0  ;;  %vm2103_vm13 = vcmp.lt.s32.totalorder %v2087_v14, 15  ;;  %vm7021_vm0 = vmpackc.low %vm7002_vm14, %vm7002_vm14  ;;  %p5658_p11 = scmp.ne.s32.totalorder %s7781_s6, %s5657_s9  ;;  %p5665_p1 = scmp.lt.s32.totalorder %s5663_s13, %s5657_s9 }
 0x1da   : > { %vm6955_vm7 = vmpackc.low %vm2101_vm5, %vm2101_vm5  ;;  %vm2726_vm5 = vcmask 916480  }
 0x1db   : > { %vm7014_vm15 = vmpackc.low %vm2103_vm13, %vm2103_vm13  ;;  %p5659_p12 = pnand %p5658_p11, %p5803_p5  ;;  %p5666_p2 = por %p5665_p1, %p5664_p0 }
 0x1dc   : > { %vm7492_vm6 = vmpackc.low %vm2726_vm5, %vm2726_vm5 }
 0x1dd   : > { %3230 = vperm.xlu0 %5415, %v3204_v9   ;;  %3225 = vperm.xlu1 %5416, %v3203_v50   ;;  %p5660_p13 = pneg %p5659_p12 }
 0x1df   : > { %p5667_p3 = pnand %p5666_p2, %p5660_p13 }
 0x1e1   : > { %3240 = vperm.xlu0 %5415, %v3206_v5   ;;  %3235 = vperm.xlu1 %5416, %v3205_v30  }
 0x1e5   : > { %3245 = vperm.xlu1 %5416, %v3207_v13  }
 0x1e7   : > { %v5419_v20 = vpop.permute.xlu0 %5418 }
 0x1e8   : > { %v5421_v53 = vunpack.i.h.bf16 %v5419_v20  ;;  %v5420_v10 = vunpack.i.l.bf16 %v5419_v20 }
 0x1ea   : > { %v2129_v59 = vsel %vm2128_vm4, %v5420_v10, %v5421_v53  ;;  %v2141_v46 = vsel %vm2128_vm4, 0.0, %v5420_v10 }
 0x1eb   : > { %v5429_v22 = vpop.permute.xlu1 %5428  ;;  %v5424_v21 = vpop.permute.xlu0 %5423 }
 0x1ec   : > { %v5431_v28 = vunpack.i.h.bf16 %v5429_v22  ;;  %v5430_v39 = vunpack.i.l.bf16 %v5429_v22  ;;  %v5426_v12 = vunpack.i.h.bf16 %v5424_v21  ;;  %v5425_v1 = vunpack.i.l.bf16 %v5424_v21 }
 0x1ee   : > { %v2130_v62 = vsel %vm2128_vm4, %v5430_v39, %v5431_v28  ;;  %v2142_v43 = vsel %vm2128_vm4, 0.0, %v5430_v39  ;;  %v2190_v24 = vsel %vm2189_vm9, %v5425_v1, %v5426_v12 }
 0x1ef   : > { %v4883_v51 = vpack.c.bf16 %v2130_v62, %v2129_v59  ;;  %v4886_v8 = vpack.c.bf16 %v2142_v43, %v2141_v46  ;;  %v5439_v36 = vpop.permute.xlu0 %5438  ;;  %v5434_v38 = vpop.permute.xlu1 %5433 }
 0x1f0   : > { %v5436_v55 = vunpack.i.h.bf16 %v5434_v38  ;;  %v5435_v11 = vunpack.i.l.bf16 %v5434_v38  ;;  %v5441_v35 = vunpack.i.h.bf16 %v5439_v36  ;;  %v5440_v34 = vunpack.i.l.bf16 %v5439_v36 }
 0x1f1   : > { %4885 = vmatprep.subr.msk.bf16.mxu0 %vm6955_vm7, %v4883_v51 }
 0x1f2   : > { %4888 = vmatpush1.bf16.msk.msra.mxu0 %vm6959_vm8, %v4886_v8  ;;  %v2191_v3 = vsel %vm2189_vm9, %v5435_v11, %v5436_v55  ;;  %v4897_v2 = vpack.c.bf16 %v5435_v11, %v5425_v1  ;;  %v2131_v58 = vsel %vm2128_vm4, %v5440_v34, %v5441_v35  ;;  %v2143_v54 = vsel %vm2128_vm4, 0.0, %v5440_v34 }
 0x1f3   : > { %v5454_v0 = vpop.permute.xlu1 %5453  ;;  %v5444_v4 = vpop.permute.xlu0 %5443  ;;  %v4895_v42 = vpack.c.bf16 %v2191_v3, %v2190_v24 }
 0x1f4   : > { %v5456_v23 = vunpack.i.h.bf16 %v5454_v0  ;;  %v5455_v19 = vunpack.i.l.bf16 %v5454_v0  ;;  %v5446_v18 = vunpack.i.h.bf16 %v5444_v4  ;;  %v5445_v15 = vunpack.i.l.bf16 %v5444_v4 }
 0x1f5   : > { %4972 = vmatprep.subr.bf16.mxu1 %v4895_v42 }
 0x1f6   : > { %v2132_v48 = vsel %vm2128_vm4, %v5455_v19, %v5456_v23  ;;  %v2144_v32 = vsel %vm2128_vm4, 0.0, %v5455_v19  ;;  %4975 = vmatpush1.bf16.msk.msra.mxu1 %vm6970_vm11, %v4897_v2  ;;  %v2192_v20 = vsel %vm2189_vm9, %v5445_v15, %v5446_v18  ;;  %vm2677_vm4 = vcmask 924672  }
 0x1f7   : > { %v4889_v17 = vpack.c.bf16 %v2132_v48, %v2131_v58  ;;  %v4892_v41 = vpack.c.bf16 %v2144_v32, %v2143_v54  ;;  %v5449_v9 = vpop.permute.xlu0 %5448  ;;  %v5459_v50 = vpop.permute.xlu1 %5458 }
 0x1f8   : > { %v5461_v63 = vunpack.i.h.bf16 %v5459_v50  ;;  %v5460_v5 = vunpack.i.l.bf16 %v5459_v50  ;;  %v5451_v30 = vunpack.i.h.bf16 %v5449_v9  ;;  %v5450_v13 = vunpack.i.l.bf16 %v5449_v9 }
 0x1f9   : > { %4891 = vmatprep.subr.msk.bf16.mxu0 %vm6955_vm7, %v4889_v17 }
 0x1fa   : > { %4894 = vmatpush1.bf16.msk.msra.mxu0 %vm6959_vm8, %v4892_v41  ;;  %v2193_v53 = vsel %vm2189_vm9, %v5460_v5, %v5461_v63  ;;  %v4902_v28 = vpack.c.bf16 %v5460_v5, %v5445_v15  ;;  %v2303_v43 = vsel %vm2189_vm9, %v5450_v13, %v5451_v30 }
 0x1fb   : > { %4896 = vmatprep.subr.bf16.mxu0 %v4895_v42  ;;  %v5469_v10 = vpop.permute.xlu0 %5468  ;;  %v5464_v22 = vpop.permute.xlu1 %5463  ;;  %v4900_v21 = vpack.c.bf16 %v2193_v53, %v2192_v20 }
 0x1fc   : > { %v5466_v39 = vunpack.i.h.bf16 %v5464_v22  ;;  %v5465_v59 = vunpack.i.l.bf16 %v5464_v22  ;;  %v5471_v46 = vunpack.i.h.bf16 %v5469_v10  ;;  %v5470_v62 = vunpack.i.l.bf16 %v5469_v10 }
 0x1fd   : > { %4977 = vmatprep.subr.bf16.mxu1 %v4900_v21 }
 0x1fe   : > { %4899 = vmatpush1.bf16.msk.msra.mxu0 %vm6970_vm11, %v4897_v2  ;;  %4980 = vmatpush1.bf16.msk.msra.mxu1 %vm6970_vm11, %v4902_v28  ;;  %v2304_v12 = vsel %vm2189_vm9, %v5465_v59, %v5466_v39  ;;  %v4907_v36 = vpack.c.bf16 %v5465_v59, %v5450_v13  ;;  %v2305_v34 = vsel %vm2189_vm9, %v5470_v62, %v5471_v46 }
 0x1ff   : > { %v5474_v1 = vpop.permute.xlu0 %5473  ;;  %v5479_v51 = vpop.permute.xlu1 %5478  ;;  %4901 = vmatprep.subr.bf16.mxu0 %v4900_v21  ;;  %v4905_v8 = vpack.c.bf16 %v2304_v12, %v2303_v43 }
 0x200   : > { %v5481_v38 = vunpack.i.h.bf16 %v5479_v51  ;;  %v5480_v55 = vunpack.i.l.bf16 %v5479_v51  ;;  %v5476_v11 = vunpack.i.h.bf16 %v5474_v1  ;;  %v5475_v35 = vunpack.i.l.bf16 %v5474_v1 }
 0x201   : > { %4982 = vmatprep.subr.bf16.mxu1 %v4905_v8 }
 0x202   : > { %4904 = vmatpush1.bf16.msk.msra.mxu0 %vm6970_vm11, %v4902_v28  ;;  %4985 = vmatpush1.bf16.msk.msra.mxu1 %vm6970_vm11, %v4907_v36  ;;  %v2306_v24 = vsel %vm2189_vm9, %v5480_v55, %v5481_v38  ;;  %v4912_v42 = vpack.c.bf16 %v5480_v55, %v5470_v62  ;;  %v2368_v58 = vsel %vm2367_vm12, %v5475_v35, %v5476_v11  ;;  %v2380_v54 = vsel %vm2367_vm12, 0.0, %v5475_v35 }
 0x203   : > { %v5489_v3 = vpop.permute.xlu0 %5488  ;;  %v5484_v0 = vpop.permute.xlu1 %5483  ;;  %4906 = vmatprep.subr.bf16.mxu0 %v4905_v8  ;;  %v4910_v4 = vpack.c.bf16 %v2306_v24, %v2305_v34  ;;  %vm2855_vm9 = vcmask 908288  }
 0x204   : > { %v5486_v2 = vunpack.i.h.bf16 %v5484_v0  ;;  %v5485_v23 = vunpack.i.l.bf16 %v5484_v0  ;;  %v5491_v48 = vunpack.i.h.bf16 %v5489_v3  ;;  %v5490_v32 = vunpack.i.l.bf16 %v5489_v3 }
 0x205   : > { %4987 = vmatprep.subr.bf16.mxu1 %v4910_v4 }
 0x206   : > { %v2369_v18 = vsel %vm2367_vm12, %v5485_v23, %v5486_v2  ;;  %v2381_v33 = vsel %vm2367_vm12, 0.0, %v5485_v23  ;;  %4909 = vmatpush1.bf16.msk.msra.mxu0 %vm6970_vm11, %v4907_v36  ;;  %4990 = vmatpush1.bf16.msk.msra.mxu1 %vm6970_vm11, %v4912_v42  ;;  %v2370_v30 = vsel %vm2367_vm12, %v5490_v32, %v5491_v48  ;;  %v2382_v13 = vsel %vm2367_vm12, 0.0, %v5490_v32 }
 0x207   : > { %v4991_v14 = vpack.c.bf16 %v2369_v18, %v2368_v58  ;;  %v4994_v27 = vpack.c.bf16 %v2381_v33, %v2380_v54  ;;  %v5494_v15 = vpop.permute.xlu0 %5493  ;;  %v5499_v17 = vpop.permute.xlu1 %5498  ;;  %4911 = vmatprep.subr.bf16.mxu0 %v4910_v4 }
 0x208   : > { %v5501_v9 = vunpack.i.h.bf16 %v5499_v17  ;;  %v5500_v50 = vunpack.i.l.bf16 %v5499_v17  ;;  %v5496_v63 = vunpack.i.h.bf16 %v5494_v15  ;;  %v5495_v5 = vunpack.i.l.bf16 %v5494_v15 }
 0x209   : > { %4993 = vmatprep.subr.msk.bf16.mxu1 %vm7014_vm15, %v4991_v14 }
 0x20a   : > { %v2371_v20 = vsel %vm2367_vm12, %v5500_v50, %v5501_v9  ;;  %v2383_v53 = vsel %vm2367_vm12, 0.0, %v5500_v50  ;;  %4914 = vmatpush1.bf16.msk.msra.mxu0 %vm6970_vm11, %v4912_v42  ;;  %4996 = vmatpush1.bf16.msk.msra.mxu1 %vm7021_vm0, %v4994_v27  ;;  %v2239_v46 = vsel %vm2238_vm1, %v5495_v5, %v5496_v63  ;;  %v2251_v62 = vsel %vm2238_vm1, 0.0, %v5495_v5  ;;  %v7936_v27 = vld [vmem:[#allocation11_spill] sm:$0xff]  ;;  %v7937_v9 = vld [vmem:[#allocation6_spill] sm:$0xff] }
 0x20b   : > { %v4997_v10 = vpack.c.bf16 %v2371_v20, %v2370_v30  ;;  %v5000_v22 = vpack.c.bf16 %v2383_v53, %v2382_v13  ;;  %v5509_v21 = vpop.permute.xlu0 %5508  ;;  %v5504_v28 = vpop.permute.xlu1 %5503 }
 0x20c   : > { %v5506_v39 = vunpack.i.h.bf16 %v5504_v28  ;;  %v5505_v59 = vunpack.i.l.bf16 %v5504_v28  ;;  %v5511_v43 = vunpack.i.h.bf16 %v5509_v21  ;;  %v5510_v12 = vunpack.i.l.bf16 %v5509_v21  ;;  %v7938_v21 = vld [vmem:[#allocation12_spill] sm:$0xff] }
 0x20d   : > { %4999 = vmatprep.subr.msk.bf16.mxu1 %vm7014_vm15, %v4997_v10 }
 0x20e   : > { %v2240_v16 = vsel %vm2238_vm1, %v5505_v59, %v5506_v39  ;;  %v2252_v1 = vsel %vm2238_vm1, 0.0, %v5505_v59  ;;  %5002 = vmatpush1.bf16.msk.msra.mxu1 %vm7021_vm0, %v5000_v22  ;;  %v2241_v35 = vsel %vm2238_vm1, %v5510_v12, %v5511_v43  ;;  %v2253_v34 = vsel %vm2238_vm1, 0.0, %v5510_v12 }
 0x20f   : > { %v7043_v51 = vpack.c.bf16 %v2240_v16, %v2239_v46  ;;  %v7045_v8 = vpack.c.bf16 %v2252_v1, %v2251_v62  ;;  %v5519_v36 = vpop.permute.xlu0 %5518  ;;  %v5514_v38 = vpop.permute.xlu1 %5513  ;;  %5004 = vmatprep.subr.bf16.mxu1 %v6804_v40 }
 0x210   : > { %v5516_v55 = vunpack.i.h.bf16 %v5514_v38  ;;  %v5515_v11 = vunpack.i.l.bf16 %v5514_v38  ;;  %v5521_v2 = vunpack.i.h.bf16 %v5519_v36  ;;  %v5520_v23 = vunpack.i.l.bf16 %v5519_v36 }
 0x211   : > { %4917 = vmatprep.subr.msk.bf16.mxu0 %vm6955_vm7, %v7043_v51 }
 0x212   : > { %v2242_v24 = vsel %vm2238_vm1, %v5515_v11, %v5516_v55  ;;  %v2254_v3 = vsel %vm2238_vm1, 0.0, %v5515_v11  ;;  %4920 = vmatpush1.bf16.msk.msra.mxu0 %vm6959_vm8, %v7045_v8  ;;  %5006 = vmatpush1.bf16.msra.mxu1 %v6808_v31  ;;  %v2450_v54 = vsel %vm2436_vm2, %v5521_v2, 0.0  ;;  %v2449_v48 = vsel %vm2436_vm2, %v5520_v23, 0.0 }
 0x213   : > { %v7059_v0 = vpack.c.bf16 %v2242_v24, %v2241_v35  ;;  %v7061_v4 = vpack.c.bf16 %v2254_v3, %v2253_v34  ;;  %v5524_v42 = vpop.permute.xlu1 %5523  ;;  %5008 = vmatprep.subr.bf16.mxu1 %v6812_v49  ;;  %v5529_v19 = vpop.permute.xlu0 %5528  ;;  %v7079_v50 = vpack.c.bf16 %v2450_v54, %v2449_v48 }
 0x214   : > { %v5526_v32 = vunpack.i.h.bf16 %v5524_v42  ;;  %v5525_v18 = vunpack.i.l.bf16 %v5524_v42  ;;  %v5531_v33 = vunpack.i.h.bf16 %v5529_v19  ;;  %v5530_v14 = vunpack.i.l.bf16 %v5529_v19 }
 0x215   : > { %4923 = vmatprep.subr.msk.bf16.mxu0 %vm6955_vm7, %v7059_v0 }
 0x216   : > { %4926 = vmatpush1.bf16.msk.msra.mxu0 %vm6959_vm8, %v7061_v4  ;;  %5010 = vmatpush1.bf16.msra.mxu1 %v6816_v45  ;;  %v2438_v63 = vsel %vm2436_vm2, %v5526_v32, %v5521_v2  ;;  %v2437_v5 = vsel %vm2436_vm2, %v5525_v18, %v5520_v23  ;;  %v2452_v20 = vsel %vm2436_vm2, %v5531_v33, 0.0  ;;  %v2451_v53 = vsel %vm2436_vm2, %v5530_v14, 0.0 }
 0x217   : > { %v5534_v58 = vpop.permute.xlu1 %5533  ;;  %4928 = vmatprep.subr.bf16.mxu0 %v6804_v40  ;;  %5012 = vmatprep.subr.bf16.mxu1 %v6820_v26  ;;  %v5539_v15 = vpop.permute.xlu0 %5538  ;;  %v7091_v39 = vpack.c.bf16 %v2438_v63, %v2437_v5  ;;  %v7093_v62 = vpack.c.bf16 %v2452_v20, %v2451_v53 }
 0x218   : > { %v5536_v30 = vunpack.i.h.bf16 %v5534_v58  ;;  %v5535_v13 = vunpack.i.l.bf16 %v5534_v58  ;;  %v5541_v59 = vunpack.i.h.bf16 %v5539_v15  ;;  %v5540_v46 = vunpack.i.l.bf16 %v5539_v15 }
 0x21a   : > { %4930 = vmatpush1.bf16.msra.mxu0 %v6808_v31  ;;  %5014 = vmatpush1.bf16.msra.mxu1 %v7936_v27  ;;  %v2440_v43 = vsel %vm2436_vm2, %v5536_v30, %v5531_v33  ;;  %v2439_v12 = vsel %vm2436_vm2, %v5535_v13, %v5530_v14  ;;  %v2501_v55 = vsel %vm2238_vm1, %v5540_v46, %v5541_v59  ;;  %v2513_v2 = vsel %vm2238_vm1, 0.0, %v5540_v46 }
 0x21b   : > { %v5544_v17 = vpop.permute.xlu1 %5543  ;;  %4932 = vmatprep.subr.bf16.mxu0 %v6812_v49  ;;  %5016 = vmatprep.subr.bf16.mxu1 %v7937_v9  ;;  %v5549_v16 = vpop.permute.xlu0 %5548  ;;  %v7107_v11 = vpack.c.bf16 %v2440_v43, %v2439_v12 }
 0x21c   : > { %v5546_v10 = vunpack.i.h.bf16 %v5544_v17  ;;  %v5545_v22 = vunpack.i.l.bf16 %v5544_v17  ;;  %v5551_v35 = vunpack.i.h.bf16 %v5549_v16  ;;  %v5550_v34 = vunpack.i.l.bf16 %v5549_v16 }
 0x21e   : > { %4934 = vmatpush1.bf16.msra.mxu0 %v6816_v45  ;;  %5018 = vmatpush1.bf16.msra.mxu1 %v7938_v21  ;;  %v2502_v1 = vsel %vm2238_vm1, %v5545_v22, %v5546_v10  ;;  %v2514_v24 = vsel %vm2238_vm1, 0.0, %v5545_v22  ;;  %v2503_v23 = vsel %vm2238_vm1, %v5550_v34, %v5551_v35  ;;  %v2515_v32 = vsel %vm2238_vm1, 0.0, %v5550_v34  ;;  %v7179_v34 = vld [vmem:[%s7830_s3 + $0x20] sm:$0xff] }
 0x21f   : > { %v5554_v28 = vpop.permute.xlu1 %5553  ;;  %4936 = vmatprep.subr.bf16.mxu0 %v6820_v26  ;;  %5021 = vmatprep.subr.msk.bf16.mxu1 %vm7014_vm15, %v7079_v50  ;;  %v7110_v3 = vpack.c.bf16 %v2502_v1, %v2501_v55  ;;  %v7123_v19 = vpack.c.bf16 %v2514_v24, %v2513_v2  ;;  %v5559_v58 = vpop.permute.xlu0 %5558  ;;  %v7162_v1 = vld [vmem:[%s7830_s3] sm:$0xff]  ;;  %v7188_v24 = vld [vmem:[%s7830_s3 + $0x18] sm:$0xff] }
 0x220   : > { %v5556_v36 = vunpack.i.h.bf16 %v5554_v28  ;;  %v5555_v38 = vunpack.i.l.bf16 %v5554_v28  ;;  %v5561_v14 = vunpack.i.h.bf16 %v5559_v58  ;;  %v5560_v15 = vunpack.i.l.bf16 %v5559_v58  ;;  %v7203_v2 = vld [vmem:[%s7830_s3 + $0x38] sm:$0xff]  ;;  %v7221_v58 = vld [vmem:[%s7830_s3 + $0x50] sm:$0xff] }
 0x222   : > { %4938 = vmatpush1.bf16.msra.mxu0 %v7936_v27  ;;  %5024 = vmatpush1.bf16.msk.msra.mxu1 %vm7021_vm0, %v7091_v39  ;;  %v2504_v42 = vsel %vm2238_vm1, %v5555_v38, %v5556_v36  ;;  %v2516_v54 = vsel %vm2238_vm1, 0.0, %v5555_v38  ;;  %v2626_v63 = vsel %vm2436_vm2, %v5561_v14, 0.0  ;;  %v2625_v5 = vsel %vm2436_vm2, %v5560_v15, 0.0 }
 0x223   : > { %4940 = vmatprep.subr.bf16.mxu0 %v7937_v9  ;;  %5027 = vmatprep.subr.msk.bf16.mxu1 %vm7014_vm15, %v7093_v62  ;;  %v7126_v48 = vpack.c.bf16 %v2504_v42, %v2503_v23  ;;  %v7137_v18 = vpack.c.bf16 %v2516_v54, %v2515_v32  ;;  %v5564_v33 = vpop.permute.xlu1 %5563  ;;  %v5569_v17 = vpop.permute.xlu0 %5568  ;;  %v7151_v22 = vpack.c.bf16 %v2626_v63, %v2625_v5  ;;  %v7212_v23 = vld [vmem:[%s7830_s3 + $0x30] sm:$0xff]  ;;  %v7237_v54 = vld [vmem:[%s7830_s3 + $0x68] sm:$0xff]  ;;  %v7246_v32 = vld [vmem:[%s7830_s3 + $0x60] sm:$0xff] }
 0x224   : > { %v5566_v30 = vunpack.i.h.bf16 %v5564_v33  ;;  %v5565_v13 = vunpack.i.l.bf16 %v5564_v33  ;;  %v5571_v20 = vunpack.i.h.bf16 %v5569_v17  ;;  %v5570_v53 = vunpack.i.l.bf16 %v5569_v17  ;;  %v7251_v33 = vld [vmem:[%s7830_s3 + $0x80] sm:$0xff]  ;;  %v7274_v17 = vld [vmem:[%s7830_s3 + $0x90] sm:$0xff]  ;;  %v7288_v5 = vld [vmem:[%s7830_s3 + $0xa8] sm:$0xff] }
 0x225   : > { %v7279_v63 = vld [vmem:[%s7830_s3 + $0xb0] sm:$0xff] }
 0x226   : > { %4942 = vmatpush1.bf16.msra.mxu0 %v7938_v21  ;;  %5030 = vmatpush1.bf16.msk.msra.mxu1 %vm7021_vm0, %v7107_v11  ;;  %v2614_v28 = vsel %vm2436_vm2, %v5566_v30, %v5561_v14  ;;  %v2613_v59 = vsel %vm2436_vm2, %v5565_v13, %v5560_v15  ;;  %v2628_v12 = vsel %vm2436_vm2, %v5571_v20, 0.0  ;;  %v2627_v16 = vsel %vm2436_vm2, %v5570_v53, 0.0  ;;  %v7260_v14 = vld [vmem:[%s7830_s3 + $0x78] sm:$0xff]  ;;  %v7297_v13 = vld [vmem:[%s7830_s3 + $0x10] sm:$0xff] }
 0x227   : > { %4945 = vmatprep.subr.msk.bf16.mxu0 %vm6955_vm7, %v7110_v3  ;;  %5032 = vmatprep.subr.bf16.mxu1 %v6839_v7  ;;  %v5574_v10 = vpop.permute.xlu1 %5573  ;;  %v7168_v36 = vpack.c.bf16 %v2614_v28, %v2613_v59  ;;  %v7170_v38 = vpack.c.bf16 %v2628_v12, %v2627_v16  ;;  %v7265_v15 = vld [vmem:[%s7830_s3 + $0x98] sm:$0xff]  ;;  %v7939_v30 = vmov 0.0  }
 0x228   : > { %v5576_v46 = vunpack.i.h.bf16 %v5574_v10  ;;  %v5575_v43 = vunpack.i.l.bf16 %v5574_v10 }
 0x22a   : > { %4948 = vmatpush1.bf16.msk.msra.mxu0 %vm6959_vm8, %v7123_v19  ;;  %5034 = vmatpush1.bf16.msra.mxu1 %v6843_v61  ;;  %v2616_v55 = vsel %vm2436_vm2, %v5576_v46, %v5571_v20  ;;  %v2615_v35 = vsel %vm2436_vm2, %v5575_v43, %v5570_v53  ;;  %v7310_v20 = vld [vmem:[%s7830_s3 + $0x28] sm:$0xff] }
 0x22b   : > { %4951 = vmatprep.subr.msk.bf16.mxu0 %vm6955_vm7, %v7126_v48  ;;  %5036 = vmatprep.subr.bf16.mxu1 %v6846_v52  ;;  %v7194_v42 = vpack.c.bf16 %v2616_v55, %v2615_v35 }
 0x22e   : > { %4954 = vmatpush1.bf16.msk.msra.mxu0 %vm6959_vm8, %v7137_v18  ;;  %5038 = vmatpush1.bf16.msra.mxu1 %v6849_v60 }
 0x22f   : > { %4956 = vmatprep.subr.bf16.mxu0 %v6839_v7  ;;  %5040 = vmatprep.subr.bf16.mxu1 %v6853_v56 }
 0x232   : > { %4958 = vmatpush1.bf16.msra.mxu0 %v6843_v61  ;;  %5042 = vmatpush1.bf16.msra.mxu1 %v6859_v47 }
 0x233   : > { %4960 = vmatprep.subr.bf16.mxu0 %v6846_v52  ;;  %5044 = vmatprep.subr.bf16.mxu1 %v6861_v37 }
 0x236   : > { %4962 = vmatpush1.bf16.msra.mxu0 %v6849_v60  ;;  %5046 = vmatpush1.bf16.msra.mxu1 %v6863_v25 }
 0x237   : > { %4964 = vmatprep.subr.bf16.mxu0 %v6853_v56  ;;  %5049 = vmatprep.subr.msk.bf16.mxu1 %vm7014_vm15, %v7151_v22 }
 0x239   : > { %3338 = vmatmul.mubr.f32.vlgmr.msra.gmra.mrb[64].mxu0 %v7162_v1  ;;  %3564 = vmatmul.mubr.f32.vlgmr.msra.gmra.mrb[64].mxu1 %v7162_v1 }
 0x23a   : > { %4966 = vmatpush1.bf16.msra.mxu0 %v6859_v47  ;;  %5052 = vmatpush1.bf16.msk.msra.mxu1 %vm7021_vm0, %v7168_v36 }
 0x23b   : > { %4968 = vmatprep.subr.bf16.mxu0 %v6861_v37  ;;  %5055 = vmatprep.subr.msk.bf16.mxu1 %vm7014_vm15, %v7170_v38 }
 0x23c   : > { %3343 = vmatprep.mubr.f32.mxu0 %v7179_v34  ;;  %3569 = vmatprep.mubr.f32.mxu1 %v7179_v34 }
 0x23d   : > { %3344 = vmatmul.mubr.f32.gmra.mrb[66].mxu0 %v7188_v24  ;;  %3570 = vmatmul.mubr.f32.gmra.mrb[66].mxu1 %v7188_v24 }
 0x23e   : > { %4970 = vmatpush1.bf16.msra.mxu0 %v6863_v25  ;;  %5058 = vmatpush1.bf16.msk.msra.mxu1 %vm7021_vm0, %v7194_v42 }
 0x23f   : > { %5061 = vmatprep.subr.msk.bf16.mxu0 %vm6955_vm7, %v7043_v51  ;;  %5148 = vmatprep.subr.bf16.mxu1 %v6804_v40  ;;  %v7232_v51 = vld [vmem:[%s7830_s3 + $0x48] sm:$0xff] }
 0x240   : > { %3349 = vmatprep.mubr.f32.mxu0 %v7203_v2  ;;  %3575 = vmatprep.mubr.f32.mxu1 %v7203_v2 }
 0x241   : > { %3350 = vmatmul.mubr.f32.gmra.mrb[68].mxu0 %v7212_v23  ;;  %3576 = vmatmul.mubr.f32.gmra.mrb[68].mxu1 %v7212_v23 }
 0x242   : > { %3355 = vmatprep.mubr.f32.mxu0 %v7221_v58  ;;  %3581 = vmatprep.mubr.f32.mxu1 %v7221_v58 }
 0x245   : > { %3356 = vmatmul.mubr.f32.gmra.mrb[70].mxu0 %v7232_v51  ;;  %3582 = vmatmul.mubr.f32.gmra.mrb[70].mxu1 %v7232_v51 }
 0x246   : > { %3361 = vmatprep.mubr.f32.mxu0 %v7237_v54  ;;  %3587 = vmatprep.mubr.f32.mxu1 %v7237_v54 }
 0x249   : > { %3362 = vmatmul.mubr.f32.gmra.mrb[72].mxu0 %v7246_v32  ;;  %3588 = vmatmul.mubr.f32.gmra.mrb[72].mxu1 %v7246_v32 }
 0x24a   : > { %3367 = vmatprep.mubr.f32.mxu0 %v7251_v33  ;;  %3593 = vmatprep.mubr.f32.mxu1 %v7251_v33 }
 0x24d   : > { %3368 = vmatmul.mubr.f32.gmra.mrb[74].mxu0 %v7260_v14  ;;  %3594 = vmatmul.mubr.f32.gmra.mrb[74].mxu1 %v7260_v14 }
 0x24e   : > { %3373 = vmatprep.mubr.f32.mxu0 %v7265_v15  ;;  %3599 = vmatprep.mubr.f32.mxu1 %v7265_v15 }
 0x251   : > { %3374 = vmatmul.mubr.f32.gmra.mrb[76].mxu0 %v7274_v17  ;;  %3600 = vmatmul.mubr.f32.gmra.mrb[76].mxu1 %v7274_v17 }
 0x252   : > { %3379 = vmatprep.mubr.f32.mxu0 %v7279_v63  ;;  %3605 = vmatprep.mubr.f32.mxu1 %v7279_v63 }
 0x255   : > { %3380 = vmatmul.mubr.f32.gmra.mrb[78].mxu0 %v7288_v5  ;;  %3606 = vmatmul.mubr.f32.gmra.mrb[78].mxu1 %v7288_v5 }
 0x256   : > { %3450 = vmatprep.mubr.f32.mxu0 %v7939_v30  ;;  %3676 = vmatprep.mubr.f32.mxu1 %v7939_v30 }
 0x259   : > { %4524 = vmatmul.mubr.msk.f32.vlgmr.msra.gmra.mrb[64].mxu0 %vm3248_vm3, %v7297_v13  ;;  %4532 = vmatmul.mubr.msk.f32.vlgmr.msra.gmra.mrb[64].mxu1 %vm3248_vm3, %v7297_v13 }
 0x25a   : > { %5064 = vmatpush1.bf16.msk.msra.mxu0 %vm6959_vm8, %v7045_v8  ;;  %5150 = vmatpush1.bf16.msra.mxu1 %v6808_v31  ;;  %v7329_v8 = vld [vmem:[%s7830_s3 + $0x40] sm:$0xff] }
 0x25b   : > { %5067 = vmatprep.subr.msk.bf16.mxu0 %vm6955_vm7, %v7059_v0  ;;  %5152 = vmatprep.subr.bf16.mxu1 %v6812_v49  ;;  %v7350_v0 = vpop.permute.xlu0 %5578 }
 0x25c   : > { %3456 = vmatprep.mubr.f32.mxu0 %v7939_v30  ;;  %3682 = vmatprep.mubr.f32.mxu1 %v7939_v30 }
 0x25d   : > { %4525 = vmatmul.mubr.msk.f32.gmra.mrb[66].mxu0 %vm3248_vm3, %v7310_v20  ;;  %4533 = vmatmul.mubr.msk.f32.gmra.mrb[66].mxu1 %vm3248_vm3, %v7310_v20 }
 0x25e   : > { %5070 = vmatpush1.bf16.msk.msra.mxu0 %vm6959_vm8, %v7061_v4  ;;  %5154 = vmatpush1.bf16.msra.mxu1 %v6816_v45 }
 0x25f   : > { %5072 = vmatprep.subr.bf16.mxu0 %v6804_v40  ;;  %5156 = vmatprep.subr.bf16.mxu1 %v6820_v26  ;;  %v7344_v40 = vld [vmem:[%s7830_s3 + $0x58] sm:$0xff] }
 0x260   : > { %3462 = vmatprep.mubr.f32.mxu0 %v7939_v30  ;;  %3688 = vmatprep.mubr.f32.mxu1 %v7939_v30 }
 0x261   : > { %4526 = vmatmul.mubr.msk.f32.gmra.mrb[68].mxu0 %vm3248_vm3, %v7329_v8  ;;  %4534 = vmatmul.mubr.msk.f32.gmra.mrb[68].mxu1 %vm3248_vm3, %v7329_v8 }
 0x262   : > { %5074 = vmatpush1.bf16.msra.mxu0 %v6808_v31  ;;  %5158 = vmatpush1.bf16.msra.mxu1 %v7936_v27  ;;  %v7361_v31 = vld [vmem:[%s7830_s3 + $0x70] sm:$0xff] }
 0x263   : > { %5076 = vmatprep.subr.bf16.mxu0 %v6812_v49  ;;  %5160 = vmatprep.subr.bf16.mxu1 %v7937_v9  ;;  %v7367_v49 = vpop.permute.xlu1 %5583 }
 0x264   : > { %3468 = vmatprep.mubr.f32.mxu0 %v7939_v30  ;;  %3694 = vmatprep.mubr.f32.mxu1 %v7939_v30 }
 0x265   : > { %4527 = vmatmul.mubr.msk.f32.gmra.mrb[70].mxu0 %vm3248_vm3, %v7344_v40  ;;  %4535 = vmatmul.mubr.msk.f32.gmra.mrb[70].mxu1 %vm3248_vm3, %v7344_v40 }
 0x266   : > { %5078 = vmatpush1.bf16.msra.mxu0 %v6816_v45  ;;  %5162 = vmatpush1.bf16.msra.mxu1 %v7938_v21  ;;  %v7382_v45 = vld [vmem:[%s7830_s3 + $0x88] sm:$0xff] }
 0x267   : > { %5080 = vmatprep.subr.bf16.mxu0 %v6820_v26  ;;  %5165 = vmatprep.subr.msk.bf16.mxu1 %vm7014_vm15, %v7079_v50  ;;  %v7384_v26 = vpop.permute.xlu0 %5588  ;;  %v7396_v4 = vpop.permute.xlu1 %5593  ;;  %v7426_v50 = vld [vmem:[%s7830_s3 + $0xb8] sm:$0xff] }
 0x268   : > { %3474 = vmatprep.mubr.f32.mxu0 %v7939_v30  ;;  %3700 = vmatprep.mubr.f32.mxu1 %v7939_v30  ;;  %v5596_v53 = vunpack.i.h.bf16 %v7396_v4  ;;  %v5595_v10 = vunpack.i.l.bf16 %v7396_v4 }
 0x269   : > { %4528 = vmatmul.mubr.msk.f32.gmra.mrb[72].mxu0 %vm3248_vm3, %v7361_v31  ;;  %4536 = vmatmul.mubr.msk.f32.gmra.mrb[72].mxu1 %vm3248_vm3, %v7361_v31 }
 0x26a   : > { %5082 = vmatpush1.bf16.msra.mxu0 %v7936_v27  ;;  %5168 = vmatpush1.bf16.msk.msra.mxu1 %vm7021_vm0, %v7091_v39  ;;  %v7405_v27 = vld [vmem:[%s7830_s3 + $0xa0] sm:$0xff] }
 0x26b   : > { %5084 = vmatprep.subr.bf16.mxu0 %v7937_v9  ;;  %5171 = vmatprep.subr.msk.bf16.mxu1 %vm7014_vm15, %v7093_v62  ;;  %v7413_v9 = vpop.permute.xlu0 %5598 }
 0x26c   : > { %3480 = vmatprep.mubr.f32.mxu0 %v7939_v30  ;;  %3706 = vmatprep.mubr.f32.mxu1 %v7939_v30 }
 0x26d   : > { %4529 = vmatmul.mubr.msk.f32.gmra.mrb[74].mxu0 %vm3248_vm3, %v7382_v45  ;;  %4537 = vmatmul.mubr.msk.f32.gmra.mrb[74].mxu1 %vm3248_vm3, %v7382_v45 }
 0x26e   : > { %5086 = vmatpush1.bf16.msra.mxu0 %v7938_v21  ;;  %5174 = vmatpush1.bf16.msk.msra.mxu1 %vm7021_vm0, %v7107_v11  ;;  %v7432_v21 = vpop.permute.xlu1 %5603  ;;  %v5581_v11 = vunpack.i.h.bf16 %v7350_v0 }
 0x26f   : > { %5089 = vmatprep.subr.msk.bf16.mxu0 %vm6955_vm7, %v7110_v3  ;;  %5176 = vmatprep.subr.bf16.mxu1 %v6839_v7  ;;  %v7444_v39 = vpop.permute.xlu0 %5608  ;;  %v5580_v3 = vunpack.i.l.bf16 %v7350_v0  ;;  %v5606_v16 = vunpack.i.h.bf16 %v7432_v21 }
 0x270   : > { %3486 = vmatprep.mubr.f32.mxu0 %v7939_v30  ;;  %3712 = vmatprep.mubr.f32.mxu1 %v7939_v30 }
 0x271   : > { %4530 = vmatmul.mubr.msk.f32.gmra.mrb[76].mxu0 %vm3248_vm3, %v7405_v27  ;;  %4538 = vmatmul.mubr.msk.f32.gmra.mrb[76].mxu1 %vm3248_vm3, %v7405_v27 }
 0x272   : > { %5092 = vmatpush1.bf16.msk.msra.mxu0 %vm6959_vm8, %v7123_v19  ;;  %5178 = vmatpush1.bf16.msra.mxu1 %v6843_v61  ;;  %v5614_v62 = vpop.permute.xlu1 %5613  ;;  %v5586_v19 = vunpack.i.h.bf16 %v7367_v49 }
 0x273   : > { %5095 = vmatprep.subr.msk.bf16.mxu0 %vm6955_vm7, %v7126_v48  ;;  %5180 = vmatprep.subr.bf16.mxu1 %v6846_v52  ;;  %v5585_v48 = vunpack.i.l.bf16 %v7367_v49  ;;  %v5616_v0 = vunpack.i.h.bf16 %v5614_v62  ;;  %v5615_v49 = vunpack.i.l.bf16 %v5614_v62 }
 0x274   : > { %3492 = vmatprep.mubr.f32.mxu0 %v7939_v30  ;;  %3718 = vmatprep.mubr.f32.mxu1 %v7939_v30  ;;  %v2679_v59 = vsel %vm2677_vm4, %v5586_v19, %v5581_v11 }
 0x275   : > { %4531 = vmatmul.mubr.msk.f32.gmra.mrb[78].mxu0 %vm3248_vm3, %v7426_v50  ;;  %4539 = vmatmul.mubr.msk.f32.gmra.mrb[78].mxu1 %vm3248_vm3, %v7426_v50  ;;  %v2678_v46 = vsel %vm2677_vm4, %v5585_v48, %v5580_v3 }
 0x276   : > { %5098 = vmatpush1.bf16.msk.msra.mxu0 %vm6959_vm8, %v7137_v18  ;;  %5182 = vmatpush1.bf16.msra.mxu1 %v6849_v60  ;;  %v5624_v18 = vpop.permute.xlu1 %5623  ;;  %v5118_v4 = vpack.c.bf16 %v2679_v59, %v2678_v46 }
 0x277   : > { %5100 = vmatprep.subr.bf16.mxu0 %v6839_v7  ;;  %5184 = vmatprep.subr.bf16.mxu1 %v6853_v56  ;;  %v7456_v7 = vpop.permute.xlu0 %5618  ;;  %v5625_v19 = vunpack.i.l.bf16 %v5624_v18 }
 0x278   : > { %3789 = vmatprep.mubr.f32.mxu0 %v6892_v57  ;;  %4015 = vmatprep.mubr.f32.mxu1 %v6892_v57  ;;  %v2691_v57 = vsel %vm2677_vm4, %v5581_v11, 0.0 }
 0x27a   : > { %5102 = vmatpush1.bf16.msra.mxu0 %v6843_v61  ;;  %5186 = vmatpush1.bf16.msra.mxu1 %v6859_v47  ;;  %v2690_v61 = vsel %vm2677_vm4, %v5580_v3, 0.0 }
 0x27b   : > { %5104 = vmatprep.subr.bf16.mxu0 %v6846_v52  ;;  %5188 = vmatprep.subr.bf16.mxu1 %v6861_v37  ;;  %v5601_v52 = vunpack.i.h.bf16 %v7413_v9  ;;  %v5115_v28 = vpack.c.bf16 %v2691_v57, %v2690_v61  ;;  %v7480_v43 = vpop.permute.xlu0 %5628  ;;  %v2730_v57 = vsel %vm2726_vm5, %v5615_v49, %v5616_v0  ;;  %v5626_v61 = vunpack.i.h.bf16 %v5624_v18 }
 0x27d   : > { %v2792_v59 = vsel %vm2726_vm5, %v5625_v19, %v5626_v61 }
 0x27e   : > { %5106 = vmatpush1.bf16.msra.mxu0 %v6849_v60  ;;  %5190 = vmatpush1.bf16.msra.mxu1 %v6863_v25  ;;  %v5600_v60 = vunpack.i.l.bf16 %v7413_v9  ;;  %v5611_v9 = vunpack.i.h.bf16 %v7444_v39 }
 0x27f   : > { %5108 = vmatprep.subr.bf16.mxu0 %v6853_v56  ;;  %5193 = vmatprep.subr.msk.bf16.mxu1 %vm7014_vm15, %v7151_v22  ;;  %v5591_v56 = vunpack.i.h.bf16 %v7384_v26  ;;  %v5590_v22 = vunpack.i.l.bf16 %v7384_v26  ;;  %v5639_v48 = vpop.permute.xlu0 %5638 }
 0x280   : > { %v2692_v12 = vsel %vm2677_vm4, %v5600_v60, 0.0  ;;  %v5641_v18 = vunpack.i.h.bf16 %v5639_v48 }
 0x281   : > { %v5127_v35 = vpack.c.bf16 %v5596_v53, %v5591_v56  ;;  %v2727_v26 = vsel %vm2726_vm5, %v5590_v22, %v5591_v56 }
 0x282   : > { %5110 = vmatpush1.bf16.msra.mxu0 %v6859_v47  ;;  %5196 = vmatpush1.bf16.msk.msra.mxu1 %vm7021_vm0, %v7168_v36  ;;  %v2693_v47 = vsel %vm2677_vm4, %v5601_v52, 0.0  ;;  %v5605_v36 = vunpack.i.l.bf16 %v7432_v21  ;;  %v5610_v21 = vunpack.i.l.bf16 %v7444_v39 }
 0x283   : > { %5112 = vmatprep.subr.bf16.mxu0 %v6861_v37  ;;  %5199 = vmatprep.subr.msk.bf16.mxu1 %vm7014_vm15, %v7170_v38  ;;  %v2728_v37 = vsel %vm2726_vm5, %v5595_v10, %v5596_v53  ;;  %v5634_v38 = vpop.permute.xlu1 %5633  ;;  %v5121_v62 = vpack.c.bf16 %v2693_v47, %v2692_v12  ;;  %v5621_v53 = vunpack.i.h.bf16 %v7456_v7  ;;  %v5620_v10 = vunpack.i.l.bf16 %v7456_v7 }
 0x284   : > { %v5130_v11 = vpack.c.bf16 %v2728_v37, %v2727_v26  ;;  %v2680_v3 = vsel %vm2677_vm4, %v5605_v36, %v5600_v60  ;;  %v2729_v39 = vsel %vm2726_vm5, %v5610_v21, %v5611_v9  ;;  %v5636_v46 = vunpack.i.h.bf16 %v5634_v38 }
 0x285   : > { %v5135_v60 = vpack.c.bf16 %v2730_v57, %v2729_v39  ;;  %v5137_v22 = vpack.c.bf16 %v5626_v61, %v5621_v53  ;;  %v5635_v47 = vunpack.i.l.bf16 %v5634_v38  ;;  %v2791_v6 = vsel %vm2726_vm5, %v5620_v10, %v5621_v53 }
 0x286   : > { %5114 = vmatpush1.bf16.msra.mxu0 %v6863_v25  ;;  %5202 = vmatpush1.bf16.msk.msra.mxu1 %vm7021_vm0, %v7194_v42  ;;  %v2681_v25 = vsel %vm2677_vm4, %v5606_v16, %v5601_v52  ;;  %v5132_v42 = vpack.c.bf16 %v5616_v0, %v5611_v9  ;;  %v5631_v7 = vunpack.i.h.bf16 %v7480_v43  ;;  %v5630_v12 = vunpack.i.l.bf16 %v7480_v43  ;;  %v5649_v16 = vpop.permute.xlu0 %5648 }
 0x287   : > { %5117 = vmatprep.subr.msk.bf16.mxu0 %vm6955_vm7, %v5115_v28  ;;  %5205 = vmatprep.subr.msk.bf16.mxu1 %vm7492_vm6, %v5127_v35  ;;  %v5124_v52 = vpack.c.bf16 %v2681_v25, %v2680_v3  ;;  %v5640_v28 = vunpack.i.l.bf16 %v5639_v48  ;;  %v5644_v56 = vpop.permute.xlu1 %5643  ;;  %v5140_v36 = vpack.c.bf16 %v2792_v59, %v2791_v6  ;;  %v2869_v37 = vsel %vm2855_vm9, %v5641_v18, 0.0 }
 0x288   : > { %v5142_v0 = vpack.c.bf16 %v5636_v46, %v5631_v7  ;;  %v2794_v49 = vsel %vm2726_vm5, %v5635_v47, %v5636_v46  ;;  %v5646_v38 = vunpack.i.h.bf16 %v5644_v56  ;;  %v5645_v26 = vunpack.i.l.bf16 %v5644_v56 }
 0x289   : > { %v2868_v29 = vsel %vm2855_vm9, %v5640_v28, 0.0  ;;  %v5650_v9 = vunpack.i.l.bf16 %v5649_v16 }
 0x28a   : > { %5120 = vmatpush1.bf16.msk.msra.mxu0 %vm6959_vm8, %v5118_v4  ;;  %5207 = vmatpush1.bf16.msra.mxu1 %v5130_v11  ;;  %v5651_v4 = vunpack.i.h.bf16 %v5649_v16  ;;  %v5223_v21 = vpack.c.bf16 %v2869_v37, %v2868_v29  ;;  %v2857_v25 = vsel %vm2855_vm9, %v5646_v38, %v5641_v18  ;;  %v2856_v3 = vsel %vm2855_vm9, %v5645_v26, %v5640_v28  ;;  %v7634_v44 = vpop.permute.xlu0 %3210 }
 0x28b   : > { %5123 = vmatprep.subr.msk.bf16.mxu0 %vm6955_vm7, %v5121_v62  ;;  %5210 = vmatprep.subr.msk.bf16.mxu1 %vm7492_vm6, %v5132_v42  ;;  %v5654_v43 = vpop.permute.xlu1 %5653 }
 0x28c   : > { %v5656_v57 = vunpack.i.h.bf16 %v5654_v43  ;;  %v5655_v61 = vunpack.i.l.bf16 %v5654_v43  ;;  %v2871_v19 = vsel %vm2855_vm9, %v5651_v4, 0.0 }
 0x28e   : > { %5126 = vmatpush1.bf16.msk.msra.mxu0 %vm6959_vm8, %v5124_v52  ;;  %5212 = vmatpush1.bf16.msra.mxu1 %v5135_v60  ;;  %v2859_v39 = vsel %vm2855_vm9, %v5656_v57, %v5651_v4  ;;  %v2858_v53 = vsel %vm2855_vm9, %v5655_v61, %v5650_v9 }
 0x28f   : > { %5129 = vmatprep.subr.msk.bf16.mxu0 %vm7492_vm6, %v5127_v35  ;;  %5215 = vmatprep.subr.msk.bf16.mxu1 %vm7492_vm6, %v5137_v22  ;;  %v2793_v35 = vsel %vm2726_vm5, %v5630_v12, %v5631_v7  ;;  %v5232_v10 = vpack.c.bf16 %v2859_v39, %v2858_v53 }
 0x290   : > { %v5145_v62 = vpack.c.bf16 %v2794_v49, %v2793_v35 }
 0x292   : > { %5131 = vmatpush1.bf16.msra.mxu0 %v5130_v11  ;;  %5217 = vmatpush1.bf16.msra.mxu1 %v5140_v36  ;;  %v2870_v11 = vsel %vm2855_vm9, %v5650_v9, 0.0 }
 0x293   : > { %5134 = vmatprep.subr.msk.bf16.mxu0 %vm7492_vm6, %v5132_v42  ;;  %5220 = vmatprep.subr.msk.bf16.mxu1 %vm7492_vm6, %v5142_v0  ;;  %v5226_v42 = vpack.c.bf16 %v2857_v25, %v2856_v3  ;;  %v5229_v48 = vpack.c.bf16 %v2871_v19, %v2870_v11 }
 0x296   : > { %5136 = vmatpush1.bf16.msra.mxu0 %v5135_v60  ;;  %5222 = vmatpush1.bf16.msra.mxu1 %v5145_v62 }
 0x297   : > { %5139 = vmatprep.subr.msk.bf16.mxu0 %vm7492_vm6, %v5137_v22  ;;  %5225 = vmatprep.subr.msk.bf16.mxu1 %vm7014_vm15, %v5223_v21 }
 0x299   : > { %3790 = vmatmul.mubr.f32.vlgmr.msra.gmra.mrb[80].mxu0 %v7162_v1  ;;  %4016 = vmatmul.mubr.f32.vlgmr.msra.gmra.mrb[80].mxu1 %v7162_v1 }
 0x29a   : > { %5141 = vmatpush1.bf16.msra.mxu0 %v5140_v36  ;;  %5228 = vmatpush1.bf16.msk.msra.mxu1 %vm7021_vm0, %v5226_v42 }
 0x29b   : > { %5144 = vmatprep.subr.msk.bf16.mxu0 %vm7492_vm6, %v5142_v0  ;;  %5231 = vmatprep.subr.msk.bf16.mxu1 %vm7014_vm15, %v5229_v48 }
 0x29c   : > { %3795 = vmatprep.mubr.f32.mxu0 %v7179_v34  ;;  %4021 = vmatprep.mubr.f32.mxu1 %v7179_v34 }
 0x29d   : > { %3796 = vmatmul.mubr.f32.gmra.mrb[82].mxu0 %v7188_v24  ;;  %4022 = vmatmul.mubr.f32.gmra.mrb[82].mxu1 %v7188_v24 }
 0x29e   : > { %5146 = vmatpush1.bf16.msra.mxu0 %v5145_v62  ;;  %5234 = vmatpush1.bf16.msk.msra.mxu1 %vm7021_vm0, %v5232_v10 }
 0x29f   : > { %3801 = vmatprep.mubr.f32.mxu0 %v7203_v2  ;;  %4027 = vmatprep.mubr.f32.mxu1 %v7203_v2 }
 0x2a1   : > { %3802 = vmatmul.mubr.f32.gmra.mrb[84].mxu0 %v7212_v23  ;;  %4028 = vmatmul.mubr.f32.gmra.mrb[84].mxu1 %v7212_v23 }
 0x2a2   : > { %3807 = vmatprep.mubr.f32.mxu0 %v7221_v58  ;;  %4033 = vmatprep.mubr.f32.mxu1 %v7221_v58 }
 0x2a5   : > { %3808 = vmatmul.mubr.f32.gmra.mrb[86].mxu0 %v7232_v51  ;;  %4034 = vmatmul.mubr.f32.gmra.mrb[86].mxu1 %v7232_v51 }
 0x2a6   : > { %3813 = vmatprep.mubr.f32.mxu0 %v7237_v54  ;;  %4039 = vmatprep.mubr.f32.mxu1 %v7237_v54  ;;  %v7640_v54 = vpop.permute.xlu1 %3215 }
 0x2a9   : > { %3814 = vmatmul.mubr.f32.gmra.mrb[88].mxu0 %v7246_v32  ;;  %4040 = vmatmul.mubr.f32.gmra.mrb[88].mxu1 %v7246_v32 }
 0x2aa   : > { %3819 = vmatprep.mubr.f32.mxu0 %v7251_v33  ;;  %4045 = vmatprep.mubr.f32.mxu1 %v7251_v33  ;;  %v7660_v16 = vpop.permute.xlu1 %3225 }
 0x2ad   : > { %3820 = vmatmul.mubr.f32.gmra.mrb[90].mxu0 %v7260_v14  ;;  %4046 = vmatmul.mubr.f32.gmra.mrb[90].mxu1 %v7260_v14 }
 0x2ae   : > { %3825 = vmatprep.mubr.f32.mxu0 %v7265_v15  ;;  %4051 = vmatprep.mubr.f32.mxu1 %v7265_v15 }
 0x2b1   : > { %3826 = vmatmul.mubr.f32.gmra.mrb[92].mxu0 %v7274_v17  ;;  %4052 = vmatmul.mubr.f32.gmra.mrb[92].mxu1 %v7274_v17 }
 0x2b2   : > { %3831 = vmatprep.mubr.f32.mxu0 %v7279_v63  ;;  %4057 = vmatprep.mubr.f32.mxu1 %v7279_v63 }
 0x2b5   : > { %3832 = vmatmul.mubr.f32.gmra.mrb[94].mxu0 %v7288_v5  ;;  %4058 = vmatmul.mubr.f32.gmra.mrb[94].mxu1 %v7288_v5 }
 0x2b6   : > { %3902 = vmatprep.mubr.f32.mxu0 %v7939_v30  ;;  %4128 = vmatprep.mubr.f32.mxu1 %v7939_v30 }
 0x2b9   : > { %4540 = vmatmul.mubr.msk.f32.vlgmr.msra.gmra.mrb[80].mxu0 %vm3248_vm3, %v7297_v13  ;;  %4548 = vmatmul.mubr.msk.f32.vlgmr.msra.gmra.mrb[80].mxu1 %vm3248_vm3, %v7297_v13 }
 0x2ba   : > { %3908 = vmatprep.mubr.f32.mxu0 %v7939_v30  ;;  %4134 = vmatprep.mubr.f32.mxu1 %v7939_v30 }
 0x2bd   : > { %4541 = vmatmul.mubr.msk.f32.gmra.mrb[82].mxu0 %vm3248_vm3, %v7310_v20  ;;  %4549 = vmatmul.mubr.msk.f32.gmra.mrb[82].mxu1 %vm3248_vm3, %v7310_v20 }
 0x2be   : > { %3914 = vmatprep.mubr.f32.mxu0 %v7939_v30  ;;  %4140 = vmatprep.mubr.f32.mxu1 %v7939_v30 }
 0x2c1   : > { %4542 = vmatmul.mubr.msk.f32.gmra.mrb[84].mxu0 %vm3248_vm3, %v7329_v8  ;;  %4550 = vmatmul.mubr.msk.f32.gmra.mrb[84].mxu1 %vm3248_vm3, %v7329_v8 }
 0x2c2   : > { %3920 = vmatprep.mubr.f32.mxu0 %v7939_v30  ;;  %4146 = vmatprep.mubr.f32.mxu1 %v7939_v30 }
 0x2c5   : > { %4543 = vmatmul.mubr.msk.f32.gmra.mrb[86].mxu0 %vm3248_vm3, %v7344_v40  ;;  %4551 = vmatmul.mubr.msk.f32.gmra.mrb[86].mxu1 %vm3248_vm3, %v7344_v40 }
 0x2c6   : > { %3926 = vmatprep.mubr.f32.mxu0 %v7939_v30  ;;  %4152 = vmatprep.mubr.f32.mxu1 %v7939_v30 }
 0x2c9   : > { %4544 = vmatmul.mubr.msk.f32.gmra.mrb[88].mxu0 %vm3248_vm3, %v7361_v31  ;;  %4552 = vmatmul.mubr.msk.f32.gmra.mrb[88].mxu1 %vm3248_vm3, %v7361_v31 }
 0x2ca   : > { %3932 = vmatprep.mubr.f32.mxu0 %v7939_v30  ;;  %4158 = vmatprep.mubr.f32.mxu1 %v7939_v30 }
 0x2cd   : > { %4545 = vmatmul.mubr.msk.f32.gmra.mrb[90].mxu0 %vm3248_vm3, %v7382_v45  ;;  %4553 = vmatmul.mubr.msk.f32.gmra.mrb[90].mxu1 %vm3248_vm3, %v7382_v45 }
 0x2ce   : > { %3938 = vmatprep.mubr.f32.mxu0 %v7939_v30  ;;  %4164 = vmatprep.mubr.f32.mxu1 %v7939_v30 }
 0x2d1   : > { %4546 = vmatmul.mubr.msk.f32.gmra.mrb[92].mxu0 %vm3248_vm3, %v7405_v27  ;;  %4554 = vmatmul.mubr.msk.f32.gmra.mrb[92].mxu1 %vm3248_vm3, %v7405_v27  ;;  %v7650_v27 = vpop.permute.xlu0 %3220 }
 0x2d2   : > { %3944 = vmatprep.mubr.f32.mxu0 %v7939_v30  ;;  %4170 = vmatprep.mubr.f32.mxu1 %v7939_v30 }
 0x2d5   : > { %4547 = vmatmul.mubr.msk.f32.gmra.mrb[94].mxu0 %vm3248_vm3, %v7426_v50  ;;  %4555 = vmatmul.mubr.msk.f32.gmra.mrb[94].mxu1 %vm3248_vm3, %v7426_v50  ;;  %v7670_v3 = vpop.permute.xlu0 %3230 }
 0x32c   : > { %v3452_v41 = vpop.f32.mrb[64].mxu0  ;;  %v3678_v1 = vpop.f32.mrb[64].mxu1 }
 0x32d   : > { %v5235_v34 = vadd.f32 %v3452_v41, %v7634_v44  ;;  %v5251_v24 = vadd.f32 %v3678_v1, %v7634_v44  ;;  %v3454_v2 = vpop.f32.mrb[65].mxu0  ;;  %v3680_v23 = vpop.f32.mrb[65].mxu1 }
 0x32e   : > { %v5236_v58 = vadd.f32 %v3454_v2, %v7634_v44  ;;  %v5252_v51 = vadd.f32 %v3680_v23, %v7634_v44  ;;  %v7680_v23 = vpop.permute.xlu1 %3235 }
 0x32f   : > { %v4177_v32 = vmax.f32 %v5235_v34, 0.0  ;;  %v4179_v33 = vmax.f32 %v5251_v24, 0.0 }
 0x330   : > { %v4178_v14 = vmax.f32 %v5236_v58, 0.0  ;;  %v4180_v15 = vmax.f32 %v5252_v51, 0.0  ;;  %v3458_v17 = vpop.f32.mrb[66].mxu0  ;;  %v3684_v63 = vpop.f32.mrb[66].mxu1 }
 0x331   : > { %v7642_v5 = vmax.f32 %v4177_v32, %v4179_v33  ;;  %v5237_v30 = vadd.f32 %v3458_v17, %v7640_v54  ;;  %v5253_v13 = vadd.f32 %v3684_v63, %v7640_v54  ;;  %v3460_v20 = vpop.f32.mrb[67].mxu0  ;;  %v3686_v8 = vpop.f32.mrb[67].mxu1 }
 0x332   : > { %v7646_v40 = vmax.f32 %v4178_v14, %v4180_v15  ;;  %v5238_v31 = vadd.f32 %v3460_v20, %v7640_v54  ;;  %v5254_v45 = vadd.f32 %v3686_v8, %v7640_v54 }
 0x333   : > { %v4185_v50 = vmax.f32 %v5237_v30, 0.0  ;;  %v4187_v55 = vmax.f32 %v5253_v13, 0.0 }
 0x334   : > { %v4186_v52 = vmax.f32 %v5238_v31, 0.0  ;;  %v4188_v60 = vmax.f32 %v5254_v45, 0.0  ;;  %v3464_v18 = vpop.f32.mrb[68].mxu0  ;;  %v3690_v28 = vpop.f32.mrb[68].mxu1 }
 0x335   : > { %v7652_v56 = vmax.f32 %v4185_v50, %v4187_v55  ;;  %v5239_v22 = vadd.f32 %v3464_v18, %v7650_v27  ;;  %v5255_v59 = vadd.f32 %v3690_v28, %v7650_v27  ;;  %v3466_v46 = vpop.f32.mrb[69].mxu0  ;;  %v3692_v47 = vpop.f32.mrb[69].mxu1 }
 0x336   : > { %v7656_v6 = vmax.f32 %v4186_v52, %v4188_v60  ;;  %v5240_v7 = vadd.f32 %v3466_v46, %v7650_v27  ;;  %v5256_v12 = vadd.f32 %v3692_v47, %v7650_v27  ;;  %v7690_v50 = vpop.permute.xlu0 %3240 }
 0x337   : > { %v4193_v36 = vmax.f32 %v5239_v22, 0.0  ;;  %v4195_v37 = vmax.f32 %v5255_v59, 0.0 }
 0x338   : > { %v4194_v29 = vmax.f32 %v5240_v7, 0.0  ;;  %v4196_v0 = vmax.f32 %v5256_v12, 0.0  ;;  %v3470_v49 = vpop.f32.mrb[70].mxu0  ;;  %v3696_v38 = vpop.f32.mrb[70].mxu1 }
 0x339   : > { %v7662_v26 = vmax.f32 %v4193_v36, %v4195_v37  ;;  %v5241_v4 = vadd.f32 %v3470_v49, %v7660_v16  ;;  %v5257_v9 = vadd.f32 %v3696_v38, %v7660_v16  ;;  %v3472_v43 = vpop.f32.mrb[71].mxu0  ;;  %v3698_v35 = vpop.f32.mrb[71].mxu1 }
 0x33a   : > { %v7666_v21 = vmax.f32 %v4194_v29, %v4196_v0  ;;  %v5242_v62 = vadd.f32 %v3472_v43, %v7660_v16  ;;  %v5258_v25 = vadd.f32 %v3698_v35, %v7660_v16  ;;  %v7700_v0 = vpop.permute.xlu1 %3245 }
 0x33b   : > { %v4201_v57 = vmax.f32 %v5241_v4, 0.0  ;;  %v4203_v61 = vmax.f32 %v5257_v9, 0.0 }
 0x33c   : > { %v4202_v19 = vmax.f32 %v5242_v62, 0.0  ;;  %v4204_v11 = vmax.f32 %v5258_v25, 0.0  ;;  %v3476_v42 = vpop.f32.mrb[72].mxu0  ;;  %v3702_v48 = vpop.f32.mrb[72].mxu1 }
 0x33d   : > { %v7672_v39 = vmax.f32 %v4201_v57, %v4203_v61  ;;  %v5243_v53 = vadd.f32 %v3476_v42, %v7670_v3  ;;  %v5259_v10 = vadd.f32 %v3702_v48, %v7670_v3  ;;  %v3478_v41 = vpop.f32.mrb[73].mxu0  ;;  %v3704_v1 = vpop.f32.mrb[73].mxu1 }
 0x33e   : > { %v7676_v34 = vmax.f32 %v4202_v19, %v4204_v11  ;;  %v5244_v24 = vadd.f32 %v3478_v41, %v7670_v3  ;;  %v5260_v2 = vadd.f32 %v3704_v1, %v7670_v3 }
 0x33f   : > { %v4209_v58 = vmax.f32 %v5243_v53, 0.0  ;;  %v4211_v51 = vmax.f32 %v5259_v10, 0.0 }
 0x340   : > { %v4210_v32 = vmax.f32 %v5244_v24, 0.0  ;;  %v4212_v33 = vmax.f32 %v5260_v2, 0.0  ;;  %v3482_v14 = vpop.f32.mrb[74].mxu0  ;;  %v3708_v15 = vpop.f32.mrb[74].mxu1 }
 0x341   : > { %v7682_v17 = vmax.f32 %v4209_v58, %v4211_v51  ;;  %v5245_v63 = vadd.f32 %v3482_v14, %v7680_v23  ;;  %v5261_v30 = vadd.f32 %v3708_v15, %v7680_v23  ;;  %v3484_v13 = vpop.f32.mrb[75].mxu0  ;;  %v3710_v20 = vpop.f32.mrb[75].mxu1 }
 0x342   : > { %v7686_v8 = vmax.f32 %v4210_v32, %v4212_v33  ;;  %v5246_v31 = vadd.f32 %v3484_v13, %v7680_v23  ;;  %v5262_v45 = vadd.f32 %v3710_v20, %v7680_v23 }
 0x343   : > { %v4217_v55 = vmax.f32 %v5245_v63, 0.0  ;;  %v4219_v52 = vmax.f32 %v5261_v30, 0.0 }
 0x344   : > { %v4218_v60 = vmax.f32 %v5246_v31, 0.0  ;;  %v4220_v18 = vmax.f32 %v5262_v45, 0.0  ;;  %v3488_v28 = vpop.f32.mrb[76].mxu0  ;;  %v3714_v22 = vpop.f32.mrb[76].mxu1 }
 0x345   : > { %v7692_v59 = vmax.f32 %v4217_v55, %v4219_v52  ;;  %v5247_v46 = vadd.f32 %v3488_v28, %v7690_v50  ;;  %v5263_v47 = vadd.f32 %v3714_v22, %v7690_v50  ;;  %v3490_v7 = vpop.f32.mrb[77].mxu0  ;;  %v3716_v12 = vpop.f32.mrb[77].mxu1 }
 0x346   : > { %v7696_v36 = vmax.f32 %v4218_v60, %v4220_v18  ;;  %v5248_v37 = vadd.f32 %v3490_v7, %v7690_v50  ;;  %v5264_v29 = vadd.f32 %v3716_v12, %v7690_v50 }
 0x347   : > { %v4225_v49 = vmax.f32 %v5247_v46, 0.0  ;;  %v4227_v38 = vmax.f32 %v5263_v47, 0.0 }
 0x348   : > { %v4226_v4 = vmax.f32 %v5248_v37, 0.0  ;;  %v4228_v9 = vmax.f32 %v5264_v29, 0.0  ;;  %v3494_v43 = vpop.f32.mrb[78].mxu0  ;;  %v3720_v35 = vpop.f32.mrb[78].mxu1 }
 0x349   : > { %v7702_v62 = vmax.f32 %v4225_v49, %v4227_v38  ;;  %v5249_v25 = vadd.f32 %v3494_v43, %v7700_v0  ;;  %v5265_v57 = vadd.f32 %v3720_v35, %v7700_v0  ;;  %v3496_v61 = vpop.f32.mrb[79].mxu0  ;;  %v3722_v19 = vpop.f32.mrb[79].mxu1 }
 0x34a   : > { %v7706_v11 = vmax.f32 %v4226_v4, %v4228_v9  ;;  %v5250_v42 = vadd.f32 %v3496_v61, %v7700_v0  ;;  %v5266_v48 = vadd.f32 %v3722_v19, %v7700_v0 }
 0x34b   : > { %v4233_v53 = vmax.f32 %v5249_v25, 0.0  ;;  %v4235_v10 = vmax.f32 %v5265_v57, 0.0 }
 0x34c   : > { %v4234_v41 = vmax.f32 %v5250_v42, 0.0  ;;  %v4236_v1 = vmax.f32 %v5266_v48, 0.0 }
 0x34d   : > { %v7710_v24 = vmax.f32 %v4233_v53, %v4235_v10 }
 0x34e   : > { %v7712_v2 = vmax.f32 %v4234_v41, %v4236_v1 }
 0x38c   : > { %v3904_v58 = vpop.f32.mrb[80].mxu0  ;;  %v4130_v51 = vpop.f32.mrb[80].mxu1 }
 0x38d   : > { %v5267_v32 = vadd.f32 %v3904_v58, %v7634_v44  ;;  %v5283_v33 = vadd.f32 %v4130_v51, %v7634_v44  ;;  %v3906_v14 = vpop.f32.mrb[81].mxu0  ;;  %v4132_v15 = vpop.f32.mrb[81].mxu1 }
 0x38e   : > { %v5268_v63 = vadd.f32 %v3906_v14, %v7634_v44  ;;  %v5284_v30 = vadd.f32 %v4132_v15, %v7634_v44 }
 0x38f   : > { %v4181_v13 = vmax.f32 %v5267_v32, 0.0  ;;  %v4183_v20 = vmax.f32 %v5283_v33, 0.0 }
 0x390   : > { %v4182_v31 = vmax.f32 %v5268_v63, 0.0  ;;  %v4184_v45 = vmax.f32 %v5284_v30, 0.0  ;;  %v3910_v55 = vpop.f32.mrb[82].mxu0  ;;  %v4136_v52 = vpop.f32.mrb[82].mxu1 }
 0x391   : > { %v4257_v60 = vmax.f32 %v4181_v13, %v4183_v20  ;;  %v5269_v18 = vadd.f32 %v3910_v55, %v7640_v54  ;;  %v5285_v28 = vadd.f32 %v4136_v52, %v7640_v54  ;;  %v3912_v22 = vpop.f32.mrb[83].mxu0  ;;  %v4138_v46 = vpop.f32.mrb[83].mxu1 }
 0x392   : > { %v4258_v47 = vmax.f32 %v4182_v31, %v4184_v45  ;;  %v5270_v7 = vadd.f32 %v3912_v22, %v7640_v54  ;;  %v5286_v44 = vadd.f32 %v4138_v46, %v7640_v54 }
 0x393   : > { %v4273_v12 = vmax.f32 %v7642_v5, %v4257_v60  ;;  %v4189_v37 = vmax.f32 %v5269_v18, 0.0  ;;  %v4191_v29 = vmax.f32 %v5285_v28, 0.0 }
 0x394   : > { %v4274_v49 = vmax.f32 %v7646_v40, %v4258_v47  ;;  %v4190_v38 = vmax.f32 %v5270_v7, 0.0  ;;  %v4192_v4 = vmax.f32 %v5286_v44, 0.0  ;;  %v3916_v9 = vpop.f32.mrb[84].mxu0  ;;  %v4142_v43 = vpop.f32.mrb[84].mxu1 }
 0x395   : > { %v4259_v35 = vmax.f32 %v4189_v37, %v4191_v29  ;;  %v5271_v25 = vadd.f32 %v3916_v9, %v7650_v27  ;;  %v5287_v57 = vadd.f32 %v4142_v43, %v7650_v27  ;;  %v3918_v61 = vpop.f32.mrb[85].mxu0  ;;  %v4144_v19 = vpop.f32.mrb[85].mxu1 }
 0x396   : > { %v4570_v42 = vpack.c.bf16 %v4274_v49, %v4273_v12  ;;  %v4260_v48 = vmax.f32 %v4190_v38, %v4192_v4  ;;  %v5272_v54 = vadd.f32 %v3918_v61, %v7650_v27  ;;  %v5288_v5 = vadd.f32 %v4144_v19, %v7650_v27 }
 0x397   : > { %v4275_v53 = vmax.f32 %v7652_v56, %v4259_v35  ;;  %v4197_v40 = vmax.f32 %v5271_v25, 0.0  ;;  %v4199_v10 = vmax.f32 %v5287_v57, 0.0 }
 0x398   : > { %4337 = vst [vmem:[%s7732_s26] sm:$0xff] %v4570_v42  ;;  %v4276_v41 = vmax.f32 %v7656_v6, %v4260_v48  ;;  %v4198_v1 = vmax.f32 %v5272_v54, 0.0  ;;  %v4200_v58 = vmax.f32 %v5288_v5, 0.0  ;;  %v3922_v51 = vpop.f32.mrb[86].mxu0  ;;  %v4148_v32 = vpop.f32.mrb[86].mxu1 }
 0x399   : > { %v4261_v33 = vmax.f32 %v4197_v40, %v4199_v10  ;;  %v5273_v14 = vadd.f32 %v3922_v51, %v7660_v16  ;;  %v5289_v27 = vadd.f32 %v4148_v32, %v7660_v16  ;;  %v3924_v15 = vpop.f32.mrb[87].mxu0  ;;  %v4150_v56 = vpop.f32.mrb[87].mxu1 }
 0x39a   : > { %v4571_v63 = vpack.c.bf16 %v4276_v41, %v4275_v53  ;;  %v4262_v30 = vmax.f32 %v4198_v1, %v4200_v58  ;;  %v5274_v13 = vadd.f32 %v3924_v15, %v7660_v16  ;;  %v5290_v20 = vadd.f32 %v4150_v56, %v7660_v16 }
 0x39b   : > { %v4277_v6 = vmax.f32 %v7662_v26, %v4261_v33  ;;  %v4205_v31 = vmax.f32 %v5273_v14, 0.0  ;;  %v4207_v45 = vmax.f32 %v5289_v27, 0.0 }
 0x39c   : > { %4338 = vst [vmem:[%s7732_s26 + $0x8] sm:$0xff] %v4571_v63  ;;  %v4278_v55 = vmax.f32 %v7666_v21, %v4262_v30  ;;  %v4206_v52 = vmax.f32 %v5274_v13, 0.0  ;;  %v4208_v60 = vmax.f32 %v5290_v20, 0.0  ;;  %v3928_v18 = vpop.f32.mrb[88].mxu0  ;;  %v4154_v28 = vpop.f32.mrb[88].mxu1 }
 0x39d   : > { %v4263_v22 = vmax.f32 %v4205_v31, %v4207_v45  ;;  %v5275_v46 = vadd.f32 %v3928_v18, %v7670_v3  ;;  %v5291_v47 = vadd.f32 %v4154_v28, %v7670_v3  ;;  %v3930_v7 = vpop.f32.mrb[89].mxu0  ;;  %v4156_v44 = vpop.f32.mrb[89].mxu1 }
 0x39e   : > { %v4572_v16 = vpack.c.bf16 %v4278_v55, %v4277_v6  ;;  %v4264_v12 = vmax.f32 %v4206_v52, %v4208_v60  ;;  %v5276_v26 = vadd.f32 %v3930_v7, %v7670_v3  ;;  %v5292_v37 = vadd.f32 %v4156_v44, %v7670_v3 }
 0x39f   : > { %v4279_v21 = vmax.f32 %v7672_v39, %v4263_v22  ;;  %v4213_v29 = vmax.f32 %v5275_v46, 0.0  ;;  %v4215_v49 = vmax.f32 %v5291_v47, 0.0 }
 0x3a0   : > { %4339 = vst [vmem:[%s7732_s26 + $0x10] sm:$0xff] %v4572_v16  ;;  %v4280_v38 = vmax.f32 %v7676_v34, %v4264_v12  ;;  %v4214_v4 = vmax.f32 %v5276_v26, 0.0  ;;  %v4216_v9 = vmax.f32 %v5292_v37, 0.0  ;;  %v3934_v43 = vpop.f32.mrb[90].mxu0  ;;  %v4160_v35 = vpop.f32.mrb[90].mxu1 }
 0x3a1   : > { %v4265_v25 = vmax.f32 %v4213_v29, %v4215_v49  ;;  %v5277_v57 = vadd.f32 %v3934_v43, %v7680_v23  ;;  %v5293_v61 = vadd.f32 %v4160_v35, %v7680_v23  ;;  %v3936_v19 = vpop.f32.mrb[91].mxu0  ;;  %v4162_v42 = vpop.f32.mrb[91].mxu1 }
 0x3a2   : > { %v4573_v3 = vpack.c.bf16 %v4280_v38, %v4279_v21  ;;  %v4266_v48 = vmax.f32 %v4214_v4, %v4216_v9  ;;  %v5278_v39 = vadd.f32 %v3936_v19, %v7680_v23  ;;  %v5294_v54 = vadd.f32 %v4162_v42, %v7680_v23 }
 0x3a3   : > { %v4281_v34 = vmax.f32 %v7682_v17, %v4265_v25  ;;  %v4221_v5 = vmax.f32 %v5277_v57, 0.0  ;;  %v4223_v53 = vmax.f32 %v5293_v61, 0.0 }
 0x3a4   : > { %4340 = vst [vmem:[%s7732_s26 + $0x18] sm:$0xff] %v4573_v3  ;;  %v4282_v40 = vmax.f32 %v7686_v8, %v4266_v48  ;;  %v4222_v10 = vmax.f32 %v5278_v39, 0.0  ;;  %v4224_v41 = vmax.f32 %v5294_v54, 0.0  ;;  %v3940_v1 = vpop.f32.mrb[92].mxu0  ;;  %v4166_v58 = vpop.f32.mrb[92].mxu1 }
 0x3a5   : > { %v4267_v51 = vmax.f32 %v4221_v5, %v4223_v53  ;;  %v5279_v32 = vadd.f32 %v3940_v1, %v7690_v50  ;;  %v5295_v33 = vadd.f32 %v4166_v58, %v7690_v50  ;;  %v3942_v14 = vpop.f32.mrb[93].mxu0  ;;  %v4168_v27 = vpop.f32.mrb[93].mxu1 }
 0x3a6   : > { %v4574_v23 = vpack.c.bf16 %v4282_v40, %v4281_v34  ;;  %v4268_v15 = vmax.f32 %v4222_v10, %v4224_v41  ;;  %v5280_v17 = vadd.f32 %v3942_v14, %v7690_v50  ;;  %v5296_v56 = vadd.f32 %v4168_v27, %v7690_v50 }
 0x3a7   : > { %v4283_v8 = vmax.f32 %v7692_v59, %v4267_v51  ;;  %v4229_v63 = vmax.f32 %v5279_v32, 0.0  ;;  %v4231_v30 = vmax.f32 %v5295_v33, 0.0 }
 0x3a8   : > { %4341 = vst [vmem:[%s7732_s26 + $0x20] sm:$0xff] %v4574_v23  ;;  %v4284_v13 = vmax.f32 %v7696_v36, %v4268_v15  ;;  %v4230_v20 = vmax.f32 %v5280_v17, 0.0  ;;  %v4232_v6 = vmax.f32 %v5296_v56, 0.0  ;;  %v3946_v31 = vpop.f32.mrb[94].mxu0  ;;  %v4172_v45 = vpop.f32.mrb[94].mxu1 }
 0x3a9   : > { %v4269_v55 = vmax.f32 %v4229_v63, %v4231_v30  ;;  %v5281_v52 = vadd.f32 %v3946_v31, %v7700_v0  ;;  %v5297_v60 = vadd.f32 %v4172_v45, %v7700_v0  ;;  %v3948_v18 = vpop.f32.mrb[95].mxu0  ;;  %v4174_v50 = vpop.f32.mrb[95].mxu1 }
 0x3aa   : > { %v4575_v59 = vpack.c.bf16 %v4284_v13, %v4283_v8  ;;  %v4270_v28 = vmax.f32 %v4230_v20, %v4232_v6  ;;  %v5282_v22 = vadd.f32 %v3948_v18, %v7700_v0  ;;  %v5298_v36 = vadd.f32 %v4174_v50, %v7700_v0 }
 0x3ab   : > { %v4285_v46 = vmax.f32 %v7702_v62, %v4269_v55  ;;  %v4237_v47 = vmax.f32 %v5281_v52, 0.0  ;;  %v4239_v7 = vmax.f32 %v5297_v60, 0.0 }
 0x3ac   : > { %4342 = vst [vmem:[%s7732_s26 + $0x28] sm:$0xff] %v4575_v59  ;;  %v4286_v44 = vmax.f32 %v7706_v11, %v4270_v28  ;;  %v4238_v16 = vmax.f32 %v5282_v22, 0.0  ;;  %v4240_v12 = vmax.f32 %v5298_v36, 0.0 }
 0x3ad   : > { %v4271_v26 = vmax.f32 %v4237_v47, %v4239_v7 }
 0x3ae   : > { %v4576_v37 = vpack.c.bf16 %v4286_v44, %v4285_v46  ;;  %v4272_v21 = vmax.f32 %v4238_v16, %v4240_v12 }
 0x3af   : > { %v4287_v29 = vmax.f32 %v7710_v24, %v4271_v26 }
 0x3b0   : > { %4343 = vst [vmem:[%s7732_s26 + $0x30] sm:$0xff] %v4576_v37  ;;  %v4288_v0 = vmax.f32 %v7712_v2, %v4272_v21 }
 0x3b2   : > { %v4577_v62 = vpack.c.bf16 %v4288_v0, %v4287_v29 }
 0x3b4   : > { %4344 = vst [vmem:[%s7732_s26 + $0x38] sm:$0xff] %v4577_v62 }
 0x3b5   : > { %5670 = shalt.err (!%p5667_p3)
}
 0x3b6   : > { %s5671_s14 = scalar_lea.hbm %s7779_s10, 1024  ;;  %s5675_s17 = scalar_lea.hbm %s7832_s5, 2048 }
 0x3b7   : > { %p5672_p4 = scmp.ne.s32.totalorder %s7779_s10, %s5671_s14  ;;  %p5676_p9 = scmp.lt.u32.totalorder %s7779_s10, %s7832_s5 }
 0x3b8   : > { %p5677_p10 = scmp.lt.u32.totalorder %s5675_s17, %s5671_s14  ;;  %p5679_p12 = scmp.lt.u32.totalorder %s5671_s14, %s7779_s10 }
 0x3b9   : > { %p5673_p7 = pnand %p5672_p4, %p5803_p5 }
 0x3ba   : > { %p5678_p11 = por %p5677_p10, %p5676_p9 }
 0x3bb   : > { %p5674_p8 = pneg %p5673_p7 }
 0x3bc   : > { %p5680_p13 = por %p5679_p12, %p5678_p11 }
 0x3be   : > { %p5681_p0 = pnand %p5680_p13, %p5674_p8 }
 0x3c0   : > { %5684 = shalt.err (!%p5681_p0)
}
 0x3c1   : > { %s5733_s26 = smov 128   ;;  %s5734_s30 = smov 8  }
 0x3c2   : > { %5363 = dma.vmem_to_hbm [thread:$0]  (%p5803_p5), %s7781_s6, 1024, %s7779_s10, %s7786_s22, %s5733_s26, %s5733_s26, %s5734_s30  }
 0x3c3 PF: > { %p5369_p1 = scmp.ge.s32.totalorder %s5719_s21, 2  ;;  %s4374_s7 = sand.u32 1, %s5707_s18  }
 0x3c4   : > { %s4375_s8 = scalar_lea.sflag [#allocation4], %s4374_s7 }
 0x3c5   : > { %p5366_p2 = pnand %p5369_p1, %p5807_p6 }
 0x3c7   : > { %5702 = dma.done.wait (!%p5366_p2), %s4375_s8, 1024  }
 0x3c8   : > { %5704 = vsyncadd (!%p5366_p2), %s4375_s8, 4294966272  ;;  %p15_p3 = scmp.ge.s32.totalorder %s5790_s24, 4   ;;  %s7942_s18 = smov %s5711_s19 }
 0x3c9   : > { %s7943_s19 = smov %s5715_s20  ;;  %s7944_s20 = smov %s5801_s27 }
 0x3ca   : > { %s7945_s21 = smov %s5790_s24  ;;  %17 = sbr.rel (!%p15_p3) target bundleno = 3 (0x3), region = 75 }
 0x3d1   :  { %4380 = vsyncpa [#allocation4], 1 }
 0x3d2   :  { %4382 = vsyncpa [#allocation4 + $0x1], 1 }

</bundles_post_ra>
